<compile_context>
chip_gen: v6e
topology: v6e:2x2x1
jax: 0.10.0
libtpu: 0.0.40
codegen_flags: <defaults>
</compile_context>

<pallas_src>
import jax
import jax.numpy as jnp
from jax.experimental import pallas as pl
from jax.experimental.pallas import tpu as pltpu

EPS = 1e-5
LANE = 128                       # pad channels to a multiple of the lane width
VMEM_LIMIT = 48 * 1024 * 1024    # fits v7x (64 MiB physical), > 32 MiB default


def _round_up(x, m):
    return (x + m - 1) // m * m


# ----------------------------- Pallas kernels ------------------------------

def _conv3x3_stats_kernel(xp_ref, w_ref, y_ref, s_ref, q_ref):
    """Direct 3x3 conv (stride 1) on one image + BN partial-stats epilogue.

    xp_ref: (1, H+2, W+2, Ci)  spatially pre-padded, channel-padded input
    w_ref : (9, Ci, Co)        weights, tap-major (ki*3+kj), channel-padded
    y_ref : (1, H, W, Co)      conv output (f32)
    s_ref : (1, 8, Co)         per-channel sum of this tile (row-broadcast)
    q_ref : (1, 8, Co)         per-channel sum of squares of this tile
    """
    _, H, W, Co = y_ref.shape
    Ci = xp_ref.shape[3]

    x = xp_ref[0]                                    # (H+2, W+2, Ci), in VMEM
    acc = jnp.zeros((H * W, Co), jnp.float32)
    for t in range(9):                               # unrolled 9-tap conv
        ki, kj = divmod(t, 3)
        patch = x[ki:ki + H, kj:kj + W, :].reshape(H * W, Ci)
        acc = acc + jnp.dot(patch, w_ref[t],
                            preferred_element_type=jnp.float32)

    y_ref[0] = acc.reshape(H, W, Co).astype(y_ref.dtype)

    # BN partial stats while the tile is still resident (saves a full re-read
    # of y from HBM for the statistics pass).
    s = jnp.sum(acc, axis=0, keepdims=True)          # (1, Co)
    q = jnp.sum(acc * acc, axis=0, keepdims=True)    # (1, Co)
    s_ref[0] = jnp.broadcast_to(s, (8, Co))
    q_ref[0] = jnp.broadcast_to(q, (8, Co))


def _bn_relu_kernel(y_ref, ss_ref, o_ref):
    """Per-channel affine normalize (precomputed scale/shift) + ReLU."""
    scale = ss_ref[0:1, :]                           # (1, C)
    shift = ss_ref[1:2, :]
    o_ref[0] = jnp.maximum(y_ref[0] * scale + shift, 0.0).astype(o_ref.dtype)


def _bn_add_relu_kernel(y_ref, ss_ref, r_ref, o_ref):
    """Normalize + residual add + ReLU."""
    scale = ss_ref[0:1, :]
    shift = ss_ref[1:2, :]
    out = y_ref[0] * scale + shift + r_ref[0]
    o_ref[0] = jnp.maximum(out, 0.0).astype(o_ref.dtype)


# --------------------------- pallas_call wrappers ---------------------------

def conv3x3_with_stats(xp, w9):
    """xp: (N, H+2, W+2, Ci), w9: (9, Ci, Co) -> y (N,H,W,Co), sum, sumsq."""
    N, Hp, Wp, Ci = xp.shape
    H, W = Hp - 2, Wp - 2
    Co = w9.shape[2]
    return pl.pallas_call(
        _conv3x3_stats_kernel,
        out_shape=(
            jax.ShapeDtypeStruct((N, H, W, Co), jnp.float32),
            jax.ShapeDtypeStruct((N, 8, Co), jnp.float32),
            jax.ShapeDtypeStruct((N, 8, Co), jnp.float32),
        ),
        grid_spec=pltpu.PrefetchScalarGridSpec(
            num_scalar_prefetch=0,
            grid=(N,),
            in_specs=[
                pl.BlockSpec((1, Hp, Wp, Ci), lambda n: (n, 0, 0, 0)),
                # Grid-invariant weight block (index_map always (0,0,0)), so it
                # is not re-fetched per step.
                pl.BlockSpec((9, Ci, Co), lambda n: (0, 0, 0)),
            ],
            out_specs=(
                pl.BlockSpec((1, H, W, Co), lambda n: (n, 0, 0, 0)),
                pl.BlockSpec((1, 8, Co), lambda n: (n, 0, 0)),
                pl.BlockSpec((1, 8, Co), lambda n: (n, 0, 0)),
            ),
        ),
        compiler_params=pltpu.CompilerParams(
            dimension_semantics=("parallel",),
            vmem_limit_bytes=VMEM_LIMIT,
        ),
    )(xp, w9)


def bn_relu(y, ss):
    N, H, W, C = y.shape
    return pl.pallas_call(
        _bn_relu_kernel,
        out_shape=jax.ShapeDtypeStruct((N, H, W, C), jnp.float32),
        grid_spec=pltpu.PrefetchScalarGridSpec(
            num_scalar_prefetch=0,
            grid=(N,),
            in_specs=[
                pl.BlockSpec((1, H, W, C), lambda n: (n, 0, 0, 0)),
                pl.BlockSpec((8, C), lambda n: (0, 0)),
            ],
            out_specs=pl.BlockSpec((1, H, W, C), lambda n: (n, 0, 0, 0)),
        ),
        compiler_params=pltpu.CompilerParams(
            dimension_semantics=("parallel",),
            vmem_limit_bytes=VMEM_LIMIT,
        ),
    )(y, ss)


def bn_add_relu(y, ss, residual):
    N, H, W, C = y.shape
    return pl.pallas_call(
        _bn_add_relu_kernel,
        out_shape=jax.ShapeDtypeStruct((N, H, W, C), jnp.float32),
        grid_spec=pltpu.PrefetchScalarGridSpec(
            num_scalar_prefetch=0,
            grid=(N,),
            in_specs=[
                pl.BlockSpec((1, H, W, C), lambda n: (n, 0, 0, 0)),
                pl.BlockSpec((8, C), lambda n: (0, 0)),
                pl.BlockSpec((1, H, W, C), lambda n: (n, 0, 0, 0)),
            ],
            out_specs=pl.BlockSpec((1, H, W, C), lambda n: (n, 0, 0, 0)),
        ),
        compiler_params=pltpu.CompilerParams(
            dimension_semantics=("parallel",),
            vmem_limit_bytes=VMEM_LIMIT,
        ),
    )(y, ss, residual)


# ------------------------------ JAX glue -----------------------------------

def _prep_weight(w_oihw, ci_pad, co_pad):
    """(Cout, Cin, 3, 3) -> (9, ci_pad, co_pad), tap-major (ki, kj)."""
    co, ci = w_oihw.shape[0], w_oihw.shape[1]
    w = jnp.transpose(w_oihw.astype(jnp.float32), (2, 3, 1, 0)).reshape(9, ci, co)
    return jnp.pad(w, ((0, 0), (0, ci_pad - ci), (0, co_pad - co)))


def _bn_scale_shift(s, q, m_total):
    """Reduce per-tile partial sums -> per-channel (scale, shift) as (8, C)."""
    total_s = jnp.sum(s[:, 0, :], axis=0)            # (C,)
    total_q = jnp.sum(q[:, 0, :], axis=0)
    mean = total_s / m_total
    var = total_q / m_total - mean * mean            # biased variance
    scale = jax.lax.rsqrt(var + EPS)
    shift = -mean * scale
    ss = jnp.stack([scale, shift], axis=0)           # (2, C)
    return jnp.pad(ss, ((0, 6), (0, 0)))             # (8, C) aligned block


def basic_block_forward(x_nchw, w1_oihw, w2_oihw, conv_dtype=jnp.float32):
    """BasicBlock forward, downsample=None / stride=1 (identity residual).

    x: (N, C, H, W) f32, weights: (planes, C, 3, 3) / (planes, planes, 3, 3).
    Set conv_dtype=jnp.bfloat16 to use the native bf16 MXU path (f32 accum).
    """
    N, Cin, H, W = x_nchw.shape
    planes = w1_oihw.shape[0]
    assert planes == Cin, "downsample=None requires inplanes == planes"

    Cip = _round_up(Cin, LANE)
    Cop = _round_up(planes, LANE)
    M = N * H * W

    # NCHW -> NHWC, channel-pad to a lane-dense multiple of 128 (fused by XLA).
    x = jnp.transpose(x_nchw, (0, 2, 3, 1)).astype(jnp.float32)
    x = jnp.pad(x, ((0, 0), (0, 0), (0, 0), (0, Cip - Cin)))
    xs = jnp.pad(x, ((0, 0), (1, 1), (1, 1), (0, 0)))      # halo for conv1

    w1 = _prep_weight(w1_oihw, Cip, Cop)
    w2 = _prep_weight(w2_oihw, Cop, Cop)

    # conv1 (+ partial BN stats) -> bn1 -> relu
    y1, s1, q1 = conv3x3_with_stats(xs.astype(conv_dtype), w1.astype(conv_dtype))
    ss1 = _bn_scale_shift(s1, q1, M)
    o1 = bn_relu(y1, ss1)                                   # (N, H, W, Cop)

    # conv2 (+ partial BN stats) -> bn2 -> + residual -> relu
    # TODO(synk): fold this halo pad into the bn_relu kernel's store to save
    # one HBM round trip of the intermediate activation.
    o1p = jnp.pad(o1, ((0, 0), (1, 1), (1, 1), (0, 0)))
    y2, s2, q2 = conv3x3_with_stats(o1p.astype(conv_dtype), w2.astype(conv_dtype))
    ss2 = _bn_scale_shift(s2, q2, M)
    out = bn_add_relu(y2, ss2, x)                           # (N, H, W, Cop)

    out = out[..., :planes]
    return jnp.transpose(out, (0, 3, 1, 2))                 # back to NCHW


# --------------------------- pure-JAX reference ----------------------------

def ref_basic_block(x, w1, w2):
    def conv(x, w):
        return jax.lax.conv_general_dilated(
            x, w, (1, 1), ((1, 1), (1, 1)),
            dimension_numbers=("NCHW", "OIHW", "NCHW"))

    def bn(y):
        mean = jnp.mean(y, axis=(0, 2, 3), keepdims=True)
        var = jnp.mean(jnp.square(y - mean), axis=(0, 2, 3), keepdims=True)
        return (y - mean) / jnp.sqrt(var + EPS)

    out = jax.nn.relu(bn(conv(x, w1)))
    out = bn(conv(out, w2))
    return jax.nn.relu(out + x)


# --------------------------------- main ------------------------------------

if __name__ == "__main__":
    key = jax.random.PRNGKey(0)
    k_x, k_w1, k_w2 = jax.random.split(key, 3)

    N, C, H, W = 2, 4, 16, 16          # inplanes = planes = 4, stride = 1
    planes = C

    x = jax.random.normal(k_x, (N, C, H, W), dtype=jnp.float32)
    std = (2.0 / (9 * C)) ** 0.5
    w1 = jax.random.normal(k_w1, (planes, C, 3, 3), dtype=jnp.float32) * std
    w2 = jax.random.normal(k_w2, (planes, planes, 3, 3), dtype=jnp.float32) * std

    fwd = jax.jit(basic_block_forward)
    out = jax.block_until_ready(fwd(x, w1, w2))

    ref = ref_basic_block(x, w1, w2)
    assert out.shape == ref.shape, (out.shape, ref.shape)
    assert jnp.allclose(out, ref, atol=1e-4, rtol=1e-4), float(
        jnp.max(jnp.abs(out - ref)))

    print("KERNEL_OK")
</pallas_src>

<mosaic_0001>
module attributes {stable_mosaic.version = 11 : i64} {
  func.func @_conv3x3_stats_kernel(%arg0: i32, %arg1: memref<1x18x18x128xf32, #tpu.memory_space<vmem>>, %arg2: memref<9x128x128xf32, #tpu.memory_space<vmem>>, %arg3: memref<1x16x16x128xf32, #tpu.memory_space<vmem>>, %arg4: memref<1x8x128xf32, #tpu.memory_space<vmem>>, %arg5: memref<1x8x128xf32, #tpu.memory_space<vmem>>) attributes {dimension_semantics = [#tpu.dimension_semantics<parallel>], iteration_bounds = array<i64: 2>, scalar_prefetch = 0 : i64, scratch_operands = 0 : i64, tpu.core_type = #tpu.core_type<tc>, window_params = [{transform_indices = @transform_0, window_bounds = array<i64: 1, 18, 18, 128>}, {pipeline_mode = #tpu.pipeline_mode<synchronous>, transform_indices = @transform_1, window_bounds = array<i64: 9, 128, 128>}, {transform_indices = @transform_2, window_bounds = array<i64: 1, 16, 16, 128>}, {transform_indices = @transform_3, window_bounds = array<i64: 1, 8, 128>}, {transform_indices = @transform_4, window_bounds = array<i64: 1, 8, 128>}]} {
    %c0 = arith.constant 0 : index
    %c0_0 = arith.constant 0 : index
    %c0_1 = arith.constant 0 : index
    %c0_2 = arith.constant 0 : index
    %0 = vector.load %arg1[%c0, %c0_0, %c0_1, %c0_2] : memref<1x18x18x128xf32, #tpu.memory_space<vmem>>, vector<1x18x18x128xf32>
    %1 = vector.shape_cast %0 : vector<1x18x18x128xf32> to vector<18x18x128xf32>
    %cst = arith.constant 0.000000e+00 : f32
    %2 = vector.broadcast %cst : f32 to vector<256x128xf32>
    %3 = vector.extract_strided_slice %1 {offsets = [0, 0, 0], sizes = [16, 16, 128], strides = [1, 1, 1]} : vector<18x18x128xf32> to vector<16x16x128xf32>
    %4 = vector.shape_cast %3 : vector<16x16x128xf32> to vector<256x128xf32>
    %c0_3 = arith.constant 0 : index
    %c0_4 = arith.constant 0 : index
    %c0_5 = arith.constant 0 : index
    %5 = vector.load %arg2[%c0_3, %c0_4, %c0_5] : memref<9x128x128xf32, #tpu.memory_space<vmem>>, vector<1x128x128xf32>
    %6 = vector.shape_cast %5 : vector<1x128x128xf32> to vector<128x128xf32>
    %cst_6 = arith.constant dense<0.000000e+00> : vector<256x128xf32>
    %7 = tpu.matmul %4, %6, %cst_6 {dimension_numbers = #tpu.dot_dimension_numbers<[1], [0], [0], [1], [0, 0, 1, 1], [], []>} : vector<256x128xf32>, vector<128x128xf32>, vector<256x128xf32> -> vector<256x128xf32>
    %8 = arith.addf %2, %7 : vector<256x128xf32>
    %9 = vector.extract_strided_slice %1 {offsets = [0, 1, 0], sizes = [16, 16, 128], strides = [1, 1, 1]} : vector<18x18x128xf32> to vector<16x16x128xf32>
    %10 = vector.shape_cast %9 : vector<16x16x128xf32> to vector<256x128xf32>
    %c1 = arith.constant 1 : index
    %c0_7 = arith.constant 0 : index
    %c0_8 = arith.constant 0 : index
    %11 = vector.load %arg2[%c1, %c0_7, %c0_8] : memref<9x128x128xf32, #tpu.memory_space<vmem>>, vector<1x128x128xf32>
    %12 = vector.shape_cast %11 : vector<1x128x128xf32> to vector<128x128xf32>
    %cst_9 = arith.constant dense<0.000000e+00> : vector<256x128xf32>
    %13 = tpu.matmul %10, %12, %cst_9 {dimension_numbers = #tpu.dot_dimension_numbers<[1], [0], [0], [1], [0, 0, 1, 1], [], []>} : vector<256x128xf32>, vector<128x128xf32>, vector<256x128xf32> -> vector<256x128xf32>
    %14 = arith.addf %8, %13 : vector<256x128xf32>
    %15 = vector.extract_strided_slice %1 {offsets = [0, 2, 0], sizes = [16, 16, 128], strides = [1, 1, 1]} : vector<18x18x128xf32> to vector<16x16x128xf32>
    %16 = vector.shape_cast %15 : vector<16x16x128xf32> to vector<256x128xf32>
    %c2 = arith.constant 2 : index
    %c0_10 = arith.constant 0 : index
    %c0_11 = arith.constant 0 : index
    %17 = vector.load %arg2[%c2, %c0_10, %c0_11] : memref<9x128x128xf32, #tpu.memory_space<vmem>>, vector<1x128x128xf32>
    %18 = vector.shape_cast %17 : vector<1x128x128xf32> to vector<128x128xf32>
    %cst_12 = arith.constant dense<0.000000e+00> : vector<256x128xf32>
    %19 = tpu.matmul %16, %18, %cst_12 {dimension_numbers = #tpu.dot_dimension_numbers<[1], [0], [0], [1], [0, 0, 1, 1], [], []>} : vector<256x128xf32>, vector<128x128xf32>, vector<256x128xf32> -> vector<256x128xf32>
    %20 = arith.addf %14, %19 : vector<256x128xf32>
    %21 = vector.extract_strided_slice %1 {offsets = [1, 0, 0], sizes = [16, 16, 128], strides = [1, 1, 1]} : vector<18x18x128xf32> to vector<16x16x128xf32>
    %22 = vector.shape_cast %21 : vector<16x16x128xf32> to vector<256x128xf32>
    %c3 = arith.constant 3 : index
    %c0_13 = arith.constant 0 : index
    %c0_14 = arith.constant 0 : index
    %23 = vector.load %arg2[%c3, %c0_13, %c0_14] : memref<9x128x128xf32, #tpu.memory_space<vmem>>, vector<1x128x128xf32>
    %24 = vector.shape_cast %23 : vector<1x128x128xf32> to vector<128x128xf32>
    %cst_15 = arith.constant dense<0.000000e+00> : vector<256x128xf32>
    %25 = tpu.matmul %22, %24, %cst_15 {dimension_numbers = #tpu.dot_dimension_numbers<[1], [0], [0], [1], [0, 0, 1, 1], [], []>} : vector<256x128xf32>, vector<128x128xf32>, vector<256x128xf32> -> vector<256x128xf32>
    %26 = arith.addf %20, %25 : vector<256x128xf32>
    %27 = vector.extract_strided_slice %1 {offsets = [1, 1, 0], sizes = [16, 16, 128], strides = [1, 1, 1]} : vector<18x18x128xf32> to vector<16x16x128xf32>
    %28 = vector.shape_cast %27 : vector<16x16x128xf32> to vector<256x128xf32>
    %c4 = arith.constant 4 : index
    %c0_16 = arith.constant 0 : index
    %c0_17 = arith.constant 0 : index
    %29 = vector.load %arg2[%c4, %c0_16, %c0_17] : memref<9x128x128xf32, #tpu.memory_space<vmem>>, vector<1x128x128xf32>
    %30 = vector.shape_cast %29 : vector<1x128x128xf32> to vector<128x128xf32>
    %cst_18 = arith.constant dense<0.000000e+00> : vector<256x128xf32>
    %31 = tpu.matmul %28, %30, %cst_18 {dimension_numbers = #tpu.dot_dimension_numbers<[1], [0], [0], [1], [0, 0, 1, 1], [], []>} : vector<256x128xf32>, vector<128x128xf32>, vector<256x128xf32> -> vector<256x128xf32>
    %32 = arith.addf %26, %31 : vector<256x128xf32>
    %33 = vector.extract_strided_slice %1 {offsets = [1, 2, 0], sizes = [16, 16, 128], strides = [1, 1, 1]} : vector<18x18x128xf32> to vector<16x16x128xf32>
    %34 = vector.shape_cast %33 : vector<16x16x128xf32> to vector<256x128xf32>
    %c5 = arith.constant 5 : index
    %c0_19 = arith.constant 0 : index
    %c0_20 = arith.constant 0 : index
    %35 = vector.load %arg2[%c5, %c0_19, %c0_20] : memref<9x128x128xf32, #tpu.memory_space<vmem>>, vector<1x128x128xf32>
    %36 = vector.shape_cast %35 : vector<1x128x128xf32> to vector<128x128xf32>
    %cst_21 = arith.constant dense<0.000000e+00> : vector<256x128xf32>
    %37 = tpu.matmul %34, %36, %cst_21 {dimension_numbers = #tpu.dot_dimension_numbers<[1], [0], [0], [1], [0, 0, 1, 1], [], []>} : vector<256x128xf32>, vector<128x128xf32>, vector<256x128xf32> -> vector<256x128xf32>
    %38 = arith.addf %32, %37 : vector<256x128xf32>
    %39 = vector.extract_strided_slice %1 {offsets = [2, 0, 0], sizes = [16, 16, 128], strides = [1, 1, 1]} : vector<18x18x128xf32> to vector<16x16x128xf32>
    %40 = vector.shape_cast %39 : vector<16x16x128xf32> to vector<256x128xf32>
    %c6 = arith.constant 6 : index
    %c0_22 = arith.constant 0 : index
    %c0_23 = arith.constant 0 : index
    %41 = vector.load %arg2[%c6, %c0_22, %c0_23] : memref<9x128x128xf32, #tpu.memory_space<vmem>>, vector<1x128x128xf32>
    %42 = vector.shape_cast %41 : vector<1x128x128xf32> to vector<128x128xf32>
    %cst_24 = arith.constant dense<0.000000e+00> : vector<256x128xf32>
    %43 = tpu.matmul %40, %42, %cst_24 {dimension_numbers = #tpu.dot_dimension_numbers<[1], [0], [0], [1], [0, 0, 1, 1], [], []>} : vector<256x128xf32>, vector<128x128xf32>, vector<256x128xf32> -> vector<256x128xf32>
    %44 = arith.addf %38, %43 : vector<256x128xf32>
    %45 = vector.extract_strided_slice %1 {offsets = [2, 1, 0], sizes = [16, 16, 128], strides = [1, 1, 1]} : vector<18x18x128xf32> to vector<16x16x128xf32>
    %46 = vector.shape_cast %45 : vector<16x16x128xf32> to vector<256x128xf32>
    %c7 = arith.constant 7 : index
    %c0_25 = arith.constant 0 : index
    %c0_26 = arith.constant 0 : index
    %47 = vector.load %arg2[%c7, %c0_25, %c0_26] : memref<9x128x128xf32, #tpu.memory_space<vmem>>, vector<1x128x128xf32>
    %48 = vector.shape_cast %47 : vector<1x128x128xf32> to vector<128x128xf32>
    %cst_27 = arith.constant dense<0.000000e+00> : vector<256x128xf32>
    %49 = tpu.matmul %46, %48, %cst_27 {dimension_numbers = #tpu.dot_dimension_numbers<[1], [0], [0], [1], [0, 0, 1, 1], [], []>} : vector<256x128xf32>, vector<128x128xf32>, vector<256x128xf32> -> vector<256x128xf32>
    %50 = arith.addf %44, %49 : vector<256x128xf32>
    %51 = vector.extract_strided_slice %1 {offsets = [2, 2, 0], sizes = [16, 16, 128], strides = [1, 1, 1]} : vector<18x18x128xf32> to vector<16x16x128xf32>
    %52 = vector.shape_cast %51 : vector<16x16x128xf32> to vector<256x128xf32>
    %c8 = arith.constant 8 : index
    %c0_28 = arith.constant 0 : index
    %c0_29 = arith.constant 0 : index
    %53 = vector.load %arg2[%c8, %c0_28, %c0_29] : memref<9x128x128xf32, #tpu.memory_space<vmem>>, vector<1x128x128xf32>
    %54 = vector.shape_cast %53 : vector<1x128x128xf32> to vector<128x128xf32>
    %cst_30 = arith.constant dense<0.000000e+00> : vector<256x128xf32>
    %55 = tpu.matmul %52, %54, %cst_30 {dimension_numbers = #tpu.dot_dimension_numbers<[1], [0], [0], [1], [0, 0, 1, 1], [], []>} : vector<256x128xf32>, vector<128x128xf32>, vector<256x128xf32> -> vector<256x128xf32>
    %56 = arith.addf %50, %55 : vector<256x128xf32>
    %57 = vector.shape_cast %56 : vector<256x128xf32> to vector<16x16x128xf32>
    %c0_31 = arith.constant 0 : index
    %c0_32 = arith.constant 0 : index
    %c0_33 = arith.constant 0 : index
    %c0_34 = arith.constant 0 : index
    %58 = vector.load %arg3[%c0_31, %c0_32, %c0_33, %c0_34] : memref<1x16x16x128xf32, #tpu.memory_space<vmem>>, vector<1x16x16x128xf32>
    %59 = vector.shape_cast %58 : vector<1x16x16x128xf32> to vector<16x16x128xf32>
    %60 = vector.shape_cast %57 : vector<16x16x128xf32> to vector<1x16x16x128xf32>
    tpu.vector_store %arg3[%c0_31, %c0_32, %c0_33, %c0_34], %60 {strides = array<i32>} : memref<1x16x16x128xf32, #tpu.memory_space<vmem>>, vector<1x16x16x128xf32>,
    %cst_35 = arith.constant dense<0.000000e+00> : vector<128xf32>
    %61 = vector.multi_reduction <add>, %56, %cst_35 [0] : vector<256x128xf32> to vector<128xf32>
    %62 = vector.shape_cast %61 : vector<128xf32> to vector<1x128xf32>
    %63 = arith.mulf %56, %56 : vector<256x128xf32>
    %cst_36 = arith.constant dense<0.000000e+00> : vector<128xf32>
    %64 = vector.multi_reduction <add>, %63, %cst_36 [0] : vector<256x128xf32> to vector<128xf32>
    %65 = vector.shape_cast %64 : vector<128xf32> to vector<1x128xf32>
    %66 = vector.shape_cast %62 : vector<1x128xf32> to vector<1x128xf32>
    %67 = vector.broadcast %66 : vector<1x128xf32> to vector<8x128xf32>
    %c0_37 = arith.constant 0 : index
    %c0_38 = arith.constant 0 : index
    %c0_39 = arith.constant 0 : index
    %68 = vector.load %arg4[%c0_37, %c0_38, %c0_39] : memref<1x8x128xf32, #tpu.memory_space<vmem>>, vector<1x8x128xf32>
    %69 = vector.shape_cast %68 : vector<1x8x128xf32> to vector<8x128xf32>
    %70 = vector.shape_cast %67 : vector<8x128xf32> to vector<1x8x128xf32>
    tpu.vector_store %arg4[%c0_37, %c0_38, %c0_39], %70 {strides = array<i32>} : memref<1x8x128xf32, #tpu.memory_space<vmem>>, vector<1x8x128xf32>,
    %71 = vector.shape_cast %65 : vector<1x128xf32> to vector<1x128xf32>
    %72 = vector.broadcast %71 : vector<1x128xf32> to vector<8x128xf32>
    %c0_40 = arith.constant 0 : index
    %c0_41 = arith.constant 0 : index
    %c0_42 = arith.constant 0 : index
    %73 = vector.load %arg5[%c0_40, %c0_41, %c0_42] : memref<1x8x128xf32, #tpu.memory_space<vmem>>, vector<1x8x128xf32>
    %74 = vector.shape_cast %73 : vector<1x8x128xf32> to vector<8x128xf32>
    %75 = vector.shape_cast %72 : vector<8x128xf32> to vector<1x8x128xf32>
    tpu.vector_store %arg5[%c0_40, %c0_41, %c0_42], %75 {strides = array<i32>} : memref<1x8x128xf32, #tpu.memory_space<vmem>>, vector<1x8x128xf32>,
    return
  }
  func.func @transform_0(%arg0: i32) -> (i32, i32, i32, i32) {
    %c0_i32 = arith.constant 0 : i32
    %c0_i32_0 = arith.constant 0 : i32
    %c0_i32_1 = arith.constant 0 : i32
    %c0_i32_2 = arith.constant 0 : i32
    return %arg0, %c0_i32, %c0_i32_0, %c0_i32_1 : i32, i32, i32, i32
  }
  func.func @transform_1(%arg0: i32) -> (i32, i32, i32) {
    %c0_i32 = arith.constant 0 : i32
    %c0_i32_0 = arith.constant 0 : i32
    %c0_i32_1 = arith.constant 0 : i32
    %c0_i32_2 = arith.constant 0 : i32
    return %c0_i32, %c0_i32_0, %c0_i32_1 : i32, i32, i32
  }
  func.func @transform_2(%arg0: i32) -> (i32, i32, i32, i32) {
    %c0_i32 = arith.constant 0 : i32
    %c0_i32_0 = arith.constant 0 : i32
    %c0_i32_1 = arith.constant 0 : i32
    %c0_i32_2 = arith.constant 0 : i32
    return %arg0, %c0_i32, %c0_i32_0, %c0_i32_1 : i32, i32, i32, i32
  }
  func.func @transform_3(%arg0: i32) -> (i32, i32, i32) {
    %c0_i32 = arith.constant 0 : i32
    %c0_i32_0 = arith.constant 0 : i32
    %c0_i32_1 = arith.constant 0 : i32
    return %arg0, %c0_i32, %c0_i32_0 : i32, i32, i32
  }
  func.func @transform_4(%arg0: i32) -> (i32, i32, i32) {
    %c0_i32 = arith.constant 0 : i32
    %c0_i32_0 = arith.constant 0 : i32
    %c0_i32_1 = arith.constant 0 : i32
    return %arg0, %c0_i32, %c0_i32_0 : i32, i32, i32
  }
}

module attributes {stable_mosaic.version = 11 : i64} {
  func.func @_bn_add_relu_kernel(%arg0: i32, %arg1: memref<1x16x16x128xf32, #tpu.memory_space<vmem>>, %arg2: memref<8x128xf32, #tpu.memory_space<vmem>>, %arg3: memref<1x16x16x128xf32, #tpu.memory_space<vmem>>, %arg4: memref<1x16x16x128xf32, #tpu.memory_space<vmem>>) attributes {dimension_semantics = [#tpu.dimension_semantics<parallel>], iteration_bounds = array<i64: 2>, scalar_prefetch = 0 : i64, scratch_operands = 0 : i64, tpu.core_type = #tpu.core_type<tc>, window_params = [{transform_indices = @transform_0, window_bounds = array<i64: 1, 16, 16, 128>}, {pipeline_mode = #tpu.pipeline_mode<synchronous>, transform_indices = @transform_1, window_bounds = array<i64: 8, 128>}, {transform_indices = @transform_2, window_bounds = array<i64: 1, 16, 16, 128>}, {transform_indices = @transform_3, window_bounds = array<i64: 1, 16, 16, 128>}]} {
    %c0 = arith.constant 0 : index
    %c0_0 = arith.constant 0 : index
    %0 = vector.load %arg2[%c0, %c0_0] : memref<8x128xf32, #tpu.memory_space<vmem>>, vector<1x128xf32>
    %c1 = arith.constant 1 : index
    %c0_1 = arith.constant 0 : index
    %1 = vector.load %arg2[%c1, %c0_1] : memref<8x128xf32, #tpu.memory_space<vmem>>, vector<1x128xf32>
    %c0_2 = arith.constant 0 : index
    %c0_3 = arith.constant 0 : index
    %c0_4 = arith.constant 0 : index
    %c0_5 = arith.constant 0 : index
    %2 = vector.load %arg1[%c0_2, %c0_3, %c0_4, %c0_5] : memref<1x16x16x128xf32, #tpu.memory_space<vmem>>, vector<1x16x16x128xf32>
    %3 = vector.shape_cast %2 : vector<1x16x16x128xf32> to vector<16x16x128xf32>
    %4 = vector.shape_cast %0 : vector<1x128xf32> to vector<1x1x128xf32>
    %5 = vector.broadcast %4 : vector<1x1x128xf32> to vector<16x16x128xf32>
    %6 = arith.mulf %3, %5 : vector<16x16x128xf32>
    %7 = vector.shape_cast %1 : vector<1x128xf32> to vector<1x1x128xf32>
    %8 = vector.broadcast %7 : vector<1x1x128xf32> to vector<16x16x128xf32>
    %9 = arith.addf %6, %8 : vector<16x16x128xf32>
    %c0_6 = arith.constant 0 : index
    %c0_7 = arith.constant 0 : index
    %c0_8 = arith.constant 0 : index
    %c0_9 = arith.constant 0 : index
    %10 = vector.load %arg3[%c0_6, %c0_7, %c0_8, %c0_9] : memref<1x16x16x128xf32, #tpu.memory_space<vmem>>, vector<1x16x16x128xf32>
    %11 = vector.shape_cast %10 : vector<1x16x16x128xf32> to vector<16x16x128xf32>
    %12 = arith.addf %9, %11 : vector<16x16x128xf32>
    %cst = arith.constant 0.000000e+00 : f32
    %13 = vector.broadcast %cst : f32 to vector<16x16x128xf32>
    %14 = arith.maximumf %12, %13 : vector<16x16x128xf32>
    %c0_10 = arith.constant 0 : index
    %c0_11 = arith.constant 0 : index
    %c0_12 = arith.constant 0 : index
    %c0_13 = arith.constant 0 : index
    %15 = vector.load %arg4[%c0_10, %c0_11, %c0_12, %c0_13] : memref<1x16x16x128xf32, #tpu.memory_space<vmem>>, vector<1x16x16x128xf32>
    %16 = vector.shape_cast %15 : vector<1x16x16x128xf32> to vector<16x16x128xf32>
    %17 = vector.shape_cast %14 : vector<16x16x128xf32> to vector<1x16x16x128xf32>
    tpu.vector_store %arg4[%c0_10, %c0_11, %c0_12, %c0_13], %17 {strides = array<i32>} : memref<1x16x16x128xf32, #tpu.memory_space<vmem>>, vector<1x16x16x128xf32>,
    return
  }
  func.func @transform_0(%arg0: i32) -> (i32, i32, i32, i32) {
    %c0_i32 = arith.constant 0 : i32
    %c0_i32_0 = arith.constant 0 : i32
    %c0_i32_1 = arith.constant 0 : i32
    %c0_i32_2 = arith.constant 0 : i32
    return %arg0, %c0_i32, %c0_i32_0, %c0_i32_1 : i32, i32, i32, i32
  }
  func.func @transform_1(%arg0: i32) -> (i32, i32) {
    %c0_i32 = arith.constant 0 : i32
    %c0_i32_0 = arith.constant 0 : i32
    %c0_i32_1 = arith.constant 0 : i32
    return %c0_i32, %c0_i32_0 : i32, i32
  }
  func.func @transform_2(%arg0: i32) -> (i32, i32, i32, i32) {
    %c0_i32 = arith.constant 0 : i32
    %c0_i32_0 = arith.constant 0 : i32
    %c0_i32_1 = arith.constant 0 : i32
    %c0_i32_2 = arith.constant 0 : i32
    return %arg0, %c0_i32, %c0_i32_0, %c0_i32_1 : i32, i32, i32, i32
  }
  func.func @transform_3(%arg0: i32) -> (i32, i32, i32, i32) {
    %c0_i32 = arith.constant 0 : i32
    %c0_i32_0 = arith.constant 0 : i32
    %c0_i32_1 = arith.constant 0 : i32
    %c0_i32_2 = arith.constant 0 : i32
    return %arg0, %c0_i32, %c0_i32_0, %c0_i32_1 : i32, i32, i32, i32
  }
}

module attributes {stable_mosaic.version = 11 : i64} {
  func.func @_bn_relu_kernel(%arg0: i32, %arg1: memref<1x16x16x128xf32, #tpu.memory_space<vmem>>, %arg2: memref<8x128xf32, #tpu.memory_space<vmem>>, %arg3: memref<1x16x16x128xf32, #tpu.memory_space<vmem>>) attributes {dimension_semantics = [#tpu.dimension_semantics<parallel>], iteration_bounds = array<i64: 2>, scalar_prefetch = 0 : i64, scratch_operands = 0 : i64, tpu.core_type = #tpu.core_type<tc>, window_params = [{transform_indices = @transform_0, window_bounds = array<i64: 1, 16, 16, 128>}, {pipeline_mode = #tpu.pipeline_mode<synchronous>, transform_indices = @transform_1, window_bounds = array<i64: 8, 128>}, {transform_indices = @transform_2, window_bounds = array<i64: 1, 16, 16, 128>}]} {
    %c0 = arith.constant 0 : index
    %c0_0 = arith.constant 0 : index
    %0 = vector.load %arg2[%c0, %c0_0] : memref<8x128xf32, #tpu.memory_space<vmem>>, vector<1x128xf32>
    %c1 = arith.constant 1 : index
    %c0_1 = arith.constant 0 : index
    %1 = vector.load %arg2[%c1, %c0_1] : memref<8x128xf32, #tpu.memory_space<vmem>>, vector<1x128xf32>
    %c0_2 = arith.constant 0 : index
    %c0_3 = arith.constant 0 : index
    %c0_4 = arith.constant 0 : index
    %c0_5 = arith.constant 0 : index
    %2 = vector.load %arg1[%c0_2, %c0_3, %c0_4, %c0_5] : memref<1x16x16x128xf32, #tpu.memory_space<vmem>>, vector<1x16x16x128xf32>
    %3 = vector.shape_cast %2 : vector<1x16x16x128xf32> to vector<16x16x128xf32>
    %4 = vector.shape_cast %0 : vector<1x128xf32> to vector<1x1x128xf32>
    %5 = vector.broadcast %4 : vector<1x1x128xf32> to vector<16x16x128xf32>
    %6 = arith.mulf %3, %5 : vector<16x16x128xf32>
    %7 = vector.shape_cast %1 : vector<1x128xf32> to vector<1x1x128xf32>
    %8 = vector.broadcast %7 : vector<1x1x128xf32> to vector<16x16x128xf32>
    %9 = arith.addf %6, %8 : vector<16x16x128xf32>
    %cst = arith.constant 0.000000e+00 : f32
    %10 = vector.broadcast %cst : f32 to vector<16x16x128xf32>
    %11 = arith.maximumf %9, %10 : vector<16x16x128xf32>
    %c0_6 = arith.constant 0 : index
    %c0_7 = arith.constant 0 : index
    %c0_8 = arith.constant 0 : index
    %c0_9 = arith.constant 0 : index
    %12 = vector.load %arg3[%c0_6, %c0_7, %c0_8, %c0_9] : memref<1x16x16x128xf32, #tpu.memory_space<vmem>>, vector<1x16x16x128xf32>
    %13 = vector.shape_cast %12 : vector<1x16x16x128xf32> to vector<16x16x128xf32>
    %14 = vector.shape_cast %11 : vector<16x16x128xf32> to vector<1x16x16x128xf32>
    tpu.vector_store %arg3[%c0_6, %c0_7, %c0_8, %c0_9], %14 {strides = array<i32>} : memref<1x16x16x128xf32, #tpu.memory_space<vmem>>, vector<1x16x16x128xf32>,
    return
  }
  func.func @transform_0(%arg0: i32) -> (i32, i32, i32, i32) {
    %c0_i32 = arith.constant 0 : i32
    %c0_i32_0 = arith.constant 0 : i32
    %c0_i32_1 = arith.constant 0 : i32
    %c0_i32_2 = arith.constant 0 : i32
    return %arg0, %c0_i32, %c0_i32_0, %c0_i32_1 : i32, i32, i32, i32
  }
  func.func @transform_1(%arg0: i32) -> (i32, i32) {
    %c0_i32 = arith.constant 0 : i32
    %c0_i32_0 = arith.constant 0 : i32
    %c0_i32_1 = arith.constant 0 : i32
    return %c0_i32, %c0_i32_0 : i32, i32
  }
  func.func @transform_2(%arg0: i32) -> (i32, i32, i32, i32) {
    %c0_i32 = arith.constant 0 : i32
    %c0_i32_0 = arith.constant 0 : i32
    %c0_i32_1 = arith.constant 0 : i32
    %c0_i32_2 = arith.constant 0 : i32
    return %arg0, %c0_i32, %c0_i32_0, %c0_i32_1 : i32, i32, i32, i32
  }
}

</mosaic_0001>

<bundles_post_ra>
// kernel: basic_block_forward.5
= control target key start
LH: loop header
LB: loop body
LE: loop exit
PB: predicated region body
PF: predicated region fallthrough
CT: control target
= control target key end

     0   :  { %s415_s9 = smov 0   ;;  %s574_s0 = inlined_call_operand.vmem [shape: f32[2,16,16,128], index: 0, kind: input, shape index: {}]   ;;  %s575_s1 = inlined_call_operand.vmem [shape: f32[8,128], index: 1, kind: input, shape index: {}]   ;;  %s576_s2 = inlined_call_operand.vmem [shape: f32[2,16,16,128], index: 2, kind: output, shape index: {}]  }
   0x1 LB: > { %s369_s10 = sadd.s32 4294967295, %s398_s9   ;;  %p373_p0 = scmp.ge.s32.totalorder %s398_s9, 1  ;;  %s398_s9 = sphi %s415_s9, %s12_s9  }
   0x2   : > { %p112_p1 = scmp.lt.s32.totalorder %s398_s9, 3 }
   0x4   : > { %p113_p2 = pnand %p373_p0, %p112_p1 }
   0x5   : > { %p134_p3 = scmp.lt.s32.totalorder (!%p113_p2), %s369_s10, 1 }
   0x6   : > { %116 = sbr.rel (%p113_p2) target bundleno = 44 (0x2c), region = 28 }
   0xb   : > { %s578_s10 = smov (!%p134_p3, %s369_s10), 1  ;;  %v426_v0 = vld [vmem:[%s575_s1] ss:$0 sm:$0xff]  ;;  %v436_v1 = vld [vmem:[%s575_s1 + $0x1] ss:$0 sm:$0xff] }
   0xc   : > { %s382_s11 = sshll.u32 %s578_s10, 8 }
   0xd   : > { %s431_s16 = scalar_lea.vmem %s574_s0, %s382_s11  ;;  %s459_s21 = scalar_lea.vmem %s576_s2, %s382_s11 }
   0xe   : > { %v146_v2 = vld [vmem:[%s431_s16] sm:$0xff]  ;;  %v147_v3 = vld [vmem:[%s431_s16 + $0x8] sm:$0xff]  ;;  %v148_v4 = vld [vmem:[%s431_s16 + $0x10] sm:$0xff] }
   0xf   : > { %v182_v5 = vmul.f32 %v426_v0, %v146_v2  ;;  %v183_v6 = vmul.f32 %v426_v0, %v147_v3  ;;  %v184_v7 = vmul.f32 %v426_v0, %v148_v4  ;;  %v149_v8 = vld [vmem:[%s431_s16 + $0x18] sm:$0xff]  ;;  %v150_v9 = vld [vmem:[%s431_s16 + $0x20] sm:$0xff]  ;;  %v151_v10 = vld [vmem:[%s431_s16 + $0x28] sm:$0xff] }
  0x10   : > { %v185_v11 = vmul.f32 %v426_v0, %v149_v8  ;;  %v186_v12 = vmul.f32 %v426_v0, %v150_v9  ;;  %v187_v13 = vmul.f32 %v426_v0, %v151_v10  ;;  %v152_v14 = vld [vmem:[%s431_s16 + $0x30] sm:$0xff]  ;;  %v153_v15 = vld [vmem:[%s431_s16 + $0x38] sm:$0xff]  ;;  %v154_v24 = vld [vmem:[%s431_s16 + $0x40] sm:$0xff] }
  0x11   : > { %v218_v16 = vadd.f32 %v436_v1, %v182_v5  ;;  %v219_v17 = vadd.f32 %v436_v1, %v183_v6  ;;  %v220_v18 = vadd.f32 %v436_v1, %v184_v7  ;;  %v188_v19 = vmul.f32 %v426_v0, %v152_v14  ;;  %v155_v25 = vld [vmem:[%s431_s16 + $0x48] sm:$0xff]  ;;  %v156_v26 = vld [vmem:[%s431_s16 + $0x50] sm:$0xff]  ;;  %v157_v31 = vld [vmem:[%s431_s16 + $0x58] sm:$0xff] }
  0x12   : > { %v221_v20 = vadd.f32 %v436_v1, %v185_v11  ;;  %v222_v21 = vadd.f32 %v436_v1, %v186_v12  ;;  %v223_v22 = vadd.f32 %v436_v1, %v187_v13  ;;  %v189_v23 = vmul.f32 %v426_v0, %v153_v15  ;;  %v158_v32 = vld [vmem:[%s431_s16 + $0x60] sm:$0xff]  ;;  %v159_v33 = vld [vmem:[%s431_s16 + $0x68] sm:$0xff]  ;;  %v160_v38 = vld [vmem:[%s431_s16 + $0x70] sm:$0xff] }
  0x13   : > { %v250_v27 = vmax.f32 %v218_v16, 0.0  ;;  %v251_v28 = vmax.f32 %v219_v17, 0.0  ;;  %v252_v29 = vmax.f32 %v220_v18, 0.0  ;;  %v224_v30 = vadd.f32 %v436_v1, %v188_v19  ;;  %v161_v43 = vld [vmem:[%s431_s16 + $0x78] sm:$0xff]  ;;  %v162_v56 = vld [vmem:[%s431_s16 + $0x80] sm:$0xff]  ;;  %v163_v57 = vld [vmem:[%s431_s16 + $0x88] sm:$0xff] }
  0x14   : > { %v253_v34 = vmax.f32 %v221_v20, 0.0  ;;  %v254_v35 = vmax.f32 %v222_v21, 0.0  ;;  %v255_v36 = vmax.f32 %v223_v22, 0.0  ;;  %v225_v37 = vadd.f32 %v436_v1, %v189_v23  ;;  %v164_v58 = vld [vmem:[%s431_s16 + $0x90] sm:$0xff]  ;;  %v165_v63 = vld [vmem:[%s431_s16 + $0x98] sm:$0xff]  ;;  %v166_v2 = vld [vmem:[%s431_s16 + $0xa0] sm:$0xff] }
  0x15   : > { %282 = vst [vmem:[%s459_s21] sm:$0xff] %v250_v27  ;;  %283 = vst [vmem:[%s459_s21 + $0x8] sm:$0xff] %v251_v28  ;;  %v256_v39 = vmax.f32 %v224_v30, 0.0  ;;  %v190_v40 = vmul.f32 %v426_v0, %v154_v24  ;;  %v191_v41 = vmul.f32 %v426_v0, %v155_v25  ;;  %v192_v42 = vmul.f32 %v426_v0, %v156_v26  ;;  %v167_v3 = vld [vmem:[%s431_s16 + $0xa8] sm:$0xff]  ;;  %v168_v8 = vld [vmem:[%s431_s16 + $0xb0] sm:$0xff] }
  0x16   : > { %284 = vst [vmem:[%s459_s21 + $0x10] sm:$0xff] %v252_v29  ;;  %285 = vst [vmem:[%s459_s21 + $0x18] sm:$0xff] %v253_v34  ;;  %v257_v44 = vmax.f32 %v225_v37, 0.0  ;;  %v193_v45 = vmul.f32 %v426_v0, %v157_v31  ;;  %v194_v46 = vmul.f32 %v426_v0, %v158_v32  ;;  %v195_v47 = vmul.f32 %v426_v0, %v159_v33  ;;  %v169_v13 = vld [vmem:[%s431_s16 + $0xb8] sm:$0xff]  ;;  %v170_v26 = vld [vmem:[%s431_s16 + $0xc0] sm:$0xff] }
  0x17   : > { %286 = vst [vmem:[%s459_s21 + $0x20] sm:$0xff] %v254_v35  ;;  %287 = vst [vmem:[%s459_s21 + $0x28] sm:$0xff] %v255_v36  ;;  %v226_v48 = vadd.f32 %v436_v1, %v190_v40  ;;  %v227_v49 = vadd.f32 %v436_v1, %v191_v41  ;;  %v228_v50 = vadd.f32 %v436_v1, %v192_v42  ;;  %v171_v27 = vld [vmem:[%s431_s16 + $0xc8] sm:$0xff]  ;;  %v172_v28 = vld [vmem:[%s431_s16 + $0xd0] sm:$0xff] }
  0x18   : > { %288 = vst [vmem:[%s459_s21 + $0x30] sm:$0xff] %v256_v39  ;;  %v196_v51 = vmul.f32 %v426_v0, %v160_v38  ;;  %289 = vst [vmem:[%s459_s21 + $0x38] sm:$0xff] %v257_v44  ;;  %v229_v52 = vadd.f32 %v436_v1, %v193_v45  ;;  %v230_v53 = vadd.f32 %v436_v1, %v194_v46  ;;  %v173_v33 = vld [vmem:[%s431_s16 + $0xd8] sm:$0xff]  ;;  %v174_v34 = vld [vmem:[%s431_s16 + $0xe0] sm:$0xff] }
  0x19   : > { %v231_v54 = vadd.f32 %v436_v1, %v195_v47  ;;  %v197_v55 = vmul.f32 %v426_v0, %v161_v43  ;;  %v258_v59 = vmax.f32 %v226_v48, 0.0  ;;  %v259_v60 = vmax.f32 %v227_v49, 0.0  ;;  %v175_v35 = vld [vmem:[%s431_s16 + $0xe8] sm:$0xff]  ;;  %v176_v40 = vld [vmem:[%s431_s16 + $0xf0] sm:$0xff]  ;;  %v177_v45 = vld [vmem:[%s431_s16 + $0xf8] sm:$0xff] }
  0x1a   : > { %v260_v61 = vmax.f32 %v228_v50, 0.0  ;;  %v232_v62 = vadd.f32 %v436_v1, %v196_v51  ;;  %v261_v4 = vmax.f32 %v229_v52, 0.0  ;;  %v262_v5 = vmax.f32 %v230_v53, 0.0 }
  0x1b   : > { %v263_v6 = vmax.f32 %v231_v54, 0.0  ;;  %v233_v7 = vadd.f32 %v436_v1, %v197_v55  ;;  %290 = vst [vmem:[%s459_s21 + $0x40] sm:$0xff] %v258_v59  ;;  %291 = vst [vmem:[%s459_s21 + $0x48] sm:$0xff] %v259_v60  ;;  %v198_v10 = vmul.f32 %v426_v0, %v162_v56  ;;  %v199_v11 = vmul.f32 %v426_v0, %v163_v57 }
  0x1c   : > { %292 = vst [vmem:[%s459_s21 + $0x50] sm:$0xff] %v260_v61  ;;  %v264_v9 = vmax.f32 %v232_v62, 0.0  ;;  %v200_v12 = vmul.f32 %v426_v0, %v164_v58  ;;  %293 = vst [vmem:[%s459_s21 + $0x58] sm:$0xff] %v261_v4  ;;  %v201_v15 = vmul.f32 %v426_v0, %v165_v63  ;;  %v202_v16 = vmul.f32 %v426_v0, %v166_v2 }
  0x1d   : > { %294 = vst [vmem:[%s459_s21 + $0x60] sm:$0xff] %v262_v5  ;;  %295 = vst [vmem:[%s459_s21 + $0x68] sm:$0xff] %v263_v6  ;;  %v265_v14 = vmax.f32 %v233_v7, 0.0  ;;  %v203_v17 = vmul.f32 %v426_v0, %v167_v3  ;;  %v234_v18 = vadd.f32 %v436_v1, %v198_v10  ;;  %v235_v19 = vadd.f32 %v436_v1, %v199_v11 }
  0x1e   : > { %296 = vst [vmem:[%s459_s21 + $0x70] sm:$0xff] %v264_v9  ;;  %v236_v20 = vadd.f32 %v436_v1, %v200_v12  ;;  %v204_v21 = vmul.f32 %v426_v0, %v168_v8  ;;  %v237_v22 = vadd.f32 %v436_v1, %v201_v15  ;;  %v238_v23 = vadd.f32 %v436_v1, %v202_v16 }
  0x1f   : > { %297 = vst [vmem:[%s459_s21 + $0x78] sm:$0xff] %v265_v14  ;;  %v239_v24 = vadd.f32 %v436_v1, %v203_v17  ;;  %v205_v25 = vmul.f32 %v426_v0, %v169_v13  ;;  %v266_v29 = vmax.f32 %v234_v18, 0.0  ;;  %v267_v30 = vmax.f32 %v235_v19, 0.0 }
  0x20   : > { %v268_v31 = vmax.f32 %v236_v20, 0.0  ;;  %v240_v32 = vadd.f32 %v436_v1, %v204_v21  ;;  %v269_v36 = vmax.f32 %v237_v22, 0.0  ;;  %v270_v37 = vmax.f32 %v238_v23, 0.0 }
  0x21   : > { %v271_v38 = vmax.f32 %v239_v24, 0.0  ;;  %v241_v39 = vadd.f32 %v436_v1, %v205_v25  ;;  %298 = vst [vmem:[%s459_s21 + $0x80] sm:$0xff] %v266_v29  ;;  %299 = vst [vmem:[%s459_s21 + $0x88] sm:$0xff] %v267_v30  ;;  %v206_v42 = vmul.f32 %v426_v0, %v170_v26  ;;  %v207_v43 = vmul.f32 %v426_v0, %v171_v27 }
  0x22   : > { %300 = vst [vmem:[%s459_s21 + $0x90] sm:$0xff] %v268_v31  ;;  %v272_v41 = vmax.f32 %v240_v32, 0.0  ;;  %v208_v44 = vmul.f32 %v426_v0, %v172_v28  ;;  %301 = vst [vmem:[%s459_s21 + $0x98] sm:$0xff] %v269_v36  ;;  %v209_v47 = vmul.f32 %v426_v0, %v173_v33  ;;  %v210_v48 = vmul.f32 %v426_v0, %v174_v34 }
  0x23   : > { %302 = vst [vmem:[%s459_s21 + $0xa0] sm:$0xff] %v270_v37  ;;  %303 = vst [vmem:[%s459_s21 + $0xa8] sm:$0xff] %v271_v38  ;;  %v273_v46 = vmax.f32 %v241_v39, 0.0  ;;  %v211_v49 = vmul.f32 %v426_v0, %v175_v35  ;;  %v242_v50 = vadd.f32 %v436_v1, %v206_v42  ;;  %v243_v51 = vadd.f32 %v436_v1, %v207_v43 }
  0x24   : > { %304 = vst [vmem:[%s459_s21 + $0xb0] sm:$0xff] %v272_v41  ;;  %v244_v52 = vadd.f32 %v436_v1, %v208_v44  ;;  %v212_v53 = vmul.f32 %v426_v0, %v176_v40  ;;  %v245_v54 = vadd.f32 %v436_v1, %v209_v47  ;;  %v246_v55 = vadd.f32 %v436_v1, %v210_v48 }
  0x25   : > { %305 = vst [vmem:[%s459_s21 + $0xb8] sm:$0xff] %v273_v46  ;;  %v247_v56 = vadd.f32 %v436_v1, %v211_v49  ;;  %v213_v57 = vmul.f32 %v426_v0, %v177_v45  ;;  %v274_v58 = vmax.f32 %v242_v50, 0.0  ;;  %v275_v59 = vmax.f32 %v243_v51, 0.0 }
  0x26   : > { %v276_v60 = vmax.f32 %v244_v52, 0.0  ;;  %v248_v61 = vadd.f32 %v436_v1, %v212_v53  ;;  %v277_v62 = vmax.f32 %v245_v54, 0.0  ;;  %v278_v63 = vmax.f32 %v246_v55, 0.0 }
  0x27   : > { %v279_v2 = vmax.f32 %v247_v56, 0.0  ;;  %v249_v3 = vadd.f32 %v436_v1, %v213_v57  ;;  %306 = vst [vmem:[%s459_s21 + $0xc0] sm:$0xff] %v274_v58  ;;  %307 = vst [vmem:[%s459_s21 + $0xc8] sm:$0xff] %v275_v59 }
  0x28   : > { %308 = vst [vmem:[%s459_s21 + $0xd0] sm:$0xff] %v276_v60  ;;  %v280_v4 = vmax.f32 %v248_v61, 0.0  ;;  %309 = vst [vmem:[%s459_s21 + $0xd8] sm:$0xff] %v277_v62 }
  0x29   : > { %310 = vst [vmem:[%s459_s21 + $0xe0] sm:$0xff] %v278_v63  ;;  %311 = vst [vmem:[%s459_s21 + $0xe8] sm:$0xff] %v279_v2  ;;  %v281_v0 = vmax.f32 %v249_v3, 0.0 }
  0x2a   : > { %312 = vst [vmem:[%s459_s21 + $0xf0] sm:$0xff] %v280_v4 }
  0x2b   : > { %313 = vst [vmem:[%s459_s21 + $0xf8] sm:$0xff] %v281_v0 }
  0x2c PF: > { %s12_s9 = sadd.s32 1, %s398_s9  }
  0x2d   : > { %p9_p4 = scmp.ge.s32.totalorder %s12_s9, 4  }
  0x2f   :  { %11 = sbr.rel (!%p9_p4) target bundleno = 1 (0x1), region = 58 }

// kernel: basic_block_forward.7
= control target key start
LH: loop header
LB: loop body
LE: loop exit
PB: predicated region body
PF: predicated region fallthrough
CT: control target
= control target key end

     0   :  { %s546_s12 = smov 0   ;;  %s747_s0 = inlined_call_operand.vmem [shape: f32[2,16,16,128], index: 0, kind: input, shape index: {}]   ;;  %s748_s1 = inlined_call_operand.vmem [shape: f32[8,128], index: 1, kind: input, shape index: {}]   ;;  %s749_s2 = inlined_call_operand.vmem [shape: f32[2,16,16,128], index: 2, kind: input, shape index: {}]   ;;  %s750_s3 = inlined_call_operand.vmem [shape: f32[2,16,16,128], index: 3, kind: output, shape index: {}]  }
   0x1 LB: > { %s492_s13 = sadd.s32 4294967295, %s524_s12   ;;  %p496_p0 = scmp.ge.s32.totalorder %s524_s12, 1  ;;  %s524_s12 = sphi %s546_s12, %s13_s12  }
   0x2   : > { %p147_p1 = scmp.lt.s32.totalorder %s524_s12, 3 }
   0x4   : > { %p148_p2 = pnand %p496_p0, %p147_p1 }
   0x5   : > { %p176_p3 = scmp.lt.s32.totalorder (!%p148_p2), %s492_s13, 1 }
   0x6   : > { %151 = sbr.rel (%p148_p2) target bundleno = 53 (0x35), region = 32 }
   0xb   : > { %s752_s13 = smov (!%p176_p3, %s492_s13), 1  ;;  %v559_v0 = vld [vmem:[%s748_s1] ss:$0 sm:$0xff]  ;;  %v576_v1 = vld [vmem:[%s748_s1 + $0x1] ss:$0 sm:$0xff] }
   0xc   : > { %s554_s14 = sshll.u32 %s752_s13, 8 }
   0xd   : > { %s565_s19 = scalar_lea.vmem %s747_s0, %s554_s14  ;;  %s571_s22 = scalar_lea.vmem %s749_s2, %s554_s14 }
   0xe   : > { %v193_v2 = vld [vmem:[%s565_s19] sm:$0xff]  ;;  %v194_v3 = vld [vmem:[%s565_s19 + $0x8] sm:$0xff]  ;;  %v195_v7 = vld [vmem:[%s565_s19 + $0x10] sm:$0xff]  ;;  %s607_s27 = scalar_lea.vmem %s750_s3, %s554_s14 }
   0xf   : > { %v229_v4 = vmul.f32 %v559_v0, %v193_v2  ;;  %v297_v5 = vld [vmem:[%s571_s22] sm:$0xff]  ;;  %v230_v6 = vmul.f32 %v559_v0, %v194_v3  ;;  %v298_v8 = vld [vmem:[%s571_s22 + $0x8] sm:$0xff]  ;;  %v231_v9 = vmul.f32 %v559_v0, %v195_v7  ;;  %v196_v10 = vld [vmem:[%s565_s19 + $0x18] sm:$0xff] }
  0x10   : > { %v197_v11 = vld [vmem:[%s565_s19 + $0x20] sm:$0xff]  ;;  %v299_v14 = vld [vmem:[%s571_s22 + $0x10] sm:$0xff]  ;;  %v232_v15 = vmul.f32 %v559_v0, %v196_v10  ;;  %v300_v16 = vld [vmem:[%s571_s22 + $0x18] sm:$0xff] }
  0x11   : > { %v265_v12 = vadd.f32 %v576_v1, %v229_v4  ;;  %v266_v13 = vadd.f32 %v576_v1, %v230_v6  ;;  %v233_v17 = vmul.f32 %v559_v0, %v197_v11  ;;  %v198_v18 = vld [vmem:[%s565_s19 + $0x28] sm:$0xff]  ;;  %v267_v19 = vadd.f32 %v576_v1, %v231_v9  ;;  %v301_v20 = vld [vmem:[%s571_s22 + $0x20] sm:$0xff]  ;;  %v199_v22 = vld [vmem:[%s565_s19 + $0x30] sm:$0xff] }
  0x12   : > { %v234_v21 = vmul.f32 %v559_v0, %v198_v18  ;;  %v200_v23 = vld [vmem:[%s565_s19 + $0x38] sm:$0xff]  ;;  %v268_v26 = vadd.f32 %v576_v1, %v232_v15  ;;  %v302_v28 = vld [vmem:[%s571_s22 + $0x28] sm:$0xff]  ;;  %v235_v31 = vmul.f32 %v559_v0, %v199_v22  ;;  %v201_v33 = vld [vmem:[%s565_s19 + $0x40] sm:$0xff] }
  0x13   : > { %v329_v24 = vadd.f32 %v297_v5, %v265_v12  ;;  %v330_v25 = vadd.f32 %v298_v8, %v266_v13  ;;  %v269_v27 = vadd.f32 %v576_v1, %v233_v17  ;;  %v331_v29 = vadd.f32 %v299_v14, %v267_v19  ;;  %v202_v34 = vld [vmem:[%s565_s19 + $0x48] sm:$0xff]  ;;  %v303_v39 = vld [vmem:[%s571_s22 + $0x30] sm:$0xff]  ;;  %v304_v40 = vld [vmem:[%s571_s22 + $0x38] sm:$0xff] }
  0x14   : > { %v270_v30 = vadd.f32 %v576_v1, %v234_v21  ;;  %v236_v32 = vmul.f32 %v559_v0, %v200_v23  ;;  %v332_v37 = vadd.f32 %v300_v16, %v268_v26  ;;  %v203_v41 = vld [vmem:[%s565_s19 + $0x50] sm:$0xff]  ;;  %v271_v44 = vadd.f32 %v576_v1, %v235_v31  ;;  %v204_v46 = vld [vmem:[%s565_s19 + $0x58] sm:$0xff]  ;;  %v205_v47 = vld [vmem:[%s565_s19 + $0x60] sm:$0xff] }
  0x15   : > { %v361_v35 = vmax.f32 %v329_v24, 0.0  ;;  %v362_v36 = vmax.f32 %v330_v25, 0.0  ;;  %v333_v38 = vadd.f32 %v301_v20, %v269_v27  ;;  %v363_v42 = vmax.f32 %v331_v29, 0.0  ;;  %v206_v52 = vld [vmem:[%s565_s19 + $0x68] sm:$0xff]  ;;  %v305_v56 = vld [vmem:[%s571_s22 + $0x40] sm:$0xff]  ;;  %v307_v61 = vld [vmem:[%s571_s22 + $0x50] sm:$0xff] }
  0x16   : > { %v334_v43 = vadd.f32 %v302_v28, %v270_v30  ;;  %v272_v45 = vadd.f32 %v576_v1, %v236_v32  ;;  %v364_v48 = vmax.f32 %v332_v37, 0.0  ;;  %v237_v50 = vmul.f32 %v559_v0, %v201_v33  ;;  %v306_v57 = vld [vmem:[%s571_s22 + $0x48] sm:$0xff]  ;;  %v207_v2 = vld [vmem:[%s565_s19 + $0x70] sm:$0xff]  ;;  %v208_v3 = vld [vmem:[%s565_s19 + $0x78] sm:$0xff] }
  0x17   : > { %393 = vst [vmem:[%s607_s27] sm:$0xff] %v361_v35  ;;  %394 = vst [vmem:[%s607_s27 + $0x8] sm:$0xff] %v362_v36  ;;  %v365_v49 = vmax.f32 %v333_v38, 0.0  ;;  %v238_v51 = vmul.f32 %v559_v0, %v202_v34  ;;  %v335_v54 = vadd.f32 %v303_v39, %v271_v44  ;;  %v239_v58 = vmul.f32 %v559_v0, %v203_v41  ;;  %v308_v7 = vld [vmem:[%s571_s22 + $0x58] sm:$0xff]  ;;  %v309_v8 = vld [vmem:[%s571_s22 + $0x60] sm:$0xff] }
  0x18   : > { %395 = vst [vmem:[%s607_s27 + $0x10] sm:$0xff] %v363_v42  ;;  %v366_v53 = vmax.f32 %v334_v43, 0.0  ;;  %v336_v55 = vadd.f32 %v304_v40, %v272_v45  ;;  %396 = vst [vmem:[%s607_s27 + $0x18] sm:$0xff] %v364_v48  ;;  %v273_v59 = vadd.f32 %v576_v1, %v237_v50  ;;  %v240_v62 = vmul.f32 %v559_v0, %v204_v46  ;;  %v310_v14 = vld [vmem:[%s571_s22 + $0x68] sm:$0xff]  ;;  %v209_v19 = vld [vmem:[%s565_s19 + $0x80] sm:$0xff] }
  0x19   : > { %397 = vst [vmem:[%s607_s27 + $0x20] sm:$0xff] %v365_v49  ;;  %v274_v60 = vadd.f32 %v576_v1, %v238_v51  ;;  %v241_v63 = vmul.f32 %v559_v0, %v205_v47  ;;  %v367_v4 = vmax.f32 %v335_v54, 0.0  ;;  %v275_v6 = vadd.f32 %v576_v1, %v239_v58  ;;  %v210_v20 = vld [vmem:[%s565_s19 + $0x88] sm:$0xff]  ;;  %v311_v25 = vld [vmem:[%s571_s22 + $0x70] sm:$0xff]  ;;  %v312_v26 = vld [vmem:[%s571_s22 + $0x78] sm:$0xff] }
  0x1a   : > { %398 = vst [vmem:[%s607_s27 + $0x28] sm:$0xff] %v366_v53  ;;  %v368_v5 = vmax.f32 %v336_v55, 0.0  ;;  %v242_v9 = vmul.f32 %v559_v0, %v206_v52  ;;  %v337_v10 = vadd.f32 %v305_v56, %v273_v59  ;;  %v276_v12 = vadd.f32 %v576_v1, %v240_v62  ;;  %v211_v27 = vld [vmem:[%s565_s19 + $0x90] sm:$0xff]  ;;  %v212_v32 = vld [vmem:[%s565_s19 + $0x98] sm:$0xff]  ;;  %v213_v33 = vld [vmem:[%s565_s19 + $0xa0] sm:$0xff] }
  0x1b   : > { %v338_v11 = vadd.f32 %v306_v57, %v274_v60  ;;  %v277_v13 = vadd.f32 %v576_v1, %v241_v63  ;;  %399 = vst [vmem:[%s607_s27 + $0x30] sm:$0xff] %v367_v4  ;;  %v339_v15 = vadd.f32 %v307_v61, %v275_v6  ;;  %v243_v17 = vmul.f32 %v559_v0, %v207_v2  ;;  %v214_v38 = vld [vmem:[%s565_s19 + $0xa8] sm:$0xff]  ;;  %v313_v42 = vld [vmem:[%s571_s22 + $0x80] sm:$0xff]  ;;  %v315_v47 = vld [vmem:[%s571_s22 + $0x90] sm:$0xff] }
  0x1c   : > { %400 = vst [vmem:[%s607_s27 + $0x38] sm:$0xff] %v368_v5  ;;  %v278_v16 = vadd.f32 %v576_v1, %v242_v9  ;;  %v244_v18 = vmul.f32 %v559_v0, %v208_v3  ;;  %v369_v21 = vmax.f32 %v337_v10, 0.0  ;;  %v340_v23 = vadd.f32 %v308_v7, %v276_v12  ;;  %v314_v43 = vld [vmem:[%s571_s22 + $0x88] sm:$0xff]  ;;  %v215_v50 = vld [vmem:[%s565_s19 + $0xb0] sm:$0xff]  ;;  %v216_v51 = vld [vmem:[%s565_s19 + $0xb8] sm:$0xff] }
  0x1d   : > { %v370_v22 = vmax.f32 %v338_v11, 0.0  ;;  %v341_v24 = vadd.f32 %v309_v8, %v277_v13  ;;  %v371_v28 = vmax.f32 %v339_v15, 0.0  ;;  %v279_v30 = vadd.f32 %v576_v1, %v243_v17  ;;  %v316_v55 = vld [vmem:[%s571_s22 + $0x98] sm:$0xff]  ;;  %v317_v56 = vld [vmem:[%s571_s22 + $0xa0] sm:$0xff]  ;;  %v318_v62 = vld [vmem:[%s571_s22 + $0xa8] sm:$0xff] }
  0x1e   : > { %v342_v29 = vadd.f32 %v310_v14, %v278_v16  ;;  %v280_v31 = vadd.f32 %v576_v1, %v244_v18  ;;  %401 = vst [vmem:[%s607_s27 + $0x40] sm:$0xff] %v369_v21  ;;  %v372_v34 = vmax.f32 %v340_v23, 0.0  ;;  %v245_v36 = vmul.f32 %v559_v0, %v209_v19  ;;  %v217_v5 = vld [vmem:[%s565_s19 + $0xc0] sm:$0xff]  ;;  %v218_v6 = vld [vmem:[%s565_s19 + $0xc8] sm:$0xff]  ;;  %v319_v11 = vld [vmem:[%s571_s22 + $0xb0] sm:$0xff] }
  0x1f   : > { %402 = vst [vmem:[%s607_s27 + $0x48] sm:$0xff] %v370_v22  ;;  %v373_v35 = vmax.f32 %v341_v24, 0.0  ;;  %v246_v37 = vmul.f32 %v559_v0, %v210_v20  ;;  %403 = vst [vmem:[%s607_s27 + $0x50] sm:$0xff] %v371_v28  ;;  %v343_v40 = vadd.f32 %v311_v25, %v279_v30  ;;  %v247_v44 = vmul.f32 %v559_v0, %v211_v27  ;;  %v320_v12 = vld [vmem:[%s571_s22 + $0xb8] sm:$0xff]  ;;  %v219_v13 = vld [vmem:[%s565_s19 + $0xd0] sm:$0xff] }
  0x20   : > { %v374_v39 = vmax.f32 %v342_v29, 0.0  ;;  %v344_v41 = vadd.f32 %v312_v26, %v280_v31  ;;  %404 = vst [vmem:[%s607_s27 + $0x58] sm:$0xff] %v372_v34  ;;  %v281_v45 = vadd.f32 %v576_v1, %v245_v36  ;;  %v248_v48 = vmul.f32 %v559_v0, %v212_v32  ;;  %v220_v18 = vld [vmem:[%s565_s19 + $0xd8] sm:$0xff]  ;;  %v221_v19 = vld [vmem:[%s565_s19 + $0xe0] sm:$0xff]  ;;  %v222_v24 = vld [vmem:[%s565_s19 + $0xe8] sm:$0xff] }
  0x21   : > { %405 = vst [vmem:[%s607_s27 + $0x60] sm:$0xff] %v373_v35  ;;  %v282_v46 = vadd.f32 %v576_v1, %v246_v37  ;;  %v249_v49 = vmul.f32 %v559_v0, %v213_v33  ;;  %v375_v52 = vmax.f32 %v343_v40, 0.0  ;;  %v283_v54 = vadd.f32 %v576_v1, %v247_v44  ;;  %v321_v28 = vld [vmem:[%s571_s22 + $0xc0] sm:$0xff]  ;;  %v322_v29 = vld [vmem:[%s571_s22 + $0xc8] sm:$0xff]  ;;  %v323_v33 = vld [vmem:[%s571_s22 + $0xd0] sm:$0xff] }
  0x22   : > { %406 = vst [vmem:[%s607_s27 + $0x68] sm:$0xff] %v374_v39  ;;  %v376_v53 = vmax.f32 %v344_v41, 0.0  ;;  %v250_v57 = vmul.f32 %v559_v0, %v214_v38  ;;  %v345_v58 = vadd.f32 %v313_v42, %v281_v45  ;;  %v284_v60 = vadd.f32 %v576_v1, %v248_v48  ;;  %v223_v36 = vld [vmem:[%s565_s19 + $0xf0] sm:$0xff]  ;;  %v224_v37 = vld [vmem:[%s565_s19 + $0xf8] sm:$0xff]  ;;  %v325_v42 = vld [vmem:[%s571_s22 + $0xe0] sm:$0xff] }
  0x23   : > { %v346_v59 = vadd.f32 %v314_v43, %v282_v46  ;;  %v285_v61 = vadd.f32 %v576_v1, %v249_v49  ;;  %407 = vst [vmem:[%s607_s27 + $0x70] sm:$0xff] %v375_v52  ;;  %v347_v63 = vadd.f32 %v315_v47, %v283_v54  ;;  %v251_v3 = vmul.f32 %v559_v0, %v215_v50  ;;  %v324_v41 = vld [vmem:[%s571_s22 + $0xd8] sm:$0xff]  ;;  %v326_v48 = vld [vmem:[%s571_s22 + $0xe8] sm:$0xff] }
  0x24   : > { %408 = vst [vmem:[%s607_s27 + $0x78] sm:$0xff] %v376_v53  ;;  %v286_v2 = vadd.f32 %v576_v1, %v250_v57  ;;  %v252_v4 = vmul.f32 %v559_v0, %v216_v51  ;;  %v377_v7 = vmax.f32 %v345_v58, 0.0  ;;  %v348_v9 = vadd.f32 %v316_v55, %v284_v60  ;;  %v327_v57 = vld [vmem:[%s571_s22 + $0xf0] sm:$0xff]  ;;  %v328_v58 = vld [vmem:[%s571_s22 + $0xf8] sm:$0xff] }
  0x25   : > { %v378_v8 = vmax.f32 %v346_v59, 0.0  ;;  %v349_v10 = vadd.f32 %v317_v56, %v285_v61  ;;  %v379_v14 = vmax.f32 %v347_v63, 0.0  ;;  %v287_v16 = vadd.f32 %v576_v1, %v251_v3 }
  0x26   : > { %v350_v15 = vadd.f32 %v318_v62, %v286_v2  ;;  %v288_v17 = vadd.f32 %v576_v1, %v252_v4  ;;  %409 = vst [vmem:[%s607_s27 + $0x80] sm:$0xff] %v377_v7  ;;  %v380_v20 = vmax.f32 %v348_v9, 0.0  ;;  %v253_v22 = vmul.f32 %v559_v0, %v217_v5 }
  0x27   : > { %410 = vst [vmem:[%s607_s27 + $0x88] sm:$0xff] %v378_v8  ;;  %v381_v21 = vmax.f32 %v349_v10, 0.0  ;;  %v254_v23 = vmul.f32 %v559_v0, %v218_v6  ;;  %411 = vst [vmem:[%s607_s27 + $0x90] sm:$0xff] %v379_v14  ;;  %v351_v26 = vadd.f32 %v319_v11, %v287_v16  ;;  %v255_v30 = vmul.f32 %v559_v0, %v219_v13 }
  0x28   : > { %v382_v25 = vmax.f32 %v350_v15, 0.0  ;;  %v352_v27 = vadd.f32 %v320_v12, %v288_v17  ;;  %412 = vst [vmem:[%s607_s27 + $0x98] sm:$0xff] %v380_v20  ;;  %v289_v31 = vadd.f32 %v576_v1, %v253_v22  ;;  %v256_v34 = vmul.f32 %v559_v0, %v220_v18 }
  0x29   : > { %413 = vst [vmem:[%s607_s27 + $0xa0] sm:$0xff] %v381_v21  ;;  %v290_v32 = vadd.f32 %v576_v1, %v254_v23  ;;  %v257_v35 = vmul.f32 %v559_v0, %v221_v19  ;;  %v383_v38 = vmax.f32 %v351_v26, 0.0  ;;  %v291_v40 = vadd.f32 %v576_v1, %v255_v30 }
  0x2a   : > { %414 = vst [vmem:[%s607_s27 + $0xa8] sm:$0xff] %v382_v25  ;;  %v384_v39 = vmax.f32 %v352_v27, 0.0  ;;  %v258_v43 = vmul.f32 %v559_v0, %v222_v24  ;;  %v353_v44 = vadd.f32 %v321_v28, %v289_v31  ;;  %v292_v46 = vadd.f32 %v576_v1, %v256_v34 }
  0x2b   : > { %v354_v45 = vadd.f32 %v322_v29, %v290_v32  ;;  %v293_v47 = vadd.f32 %v576_v1, %v257_v35  ;;  %415 = vst [vmem:[%s607_s27 + $0xb0] sm:$0xff] %v383_v38  ;;  %v355_v49 = vadd.f32 %v323_v33, %v291_v40  ;;  %v259_v51 = vmul.f32 %v559_v0, %v223_v36 }
  0x2c   : > { %416 = vst [vmem:[%s607_s27 + $0xb8] sm:$0xff] %v384_v39  ;;  %v294_v50 = vadd.f32 %v576_v1, %v258_v43  ;;  %v260_v52 = vmul.f32 %v559_v0, %v224_v37  ;;  %v385_v53 = vmax.f32 %v353_v44, 0.0  ;;  %v356_v55 = vadd.f32 %v324_v41, %v292_v46 }
  0x2d   : > { %v386_v54 = vmax.f32 %v354_v45, 0.0  ;;  %v357_v56 = vadd.f32 %v325_v42, %v293_v47  ;;  %v387_v59 = vmax.f32 %v355_v49, 0.0  ;;  %v295_v61 = vadd.f32 %v576_v1, %v259_v51 }
  0x2e   : > { %v358_v60 = vadd.f32 %v326_v48, %v294_v50  ;;  %v296_v62 = vadd.f32 %v576_v1, %v260_v52  ;;  %417 = vst [vmem:[%s607_s27 + $0xc0] sm:$0xff] %v385_v53  ;;  %v388_v0 = vmax.f32 %v356_v55, 0.0 }
  0x2f   : > { %418 = vst [vmem:[%s607_s27 + $0xc8] sm:$0xff] %v386_v54  ;;  %v389_v63 = vmax.f32 %v357_v56, 0.0  ;;  %419 = vst [vmem:[%s607_s27 + $0xd0] sm:$0xff] %v387_v59  ;;  %v359_v3 = vadd.f32 %v327_v57, %v295_v61 }
  0x30   : > { %v390_v2 = vmax.f32 %v358_v60, 0.0  ;;  %v360_v4 = vadd.f32 %v328_v58, %v296_v62  ;;  %420 = vst [vmem:[%s607_s27 + $0xd8] sm:$0xff] %v388_v0 }
  0x31   : > { %421 = vst [vmem:[%s607_s27 + $0xe0] sm:$0xff] %v389_v63  ;;  %v391_v5 = vmax.f32 %v359_v3, 0.0 }
  0x32   : > { %422 = vst [vmem:[%s607_s27 + $0xe8] sm:$0xff] %v390_v2  ;;  %v392_v6 = vmax.f32 %v360_v4, 0.0 }
  0x33   : > { %423 = vst [vmem:[%s607_s27 + $0xf0] sm:$0xff] %v391_v5 }
  0x34   : > { %424 = vst [vmem:[%s607_s27 + $0xf8] sm:$0xff] %v392_v6 }
  0x35 PF: > { %s13_s12 = sadd.s32 1, %s524_s12  }
  0x36   : > { %p10_p4 = scmp.ge.s32.totalorder %s13_s12, 4  }
  0x38   :  { %12 = sbr.rel (!%p10_p4) target bundleno = 1 (0x1), region = 65 }

// kernel: basic_block_forward.4
= control target key start
LH: loop header
LB: loop body
LE: loop exit
PB: predicated region body
PF: predicated region fallthrough
CT: control target
= control target key end

     0   :  { %s4634_s15 = smov 0   ;;  %s6378_s0 = inlined_call_operand.vmem [shape: f32[2,18,18,128], index: 0, kind: input, shape index: {}]   ;;  %s6379_s1 = inlined_call_operand.vmem [shape: f32[9,128,128], index: 1, kind: input, shape index: {}]   ;;  %s6380_s2 = inlined_call_operand.vmem [shape: f32[2,16,16,128], index: 2, kind: output, shape index: {0}]   ;;  %s6381_s3 = inlined_call_operand.vmem [shape: f32[2,8,128], index: 3, kind: output, shape index: {1}]   ;;  %s6382_s4 = inlined_call_operand.vmem [shape: f32[2,8,128], index: 4, kind: output, shape index: {2}]  }
   0x1 LB: > { %s3239_s16 = sadd.s32 4294967295, %s4607_s15   ;;  %p3243_p0 = scmp.ge.s32.totalorder %s4607_s15, 1  ;;  %s4607_s15 = sphi %s4634_s15, %s15_s15  }
   0x2   : > { %p167_p1 = scmp.lt.s32.totalorder %s4607_s15, 3 }
   0x4   : > { %p168_p2 = pnand %p3243_p0, %p167_p1 }
   0x6   : > { %171 = sbr.rel (%p168_p2) target bundleno = 563 (0x233), region = 28 }
   0xb   : > { %v3264_v0 = vld [vmem:[%s6379_s1 + $0xf8] sm:$0xff]  ;;  %v3263_v1 = vld [vmem:[%s6379_s1 + $0xf0] sm:$0xff]  ;;  %v3262_v2 = vld [vmem:[%s6379_s1 + $0xe8] sm:$0xff]  ;;  %p201_p3 = scmp.lt.s32.totalorder %s3239_s16, 1  ;;  %vm337_vm0 = vcmask 1046528   ;;  %vm917_vm1 = vcmask 1045504  }
   0xc   : > { %4532 = vmatprep.subr.mxu1 %v3264_v0  ;;  %3812 = vmatprep.subr.mxu0 %v3264_v0  ;;  %v3261_v3 = vld [vmem:[%s6379_s1 + $0xe0] sm:$0xff]  ;;  %v3260_v4 = vld [vmem:[%s6379_s1 + $0xd8] sm:$0xff]  ;;  %v3259_v5 = vld [vmem:[%s6379_s1 + $0xd0] sm:$0xff] }
   0xd   : > { %4548 = vmatpush3.msra.mxu1 %v3264_v0  ;;  %3813 = vmatpush3.msra.mxu0 %v3264_v0  ;;  %v3258_v6 = vld [vmem:[%s6379_s1 + $0xc8] sm:$0xff]  ;;  %s6646_s16 = smov (!%p201_p3, %s3239_s16), 1  ;;  %v3257_v7 = vld [vmem:[%s6379_s1 + $0xc0] sm:$0xff]  ;;  %v3256_v8 = vld [vmem:[%s6379_s1 + $0xb8] sm:$0xff] }
   0xe   : > { %4533 = vmatprep.subr.mxu1 %v3263_v1  ;;  %3814 = vmatprep.subr.mxu0 %v3263_v1  ;;  %s4564_s9 = smul.u32 432, %s6646_s16  ;;  %v3255_v9 = vld [vmem:[%s6379_s1 + $0xb0] sm:$0xff]  ;;  %v3254_v10 = vld [vmem:[%s6379_s1 + $0xa8] sm:$0xff]  ;;  %v3253_v11 = vld [vmem:[%s6379_s1 + $0xa0] sm:$0xff] }
   0xf   : > { %4549 = vmatpush3.msra.mxu1 %v3263_v1  ;;  %3815 = vmatpush3.msra.mxu0 %v3263_v1  ;;  %v3252_v12 = vld [vmem:[%s6379_s1 + $0x98] sm:$0xff]  ;;  %v3251_v17 = vld [vmem:[%s6379_s1 + $0x90] sm:$0xff]  ;;  %v3250_v22 = vld [vmem:[%s6379_s1 + $0x88] sm:$0xff] }
  0x10   : > { %4534 = vmatprep.subr.mxu1 %v3262_v2  ;;  %3816 = vmatprep.subr.mxu0 %v3262_v2  ;;  %s4685_s18 = scalar_lea.vmem %s6378_s0, %s4564_s9  ;;  %v3249_v28 = vld [vmem:[%s6379_s1 + $0x80] sm:$0xff]  ;;  %v288_v38 = vld [vmem:[%s6379_s1 + $0x78] sm:$0xff]  ;;  %v287_v45 = vld [vmem:[%s6379_s1 + $0x70] sm:$0xff]  ;;  %s3247_s9 = sshll.u32 %s6646_s16, 3 }
  0x11   : > { %4550 = vmatpush3.msra.mxu1 %v3262_v2  ;;  %3817 = vmatpush3.msra.mxu0 %v3262_v2  ;;  %v4694_v13 = vld [vmem:[%s4685_s18 + $0xc0] sm:$0xff]  ;;  %v4697_v14 = vld [vmem:[%s4685_s18 + $0xc8] sm:$0xff]  ;;  %v4709_v18 = vld [vmem:[%s4685_s18 + $0xd0] sm:$0x3]  ;;  %s214_s12 = scalar_lea.vmem %s6381_s3, %s3247_s9  ;;  %s218_s17 = scalar_lea.vmem %s6382_s4, %s3247_s9 }
  0x12   : > { %4535 = vmatprep.subr.mxu1 %v3261_v3  ;;  %3818 = vmatprep.subr.mxu0 %v3261_v3  ;;  %v4700_v15 = vld [vmem:[%s4685_s18] sm:$0xff]  ;;  %v4703_v16 = vld [vmem:[%s4685_s18 + $0x8] sm:$0xff]  ;;  %v378_v19 = vrot.slane %v4694_v13, 1  ;;  %v379_v20 = vrot.slane %v4697_v14, 1  ;;  %v4714_v21 = vld [vmem:[%s4685_s18 + $0x10] sm:$0x3] }
  0x13   : > { %4551 = vmatpush3.msra.mxu1 %v3261_v3  ;;  %3819 = vmatpush3.msra.mxu0 %v3261_v3  ;;  %v338_v23 = vrot.slane %v4700_v15, 1  ;;  %v339_v24 = vrot.slane %v4703_v16, 1  ;;  %v381_v25 = vrot.slane %v4709_v18, 1  ;;  %v4723_v26 = vld [vmem:[%s4685_s18 + $0xd8] sm:$0xff]  ;;  %v4726_v27 = vld [vmem:[%s4685_s18 + $0xe0] sm:$0xff]  ;;  %v341_v29 = vrot.slane %v4714_v21, 1 }
  0x14   : > { %4536 = vmatprep.subr.mxu1 %v3260_v4  ;;  %3820 = vmatprep.subr.mxu0 %v3260_v4  ;;  %v4733_v30 = vsel %vm337_vm0, %v378_v19, %v379_v20  ;;  %v4736_v31 = vld [vmem:[%s4685_s18 + $0x18] sm:$0xff]  ;;  %v4739_v32 = vld [vmem:[%s4685_s18 + $0x20] sm:$0xff]  ;;  %v4742_v33 = vld [vmem:[%s4685_s18 + $0xe8] sm:$0x3]  ;;  %v383_v35 = vrot.slane %v4723_v26, 1  ;;  %v384_v36 = vrot.slane %v4726_v27, 1 }
  0x15   : > { %4552 = vmatpush3.msra.mxu1 %v3260_v4  ;;  %3821 = vmatpush3.msra.mxu0 %v3260_v4  ;;  %6448 = vst [vmem:[#allocation2_spill] sm:$0xff] %v4733_v30  ;;  %v340_v34 = vsel %vm337_vm0, %v338_v23, %v339_v24  ;;  %v4748_v37 = vsel %vm337_vm0, %v379_v20, %v381_v25  ;;  %v4754_v39 = vld [vmem:[%s4685_s18 + $0x28] sm:$0x3]  ;;  %v3280_v41 = vld [vmem:[%s6379_s1 + $0x178] sm:$0xff]  ;;  %v343_v42 = vrot.slane %v4736_v31, 1  ;;  %v344_v43 = vrot.slane %v4739_v32, 1 }
  0x16   : > { %4537 = vmatprep.subr.mxu1 %v3259_v5  ;;  %3822 = vmatprep.subr.mxu0 %v3259_v5  ;;  %6449 = vst [vmem:[#allocation3_spill] sm:$0xff] %v4748_v37  ;;  %v342_v40 = vsel %vm337_vm0, %v339_v24, %v341_v29  ;;  %v386_v44 = vrot.slane %v4742_v33, 1  ;;  %v4768_v46 = vld [vmem:[%s4685_s18 + $0xf0] sm:$0xff]  ;;  %v4771_v47 = vld [vmem:[%s4685_s18 + $0xf8] sm:$0xff]  ;;  %v4775_v48 = vsel %vm337_vm0, %v383_v35, %v384_v36  ;;  %v346_v50 = vrot.slane %v4754_v39, 1  ;;  %v286_v58 = vld [vmem:[%s6379_s1 + $0x68] sm:$0xff] }
  0x17   : > { %4553 = vmatpush3.msra.mxu1 %v3259_v5  ;;  %3823 = vmatpush3.msra.mxu0 %v3259_v5  ;;  %6450 = vst [vmem:[#allocation4_spill] sm:$0xff] %v4775_v48  ;;  %v3279_v49 = vld [vmem:[%s6379_s1 + $0x170] sm:$0xff]  ;;  %v4785_v52 = vld [vmem:[%s4685_s18 + $0x38] sm:$0xff]  ;;  %v4788_v53 = vld [vmem:[%s4685_s18 + $0x100] sm:$0x3]  ;;  %v4791_v54 = vsel %vm337_vm0, %v343_v42, %v344_v43  ;;  %v388_v56 = vrot.slane %v4768_v46, 1 }
  0x18   : > { %4538 = vmatprep.subr.mxu1 %v3258_v6  ;;  %3824 = vmatprep.subr.mxu0 %v3258_v6  ;;  %v4782_v51 = vld [vmem:[%s4685_s18 + $0x30] sm:$0xff]  ;;  %v4794_v55 = vsel %vm337_vm0, %v384_v36, %v386_v44  ;;  %v389_v57 = vrot.slane %v4771_v47, 1  ;;  %v4803_v59 = vld [vmem:[%s4685_s18 + $0x40] sm:$0x3]  ;;  %v4806_v60 = vsel %vm337_vm0, %v344_v43, %v346_v50  ;;  %v3278_v61 = vld [vmem:[%s6379_s1 + $0x168] sm:$0xff]  ;;  %v349_v63 = vrot.slane %v4785_v52, 1 }
  0x19   : > { %4554 = vmatpush3.msra.mxu1 %v3258_v6  ;;  %3825 = vmatpush3.msra.mxu0 %v3258_v6  ;;  %6451 = vst [vmem:[#allocation5_spill] sm:$0xff] %v4794_v55  ;;  %6452 = vst [vmem:[#allocation6_spill] sm:$0xff] %v4806_v60  ;;  %v348_v62 = vrot.slane %v4782_v51, 1  ;;  %v391_v0 = vrot.slane %v4788_v53, 1  ;;  %v285_v1 = vld [vmem:[%s6379_s1 + $0x60] sm:$0xff]  ;;  %v4820_v2 = vld [vmem:[%s4685_s18 + $0x108] sm:$0xff] }
  0x1a   : > { %4539 = vmatprep.subr.mxu1 %v3257_v7  ;;  %3826 = vmatprep.subr.mxu0 %v3257_v7  ;;  %v4823_v3 = vld [vmem:[%s4685_s18 + $0x110] sm:$0xff]  ;;  %v4826_v4 = vsel %vm337_vm0, %v388_v56, %v389_v57  ;;  %v3277_v5 = vld [vmem:[%s6379_s1 + $0x160] sm:$0xff]  ;;  %v351_v6 = vrot.slane %v4803_v59, 1  ;;  %v284_v19 = vld [vmem:[%s6379_s1 + $0x58] sm:$0xff] }
  0x1b   : > { %4555 = vmatpush3.msra.mxu1 %v3257_v7  ;;  %3827 = vmatpush3.msra.mxu0 %v3257_v7  ;;  %6453 = vst [vmem:[#allocation7_spill] sm:$0xff] %v4826_v4  ;;  %v4834_v7 = vld [vmem:[%s4685_s18 + $0x48] sm:$0xff]  ;;  %v4855_v20 = vld [vmem:[%s4685_s18 + $0x58] sm:$0x3]  ;;  %v283_v29 = vld [vmem:[%s6379_s1 + $0x50] sm:$0xff] }
  0x1c   : > { %4540 = vmatprep.subr.mxu1 %v3256_v8  ;;  %3828 = vmatprep.subr.mxu0 %v3256_v8  ;;  %v3276_v23 = vld [vmem:[%s6379_s1 + $0x158] sm:$0xff]  ;;  %v353_v24 = vrot.slane %v4834_v7, 1  ;;  %v4875_v35 = vld [vmem:[%s4685_s18 + $0x128] sm:$0xff]  ;;  %v4892_v43 = vld [vmem:[%s4685_s18 + $0x130] sm:$0x3] }
  0x1d   : > { %4556 = vmatpush3.msra.mxu1 %v3256_v8  ;;  %3829 = vmatpush3.msra.mxu0 %v3256_v8  ;;  %v4837_v8 = vld [vmem:[%s4685_s18 + $0x50] sm:$0xff]  ;;  %v4889_v42 = vld [vmem:[%s4685_s18 + $0x68] sm:$0xff]  ;;  %v399_v50 = vrot.slane %v4875_v35, 1 }
  0x1e   : > { %4541 = vmatprep.subr.mxu1 %v3255_v9  ;;  %3830 = vmatprep.subr.mxu0 %v3255_v9  ;;  %v354_v25 = vrot.slane %v4837_v8, 1  ;;  %v282_v56 = vld [vmem:[%s6379_s1 + $0x48] sm:$0xff] }
  0x1f   : > { %4557 = vmatpush3.msra.mxu1 %v3255_v9  ;;  %3831 = vmatpush3.msra.mxu0 %v3255_v9  ;;  %v4840_v9 = vld [vmem:[%s4685_s18 + $0x118] sm:$0x3] }
  0x20   : > { %4542 = vmatprep.subr.mxu1 %v3254_v10  ;;  %3832 = vmatprep.subr.mxu0 %v3254_v10  ;;  %v4895_v44 = vsel %vm337_vm0, %v353_v24, %v354_v25  ;;  %v4941_v24 = vld [vmem:[%s4685_s18 + $0x80] sm:$0xff] }
  0x21   : > { %4558 = vmatpush3.msra.mxu1 %v3254_v10  ;;  %3833 = vmatpush3.msra.mxu0 %v3254_v10  ;;  %v4843_v10 = vsel %vm337_vm0, %v348_v62, %v349_v63  ;;  %6458 = vst [vmem:[#allocation12_spill] sm:$0xff] %v4895_v44 }
  0x22   : > { %4543 = vmatprep.subr.mxu1 %v3253_v11  ;;  %3834 = vmatprep.subr.mxu0 %v3253_v11  ;;  %6454 = vst [vmem:[#allocation8_spill] sm:$0xff] %v4843_v10 }
  0x23   : > { %4559 = vmatpush3.msra.mxu1 %v3253_v11  ;;  %3835 = vmatpush3.msra.mxu0 %v3253_v11  ;;  %v4846_v11 = vsel %vm337_vm0, %v389_v57, %v391_v0  ;;  %v4907_v57 = vld [vmem:[%s4685_s18 + $0x70] sm:$0x3]  ;;  %v401_v0 = vrot.slane %v4892_v43, 1 }
  0x24   : > { %4544 = vmatprep.subr.mxu1 %v3252_v12  ;;  %3836 = vmatprep.subr.mxu0 %v3252_v12  ;;  %6455 = vst [vmem:[#allocation9_spill] sm:$0xff] %v4846_v11 }
  0x25   : > { %4560 = vmatpush3.msra.mxu1 %v3252_v12  ;;  %3837 = vmatpush3.msra.mxu0 %v3252_v12  ;;  %v393_v12 = vrot.slane %v4820_v2, 1 }
  0x26   : > { %4545 = vmatprep.subr.mxu1 %v3251_v17  ;;  %3838 = vmatprep.subr.mxu0 %v3251_v17 }
  0x27   : > { %4561 = vmatpush3.msra.mxu1 %v3251_v17  ;;  %3839 = vmatpush3.msra.mxu0 %v3251_v17  ;;  %v394_v17 = vrot.slane %v4823_v3, 1 }
  0x28   : > { %4546 = vmatprep.subr.mxu1 %v3250_v22  ;;  %3840 = vmatprep.subr.mxu0 %v3250_v22 }
  0x29   : > { %4562 = vmatpush3.msra.mxu1 %v3250_v22  ;;  %3841 = vmatpush3.msra.mxu0 %v3250_v22  ;;  %v4858_v22 = vsel %vm337_vm0, %v349_v63, %v351_v6  ;;  %v4878_v36 = vsel %vm337_vm0, %v393_v12, %v394_v17  ;;  %v359_v63 = vrot.slane %v4889_v42, 1  ;;  %v4927_v6 = vld [vmem:[%s4685_s18 + $0x140] sm:$0xff] }
  0x2a   : > { %4547 = vmatprep.subr.mxu1 %v3249_v28  ;;  %3842 = vmatprep.subr.mxu0 %v3249_v28  ;;  %6456 = vst [vmem:[#allocation10_spill] sm:$0xff] %v4858_v22  ;;  %6457 = vst [vmem:[#allocation11_spill] sm:$0xff] %v4878_v36 }
  0x2b   : > { %4563 = vmatpush3.msra.mxu1 %v3249_v28  ;;  %3868 = vmatprep.mubr.f32.mxu1 %v4733_v30  ;;  %v5011_v30 = vld [vmem:[%s4685_s18 + $0xa0] sm:$0x3] }
  0x2c   : > { %3843 = vmatpush3.msra.mxu0 %v3249_v28  ;;  %3844 = vmatprep.mubr.f32.mxu0 %v340_v34  ;;  %v396_v28 = vrot.slane %v4840_v9, 1  ;;  %v4872_v34 = vld [vmem:[%s4685_s18 + $0x120] sm:$0xff] }
  0x2d   : > { %3869 = vmatmul.mubr.f32.vlgmr.msra.gmra.mxu1 %v4748_v37  ;;  %3892 = vmatprep.subr.mxu1 %v288_v38 }
  0x2e   : > { %3845 = vmatmul.mubr.f32.vlgmr.msra.gmra.mxu0 %v342_v40  ;;  %3893 = vmatpush3.msra.mxu1 %v288_v38  ;;  %v3275_v38 = vld [vmem:[%s6379_s1 + $0x150] sm:$0xff]  ;;  %v356_v40 = vrot.slane %v4855_v20, 1 }
  0x2f   : > { %3972 = vmatprep.subr.mxu0 %v3280_v41  ;;  %3894 = vmatprep.subr.mxu1 %v287_v45 }
  0x30   : > { %3973 = vmatpush3.msra.mxu0 %v3280_v41  ;;  %3871 = vmatprep.mubr.f32.mxu1 %v4775_v48  ;;  %v4886_v41 = vld [vmem:[%s4685_s18 + $0x60] sm:$0xff] }
  0x31   : > { %3895 = vmatpush3.msra.mxu1 %v287_v45  ;;  %3974 = vmatprep.subr.mxu0 %v3279_v49  ;;  %v4898_v45 = vsel %vm337_vm0, %v394_v17, %v396_v28  ;;  %v358_v62 = vrot.slane %v4886_v41, 1  ;;  %v3273_v17 = vld [vmem:[%s6379_s1 + $0x140] sm:$0xff] }
  0x32   : > { %3847 = vmatprep.mubr.f32.mxu0 %v4791_v54  ;;  %3872 = vmatmul.mubr.f32.gmra.mxu1 %v4794_v55  ;;  %6459 = vst [vmem:[#allocation13_spill] sm:$0xff] %v4898_v45  ;;  %v4996_v55 = vld [vmem:[%s4685_s18 + $0x160] sm:$0x3] }
  0x33   : > { %3896 = vmatprep.subr.mxu1 %v286_v58  ;;  %3975 = vmatpush3.msra.mxu0 %v3279_v49  ;;  %v398_v49 = vrot.slane %v4872_v34, 1  ;;  %v4947_v28 = vsel %vm337_vm0, %v358_v62, %v359_v63  ;;  %v3272_v62 = vld [vmem:[%s6379_s1 + $0x138] sm:$0xff] }
  0x34   : > { %3848 = vmatmul.mubr.f32.gmra.mxu0 %v4806_v60  ;;  %3897 = vmatpush3.msra.mxu1 %v286_v58  ;;  %v4910_v58 = vsel %vm337_vm0, %v354_v25, %v356_v40  ;;  %v4944_v25 = vld [vmem:[%s4685_s18 + $0x148] sm:$0x3]  ;;  %6462 = vst [vmem:[#allocation16_spill] sm:$0xff] %v4947_v28  ;;  %v404_v40 = vrot.slane %v4927_v6, 1 }
  0x35   : > { %3976 = vmatprep.subr.mxu0 %v3278_v61  ;;  %3898 = vmatprep.subr.mxu1 %v285_v1  ;;  %6460 = vst [vmem:[#allocation14_spill] sm:$0xff] %v4910_v58  ;;  %v4930_v12 = vsel %vm337_vm0, %v398_v49, %v399_v50  ;;  %v280_v49 = vld [vmem:[%s6379_s1 + $0x38] sm:$0xff] }
  0x36   : > { %3977 = vmatpush3.msra.mxu0 %v3278_v61  ;;  %3874 = vmatprep.mubr.f32.mxu1 %v4826_v4  ;;  %v3274_v61 = vld [vmem:[%s6379_s1 + $0x148] sm:$0xff]  ;;  %6461 = vst [vmem:[#allocation15_spill] sm:$0xff] %v4930_v12  ;;  %v4993_v4 = vld [vmem:[%s4685_s18 + $0x98] sm:$0xff] }
  0x37   : > { %3899 = vmatpush3.msra.mxu1 %v285_v1  ;;  %3978 = vmatprep.subr.mxu0 %v3277_v5  ;;  %v281_v1 = vld [vmem:[%s6379_s1 + $0x40] sm:$0xff] }
  0x38   : > { %3850 = vmatprep.mubr.f32.mxu0 %v4843_v10  ;;  %3875 = vmatmul.mubr.f32.gmra.mxu1 %v4846_v11  ;;  %v4990_v11 = vld [vmem:[%s4685_s18 + $0x90] sm:$0xff] }
  0x39   : > { %3900 = vmatprep.subr.mxu1 %v284_v19  ;;  %3979 = vmatpush3.msra.mxu0 %v3277_v5  ;;  %v4924_v5 = vld [vmem:[%s4685_s18 + $0x138] sm:$0xff] }
  0x3a   : > { %3851 = vmatmul.mubr.f32.gmra.mxu0 %v4858_v22  ;;  %3901 = vmatpush3.msra.mxu1 %v284_v19  ;;  %v361_v19 = vrot.slane %v4907_v57, 1 }
  0x3b   : > { %3980 = vmatprep.subr.mxu0 %v3276_v23  ;;  %3902 = vmatprep.subr.mxu1 %v283_v29 }
  0x3c   : > { %3981 = vmatpush3.msra.mxu0 %v3276_v23  ;;  %3877 = vmatprep.mubr.f32.mxu1 %v4878_v36  ;;  %v4938_v23 = vld [vmem:[%s4685_s18 + $0x78] sm:$0xff]  ;;  %v3271_v36 = vld [vmem:[%s6379_s1 + $0x130] sm:$0xff] }
  0x3d   : > { %3903 = vmatpush3.msra.mxu1 %v283_v29  ;;  %3982 = vmatprep.subr.mxu0 %v3275_v38  ;;  %v4950_v29 = vsel %vm337_vm0, %v399_v50, %v401_v0  ;;  %v4962_v50 = vsel %vm337_vm0, %v359_v63, %v361_v19  ;;  %v364_v0 = vrot.slane %v4941_v24, 1  ;;  %v279_v63 = vld [vmem:[%s6379_s1 + $0x30] sm:$0xff]  ;;  %v4979_v19 = vld [vmem:[%s4685_s18 + $0x158] sm:$0xff] }
  0x3e   : > { %3853 = vmatprep.mubr.f32.mxu0 %v4895_v44  ;;  %3878 = vmatmul.mubr.f32.gmra.mxu1 %v4898_v45  ;;  %6463 = vst [vmem:[#allocation17_spill] sm:$0xff] %v4950_v29  ;;  %6464 = vst [vmem:[#allocation18_spill] sm:$0xff] %v4962_v50  ;;  %v409_v37 = vrot.slane %v4979_v19, 1  ;;  %v5048_v44 = vld [vmem:[%s4685_s18 + $0x178] sm:$0x3] }
  0x3f   : > { %3904 = vmatprep.subr.mxu1 %v282_v56  ;;  %3983 = vmatpush3.msra.mxu0 %v3275_v38  ;;  %v403_v38 = vrot.slane %v4924_v5, 1  ;;  %v416_v60 = vrot.slane %v5048_v44, 1 }
  0x40   : > { %3854 = vmatmul.mubr.f32.gmra.mxu0 %v4910_v58  ;;  %3905 = vmatpush3.msra.mxu1 %v282_v56  ;;  %v4959_v56 = vld [vmem:[%s4685_s18 + $0x88] sm:$0x3]  ;;  %v5045_v58 = vld [vmem:[%s4685_s18 + $0xb0] sm:$0xff] }
  0x41   : > { %3984 = vmatprep.subr.mxu0 %v3274_v61  ;;  %3906 = vmatprep.subr.mxu1 %v281_v1  ;;  %v4982_v45 = vsel %vm337_vm0, %v403_v38, %v404_v40 }
  0x42   : > { %3985 = vmatpush3.msra.mxu0 %v3274_v61  ;;  %3880 = vmatprep.mubr.f32.mxu1 %v4930_v12  ;;  %v363_v61 = vrot.slane %v4938_v23, 1  ;;  %v406_v12 = vrot.slane %v4944_v25, 1  ;;  %6465 = vst [vmem:[#allocation19_spill] sm:$0xff] %v4982_v45 }
  0x43   : > { %3907 = vmatpush3.msra.mxu1 %v281_v1  ;;  %3986 = vmatprep.subr.mxu0 %v3273_v17  ;;  %v4976_v1 = vld [vmem:[%s4685_s18 + $0x150] sm:$0xff] }
  0x44   : > { %3856 = vmatprep.mubr.f32.mxu0 %v4947_v28  ;;  %3881 = vmatmul.mubr.f32.gmra.mxu1 %v4950_v29  ;;  %v366_v29 = vrot.slane %v4959_v56, 1  ;;  %v5002_v38 = vsel %vm337_vm0, %v404_v40, %v406_v12  ;;  %v408_v48 = vrot.slane %v4976_v1, 1  ;;  %v3270_v40 = vld [vmem:[%s6379_s1 + $0x128] sm:$0xff]  ;;  %v3269_v28 = vld [vmem:[%s6379_s1 + $0x120] sm:$0xff] }
  0x45   : > { %3908 = vmatprep.subr.mxu1 %v280_v49  ;;  %3987 = vmatpush3.msra.mxu0 %v3273_v17  ;;  %v4999_v17 = vsel %vm337_vm0, %v363_v61, %v364_v0  ;;  %6467 = vst [vmem:[#allocation21_spill] sm:$0xff] %v5002_v38  ;;  %v369_v61 = vrot.slane %v4993_v4, 1 }
  0x46   : > { %3857 = vmatmul.mubr.f32.gmra.mxu0 %v4962_v50  ;;  %3909 = vmatpush3.msra.mxu1 %v280_v49  ;;  %6466 = vst [vmem:[#allocation20_spill] sm:$0xff] %v4999_v17  ;;  %v278_v49 = vld [vmem:[%s6379_s1 + $0x28] sm:$0xff]  ;;  %v5014_v12 = vsel %vm337_vm0, %v364_v0, %v366_v29  ;;  %v277_v29 = vld [vmem:[%s6379_s1 + $0x20] sm:$0xff]  ;;  %v5034_v50 = vsel %vm337_vm0, %v408_v48, %v409_v37 }
  0x47   : > { %3988 = vmatprep.subr.mxu0 %v3272_v62  ;;  %3910 = vmatprep.subr.mxu1 %v279_v63  ;;  %6468 = vst [vmem:[#allocation22_spill] sm:$0xff] %v5014_v12  ;;  %v5028_v0 = vld [vmem:[%s4685_s18 + $0x168] sm:$0xff]  ;;  %6469 = vst [vmem:[#allocation23_spill] sm:$0xff] %v5034_v50 }
  0x48   : > { %3989 = vmatpush3.msra.mxu0 %v3272_v62  ;;  %3883 = vmatprep.mubr.f32.mxu1 %v4982_v45  ;;  %v368_v62 = vrot.slane %v4990_v11, 1  ;;  %v411_v45 = vrot.slane %v4996_v55, 1  ;;  %v413_v22 = vrot.slane %v5028_v0, 1 }
  0x49   : > { %3911 = vmatpush3.msra.mxu1 %v279_v63  ;;  %3990 = vmatprep.subr.mxu0 %v3271_v36  ;;  %v5031_v63 = vld [vmem:[%s4685_s18 + $0x170] sm:$0xff] }
  0x4a   : > { %3859 = vmatprep.mubr.f32.mxu0 %v4999_v17  ;;  %3884 = vmatmul.mubr.f32.gmra.mxu1 %v5002_v38  ;;  %v371_v38 = vrot.slane %v5011_v30, 1  ;;  %v5042_v17 = vld [vmem:[%s4685_s18 + $0xa8] sm:$0xff]  ;;  %v5051_v48 = vsel %vm337_vm0, %v368_v62, %v369_v61  ;;  %v414_v10 = vrot.slane %v5031_v63, 1 }
  0x4b   : > { %3912 = vmatprep.subr.mxu1 %v278_v49  ;;  %3991 = vmatpush3.msra.mxu0 %v3271_v36  ;;  %6470 = vst [vmem:[#allocation24_spill] sm:$0xff] %v5051_v48  ;;  %v5054_v36 = vsel %vm337_vm0, %v409_v37, %v411_v45  ;;  %v373_v37 = vrot.slane %v5042_v17, 1  ;;  %v374_v45 = vrot.slane %v5045_v58, 1 }
  0x4c   : > { %3860 = vmatmul.mubr.f32.gmra.mxu0 %v5014_v12  ;;  %3913 = vmatpush3.msra.mxu1 %v278_v49  ;;  %6471 = vst [vmem:[#allocation25_spill] sm:$0xff] %v5054_v36  ;;  %v276_v49 = vld [vmem:[%s6379_s1 + $0x18] sm:$0xff]  ;;  %v5066_v62 = vsel %vm337_vm0, %v369_v61, %v371_v38  ;;  %v5080_v38 = vsel %vm337_vm0, %v413_v22, %v414_v10  ;;  %v274_v22 = vld [vmem:[%s6379_s1 + $0x8] sm:$0xff] }
  0x4d   : > { %3992 = vmatprep.subr.mxu0 %v3270_v40  ;;  %3914 = vmatprep.subr.mxu1 %v277_v29  ;;  %v5063_v12 = vld [vmem:[%s4685_s18 + $0xb8] sm:$0x3]  ;;  %6472 = vst [vmem:[#allocation26_spill] sm:$0xff] %v5080_v38 }
  0x4e   : > { %3993 = vmatpush3.msra.mxu0 %v3270_v40  ;;  %3886 = vmatprep.mubr.f32.mxu1 %v5034_v50  ;;  %v3268_v40 = vld [vmem:[%s6379_s1 + $0x118] sm:$0xff]  ;;  %v376_v61 = vrot.slane %v5063_v12, 1  ;;  %v5088_v50 = vsel %vm337_vm0, %v373_v37, %v374_v45  ;;  %v919_v37 = vrot.slane %v4703_v16, 2 }
  0x4f   : > { %3915 = vmatpush3.msra.mxu1 %v277_v29  ;;  %3994 = vmatprep.subr.mxu0 %v3269_v28  ;;  %v275_v29 = vld [vmem:[%s6379_s1 + $0x10] sm:$0xff] }
  0x50   : > { %3862 = vmatprep.mubr.f32.mxu0 %v5051_v48  ;;  %3887 = vmatmul.mubr.f32.gmra.mxu1 %v5054_v36  ;;  %v3267_v36 = vld [vmem:[%s6379_s1 + $0x110] sm:$0xff]  ;;  %v5091_v48 = vsel %vm337_vm0, %v414_v10, %v416_v60  ;;  %v3266_v60 = vld [vmem:[%s6379_s1 + $0x108] sm:$0xff]  ;;  %v273_v10 = vld [vmem:[%s6379_s1] sm:$0xff] }
  0x51   : > { %3916 = vmatprep.subr.mxu1 %v276_v49  ;;  %3995 = vmatpush3.msra.mxu0 %v3269_v28  ;;  %6473 = vst [vmem:[#allocation27_spill] sm:$0xff] %v5091_v48  ;;  %v5098_v28 = vsel %vm337_vm0, %v374_v45, %v376_v61  ;;  %v3265_v45 = vld [vmem:[%s6379_s1 + $0x100] sm:$0xff]  ;;  %v924_v61 = vrot.slane %v4739_v32, 2 }
  0x52   : > { %3863 = vmatmul.mubr.f32.gmra.mxu0 %v5066_v62  ;;  %3917 = vmatpush3.msra.mxu1 %v276_v49  ;;  %v918_v49 = vrot.slane %v4700_v15, 2 }
  0x53   : > { %3996 = vmatprep.subr.mxu0 %v3268_v40  ;;  %3918 = vmatprep.subr.mxu1 %v275_v29 }
  0x54   : > { %3997 = vmatpush3.msra.mxu0 %v3268_v40  ;;  %3889 = vmatprep.mubr.f32.mxu1 %v5080_v38  ;;  %v921_v40 = vrot.slane %v4714_v21, 2  ;;  %v3296_v21 = vld [vmem:[%s6379_s1 + $0x1f8] sm:$0xff] }
  0x55   : > { %3919 = vmatpush3.msra.mxu1 %v275_v29  ;;  %3998 = vmatprep.subr.mxu0 %v3267_v36  ;;  %v920_v29 = vsel %vm917_vm1, %v918_v49, %v919_v37 }
  0x56   : > { %3865 = vmatprep.mubr.f32.mxu0 %v5088_v50  ;;  %3890 = vmatmul.mubr.f32.gmra.mxu1 %v5091_v48  ;;  %v926_v48 = vrot.slane %v4754_v39, 2  ;;  %v928_v39 = vrot.slane %v4782_v51, 2 }
  0x57   : > { %3920 = vmatprep.subr.mxu1 %v274_v22  ;;  %3999 = vmatpush3.msra.mxu0 %v3267_v36  ;;  %v923_v36 = vrot.slane %v4736_v31, 2 }
  0x58   : > { %3866 = vmatmul.mubr.f32.gmra.mxu0 %v5098_v28  ;;  %3921 = vmatpush3.msra.mxu1 %v274_v22  ;;  %v922_v22 = vsel %vm917_vm1, %v919_v37, %v921_v40  ;;  %v5138_v49 = vsel %vm917_vm1, %v924_v61, %v926_v48  ;;  %v931_v37 = vrot.slane %v4803_v59, 2  ;;  %v3311_v40 = vld [vmem:[%s6379_s1 + $0x270] sm:$0xff]  ;;  %v3294_v59 = vld [vmem:[%s6379_s1 + $0x1e8] sm:$0xff]  ;;  %v933_v48 = vrot.slane %v4834_v7, 2 }
  0x59   : > { %4000 = vmatprep.subr.mxu0 %v3266_v60  ;;  %3922 = vmatprep.subr.mxu1 %v273_v10 }
  0x5a   : > { %4001 = vmatpush3.msra.mxu0 %v3266_v60  ;;  %3923 = vmatpush3.msra.mxu1 %v273_v10  ;;  %v3312_v60 = vld [vmem:[%s6379_s1 + $0x278] sm:$0xff]  ;;  %v5129_v10 = vsel %vm917_vm1, %v923_v36, %v924_v61  ;;  %v936_v36 = vrot.slane %v4855_v20, 2  ;;  %v3310_v61 = vld [vmem:[%s6379_s1 + $0x268] sm:$0xff]  ;;  %v3293_v20 = vld [vmem:[%s6379_s1 + $0x1e0] sm:$0xff] }
  0x5b   : > { %3924 = vmatprep.mubr.f32.mxu1 %v4700_v15  ;;  %4002 = vmatprep.subr.mxu0 %v3265_v45  ;;  %v3295_v15 = vld [vmem:[%s6379_s1 + $0x1f0] sm:$0xff] }
  0x5c   : > { %3925 = vmatmul.mubr.f32.vlgmr.msra.gmra.mxu1 %v4703_v16  ;;  %4003 = vmatpush3.msra.mxu0 %v3265_v45  ;;  %v929_v16 = vrot.slane %v4785_v52, 2 }
  0x5d   : > { %4004 = vmatprep.mubr.f32.mxu0 %v920_v29  ;;  %4052 = vmatprep.subr.mxu1 %v3296_v21  ;;  %v934_v29 = vrot.slane %v4837_v8, 2 }
  0x5e   : > { %4005 = vmatmul.mubr.f32.vlgmr.msra.gmra.mxu0 %v922_v22  ;;  %4053 = vmatpush3.msra.mxu1 %v3296_v21  ;;  %v5148_v45 = vsel %vm917_vm1, %v928_v39, %v929_v16  ;;  %v5157_v21 = vsel %vm917_vm1, %v929_v16, %v931_v37  ;;  %v941_v16 = vrot.slane %v4907_v57, 2  ;;  %v3309_v37 = vld [vmem:[%s6379_s1 + $0x260] sm:$0xff]  ;;  %v3292_v57 = vld [vmem:[%s6379_s1 + $0x1d8] sm:$0xff] }
  0x5f   : > { %4132 = vmatprep.subr.mxu0 %v3312_v60  ;;  %3927 = vmatprep.mubr.f32.mxu1 %v4736_v31  ;;  %v5167_v22 = vsel %vm917_vm1, %v933_v48, %v934_v29  ;;  %v5176_v39 = vsel %vm917_vm1, %v934_v29, %v936_v36  ;;  %v944_v48 = vrot.slane %v4941_v24, 2  ;;  %v946_v36 = vrot.slane %v4959_v56, 2  ;;  %v3291_v56 = vld [vmem:[%s6379_s1 + $0x1d0] sm:$0xff] }
  0x60   : > { %4133 = vmatpush3.msra.mxu0 %v3312_v60  ;;  %3928 = vmatmul.mubr.f32.gmra.mxu1 %v4739_v32  ;;  %v938_v60 = vrot.slane %v4886_v41, 2 }
  0x61   : > { %4007 = vmatprep.mubr.f32.mxu0 %v5129_v10  ;;  %4054 = vmatprep.subr.mxu1 %v3295_v15 }
  0x62   : > { %4008 = vmatmul.mubr.f32.gmra.mxu0 %v5138_v49  ;;  %4055 = vmatpush3.msra.mxu1 %v3295_v15  ;;  %v939_v15 = vrot.slane %v4889_v42, 2 }
  0x63   : > { %4134 = vmatprep.subr.mxu0 %v3311_v40  ;;  %3930 = vmatprep.mubr.f32.mxu1 %v4782_v51 }
  0x64   : > { %4135 = vmatpush3.msra.mxu0 %v3311_v40  ;;  %3931 = vmatmul.mubr.f32.gmra.mxu1 %v4785_v52  ;;  %v5186_v40 = vsel %vm917_vm1, %v938_v60, %v939_v15  ;;  %v5195_v29 = vsel %vm917_vm1, %v939_v15, %v941_v16  ;;  %v948_v60 = vrot.slane %v4990_v11, 2  ;;  %v949_v15 = vrot.slane %v4993_v4, 2 }
  0x65   : > { %4010 = vmatprep.mubr.f32.mxu0 %v5148_v45  ;;  %4056 = vmatprep.subr.mxu1 %v3294_v59  ;;  %v5214_v16 = vsel %vm917_vm1, %v944_v48, %v946_v36  ;;  %v954_v36 = vrot.slane %v5045_v58, 2 }
  0x66   : > { %4011 = vmatmul.mubr.f32.gmra.mxu0 %v5157_v21  ;;  %4057 = vmatpush3.msra.mxu1 %v3294_v59  ;;  %v943_v59 = vrot.slane %v4938_v23, 2  ;;  %6474 = vst [vmem:[#allocation28_spill] sm:$0xff] %v5214_v16 }
  0x67   : > { %4136 = vmatprep.subr.mxu0 %v3310_v61  ;;  %3933 = vmatprep.mubr.f32.mxu1 %v4834_v7 }
  0x68   : > { %4137 = vmatpush3.msra.mxu0 %v3310_v61  ;;  %3934 = vmatmul.mubr.f32.gmra.mxu1 %v4837_v8  ;;  %v3308_v61 = vld [vmem:[%s6379_s1 + $0x258] sm:$0xff] }
  0x69   : > { %4013 = vmatprep.mubr.f32.mxu0 %v5167_v22  ;;  %4058 = vmatprep.subr.mxu1 %v3293_v20 }
  0x6a   : > { %4014 = vmatmul.mubr.f32.gmra.mxu0 %v5176_v39  ;;  %4059 = vmatpush3.msra.mxu1 %v3293_v20  ;;  %v5205_v20 = vsel %vm917_vm1, %v943_v59, %v944_v48  ;;  %v5224_v59 = vsel %vm917_vm1, %v948_v60, %v949_v15  ;;  %v953_v48 = vrot.slane %v5042_v17, 2 }
  0x6b   : > { %4138 = vmatprep.subr.mxu0 %v3309_v37  ;;  %3936 = vmatprep.mubr.f32.mxu1 %v4886_v41 }
  0x6c   : > { %4139 = vmatpush3.msra.mxu0 %v3309_v37  ;;  %3937 = vmatmul.mubr.f32.gmra.mxu1 %v4889_v42  ;;  %v951_v37 = vrot.slane %v5011_v30, 2  ;;  %v3290_v30 = vld [vmem:[%s6379_s1 + $0x1c8] sm:$0xff]  ;;  %v5243_v60 = vsel %vm917_vm1, %v953_v48, %v954_v36 }
  0x6d   : > { %4016 = vmatprep.mubr.f32.mxu0 %v5186_v40  ;;  %4060 = vmatprep.subr.mxu1 %v3292_v57 }
  0x6e   : > { %4017 = vmatmul.mubr.f32.gmra.mxu0 %v5195_v29  ;;  %4061 = vmatpush3.msra.mxu1 %v3292_v57  ;;  %v3307_v57 = vld [vmem:[%s6379_s1 + $0x250] sm:$0xff] }
  0x6f   : > { %4140 = vmatprep.subr.mxu0 %v3308_v61  ;;  %3939 = vmatprep.mubr.f32.mxu1 %v4938_v23 }
  0x70   : > { %4141 = vmatpush3.msra.mxu0 %v3308_v61  ;;  %3940 = vmatmul.mubr.f32.gmra.mxu1 %v4941_v24  ;;  %v5233_v61 = vsel %vm917_vm1, %v949_v15, %v951_v37  ;;  %v958_v15 = vrot.slane %v4694_v13, 2  ;;  %v959_v37 = vrot.slane %v4697_v14, 2 }
  0x71   : > { %4019 = vmatprep.mubr.f32.mxu0 %v5205_v20  ;;  %4062 = vmatprep.subr.mxu1 %v3291_v56  ;;  %6475 = vst [vmem:[#allocation29_spill] sm:$0xff] %v5233_v61 }
  0x72   : > { %4020 = vmatmul.mubr.f32.gmra.mxu0 %v5214_v16  ;;  %4063 = vmatpush3.msra.mxu1 %v3291_v56  ;;  %v956_v16 = vrot.slane %v5063_v12, 2  ;;  %v3306_v56 = vld [vmem:[%s6379_s1 + $0x248] sm:$0xff]  ;;  %v3289_v12 = vld [vmem:[%s6379_s1 + $0x1c0] sm:$0xff]  ;;  %v5262_v48 = vsel %vm917_vm1, %v958_v15, %v959_v37 }
  0x73   : > { %4142 = vmatprep.subr.mxu0 %v3307_v57  ;;  %3942 = vmatprep.mubr.f32.mxu1 %v4990_v11 }
  0x74   : > { %4143 = vmatpush3.msra.mxu0 %v3307_v57  ;;  %3943 = vmatmul.mubr.f32.gmra.mxu1 %v4993_v4  ;;  %v5252_v57 = vsel %vm917_vm1, %v954_v36, %v956_v16  ;;  %v963_v16 = vrot.slane %v4723_v26, 2  ;;  %v964_v36 = vrot.slane %v4726_v27, 2 }
  0x75   : > { %4022 = vmatprep.mubr.f32.mxu0 %v5224_v59  ;;  %4064 = vmatprep.subr.mxu1 %v3290_v30  ;;  %6476 = vst [vmem:[#allocation30_spill] sm:$0xff] %v5252_v57 }
  0x76   : > { %4023 = vmatmul.mubr.f32.gmra.mxu0 %v5233_v61  ;;  %4065 = vmatpush3.msra.mxu1 %v3290_v30  ;;  %v961_v61 = vrot.slane %v4709_v18, 2  ;;  %v3305_v30 = vld [vmem:[%s6379_s1 + $0x240] sm:$0xff]  ;;  %v3288_v18 = vld [vmem:[%s6379_s1 + $0x1b8] sm:$0xff] }
  0x77   : > { %4144 = vmatprep.subr.mxu0 %v3306_v56  ;;  %3945 = vmatprep.mubr.f32.mxu1 %v5042_v17 }
  0x78   : > { %4145 = vmatpush3.msra.mxu0 %v3306_v56  ;;  %3946 = vmatmul.mubr.f32.gmra.mxu1 %v5045_v58  ;;  %v5271_v56 = vsel %vm917_vm1, %v959_v37, %v961_v61  ;;  %v968_v61 = vrot.slane %v4768_v46, 2  ;;  %v971_v37 = vrot.slane %v4788_v53, 2  ;;  %v3286_v53 = vld [vmem:[%s6379_s1 + $0x1a8] sm:$0xff] }
  0x79   : > { %4025 = vmatprep.mubr.f32.mxu0 %v5243_v60  ;;  %4066 = vmatprep.subr.mxu1 %v3289_v12 }
  0x7a   : > { %4026 = vmatmul.mubr.f32.gmra.mxu0 %v5252_v57  ;;  %4067 = vmatpush3.msra.mxu1 %v3289_v12  ;;  %v966_v57 = vrot.slane %v4742_v33, 2  ;;  %v3304_v12 = vld [vmem:[%s6379_s1 + $0x238] sm:$0xff]  ;;  %v3287_v33 = vld [vmem:[%s6379_s1 + $0x1b0] sm:$0xff] }
  0x7b   : > { %4146 = vmatprep.subr.mxu0 %v3305_v30  ;;  %3948 = vmatprep.mubr.f32.mxu1 %v4694_v13  ;;  %v5281_v13 = vsel %vm917_vm1, %v963_v16, %v964_v36  ;;  %v976_v16 = vrot.slane %v4840_v9, 2  ;;  %v3285_v9 = vld [vmem:[%s6379_s1 + $0x1a0] sm:$0xff] }
  0x7c   : > { %4147 = vmatpush3.msra.mxu0 %v3305_v30  ;;  %3949 = vmatmul.mubr.f32.gmra.mxu1 %v4697_v14  ;;  %v969_v14 = vrot.slane %v4771_v47, 2  ;;  %v5290_v15 = vsel %vm917_vm1, %v964_v36, %v966_v57  ;;  %v3303_v30 = vld [vmem:[%s6379_s1 + $0x230] sm:$0xff]  ;;  %v973_v57 = vrot.slane %v4820_v2, 2  ;;  %v3302_v36 = vld [vmem:[%s6379_s1 + $0x228] sm:$0xff] }
  0x7d   : > { %4028 = vmatprep.mubr.f32.mxu0 %v5262_v48  ;;  %4068 = vmatprep.subr.mxu1 %v3288_v18 }
  0x7e   : > { %4029 = vmatmul.mubr.f32.gmra.mxu0 %v5271_v56  ;;  %4069 = vmatpush3.msra.mxu1 %v3288_v18  ;;  %v5309_v18 = vsel %vm917_vm1, %v969_v14, %v971_v37  ;;  %v983_v37 = vrot.slane %v4924_v5, 2 }
  0x7f   : > { %4148 = vmatprep.subr.mxu0 %v3304_v12  ;;  %3951 = vmatprep.mubr.f32.mxu1 %v4723_v26  ;;  %v5300_v26 = vsel %vm917_vm1, %v968_v61, %v969_v14  ;;  %v981_v61 = vrot.slane %v4892_v43, 2  ;;  %v3301_v14 = vld [vmem:[%s6379_s1 + $0x220] sm:$0xff]  ;;  %v3284_v43 = vld [vmem:[%s6379_s1 + $0x198] sm:$0xff] }
  0x80   : > { %4149 = vmatpush3.msra.mxu0 %v3304_v12  ;;  %3952 = vmatmul.mubr.f32.gmra.mxu1 %v4726_v27  ;;  %v974_v27 = vrot.slane %v4823_v3, 2  ;;  %v978_v12 = vrot.slane %v4872_v34, 2 }
  0x81   : > { %4031 = vmatprep.mubr.f32.mxu0 %v5281_v13  ;;  %4070 = vmatprep.subr.mxu1 %v3287_v33 }
  0x82   : > { %4032 = vmatmul.mubr.f32.gmra.mxu0 %v5290_v15  ;;  %4071 = vmatpush3.msra.mxu1 %v3287_v33  ;;  %v5328_v33 = vsel %vm917_vm1, %v974_v27, %v976_v16  ;;  %v988_v16 = vrot.slane %v4976_v1, 2 }
  0x83   : > { %4150 = vmatprep.subr.mxu0 %v3303_v30  ;;  %3954 = vmatprep.mubr.f32.mxu1 %v4768_v46  ;;  %v5319_v46 = vsel %vm917_vm1, %v973_v57, %v974_v27  ;;  %v3300_v57 = vld [vmem:[%s6379_s1 + $0x218] sm:$0xff] }
  0x84   : > { %4151 = vmatpush3.msra.mxu0 %v3303_v30  ;;  %3955 = vmatmul.mubr.f32.gmra.mxu1 %v4771_v47  ;;  %v979_v47 = vrot.slane %v4875_v35, 2 }
  0x85   : > { %4034 = vmatprep.mubr.f32.mxu0 %v5300_v26  ;;  %4072 = vmatprep.subr.mxu1 %v3286_v53 }
  0x86   : > { %4035 = vmatmul.mubr.f32.gmra.mxu0 %v5309_v18  ;;  %4073 = vmatpush3.msra.mxu1 %v3286_v53  ;;  %v5347_v30 = vsel %vm917_vm1, %v979_v47, %v981_v61  ;;  %v986_v53 = vrot.slane %v4944_v25, 2  ;;  %v3283_v25 = vld [vmem:[%s6379_s1 + $0x190] sm:$0xff]  ;;  %v993_v61 = vrot.slane %v5028_v0, 2 }
  0x87   : > { %4152 = vmatprep.subr.mxu0 %v3302_v36  ;;  %3957 = vmatprep.mubr.f32.mxu1 %v4820_v2  ;;  %v5338_v2 = vsel %vm917_vm1, %v978_v12, %v979_v47  ;;  %6478 = vst [vmem:[#allocation32_spill] sm:$0xff] %v5347_v30  ;;  %v3299_v12 = vld [vmem:[%s6379_s1 + $0x210] sm:$0xff] }
  0x88   : > { %4153 = vmatpush3.msra.mxu0 %v3302_v36  ;;  %3958 = vmatmul.mubr.f32.gmra.mxu1 %v4823_v3  ;;  %6477 = vst [vmem:[#allocation31_spill] sm:$0xff] %v5338_v2  ;;  %v984_v3 = vrot.slane %v4927_v6, 2 }
  0x89   : > { %4037 = vmatprep.mubr.f32.mxu0 %v5319_v46  ;;  %4074 = vmatprep.subr.mxu1 %v3285_v9 }
  0x8a   : > { %4038 = vmatmul.mubr.f32.gmra.mxu0 %v5328_v33  ;;  %4075 = vmatpush3.msra.mxu1 %v3285_v9  ;;  %v5357_v27 = vsel %vm917_vm1, %v983_v37, %v984_v3  ;;  %v5366_v36 = vsel %vm917_vm1, %v984_v3, %v986_v53  ;;  %v991_v9 = vrot.slane %v4996_v55, 2  ;;  %v3282_v55 = vld [vmem:[%s6379_s1 + $0x188] sm:$0xff]  ;;  %v996_v37 = vrot.slane %v5048_v44, 2  ;;  %v3281_v44 = vld [vmem:[%s6379_s1 + $0x180] sm:$0xff] }
  0x8b   : > { %4154 = vmatprep.subr.mxu0 %v3301_v14  ;;  %3960 = vmatprep.mubr.f32.mxu1 %v4872_v34  ;;  %6479 = vst [vmem:[#allocation33_spill] sm:$0xff] %v5357_v27  ;;  %6480 = vst [vmem:[#allocation34_spill] sm:$0xff] %v5366_v36  ;;  %v3298_v3 = vld [vmem:[%s6379_s1 + $0x208] sm:$0xff] }
  0x8c   : > { %4155 = vmatpush3.msra.mxu0 %v3301_v14  ;;  %3961 = vmatmul.mubr.f32.gmra.mxu1 %v4875_v35  ;;  %v989_v35 = vrot.slane %v4979_v19, 2  ;;  %v994_v14 = vrot.slane %v5031_v63, 2 }
  0x8d   : > { %4040 = vmatprep.mubr.f32.mxu0 %v5338_v2  ;;  %4076 = vmatprep.subr.mxu1 %v3284_v43 }
  0x8e   : > { %4041 = vmatmul.mubr.f32.gmra.mxu0 %v5347_v30  ;;  %4077 = vmatpush3.msra.mxu1 %v3284_v43  ;;  %v5376_v47 = vsel %vm917_vm1, %v988_v16, %v989_v35  ;;  %v5385_v43 = vsel %vm917_vm1, %v989_v35, %v991_v9  ;;  %v5395_v53 = vsel %vm917_vm1, %v993_v61, %v994_v14  ;;  %v3328_v16 = vld [vmem:[%s6379_s1 + $0x2f8] sm:$0xff]  ;;  %v6483_v9 = vld [vmem:[#allocation6_spill] sm:$0xff] }
  0x8f   : > { %4156 = vmatprep.subr.mxu0 %v3300_v57  ;;  %3963 = vmatprep.mubr.f32.mxu1 %v4924_v5  ;;  %6481 = vst [vmem:[#allocation35_spill] sm:$0xff] %v5385_v43  ;;  %v3344_v35 = vld [vmem:[%s6379_s1 + $0x378] sm:$0xff]  ;;  %v6487_v61 = vld [vmem:[#allocation14_spill] sm:$0xff] }
  0x90   : > { %4157 = vmatpush3.msra.mxu0 %v3300_v57  ;;  %3964 = vmatmul.mubr.f32.gmra.mxu1 %v4927_v6  ;;  %v5402_v57 = vsel %vm917_vm1, %v994_v14, %v996_v37  ;;  %v3325_v14 = vld [vmem:[%s6379_s1 + $0x2e0] sm:$0xff] }
  0x91   : > { %4043 = vmatprep.mubr.f32.mxu0 %v5357_v27  ;;  %4078 = vmatprep.subr.mxu1 %v3283_v25  ;;  %6482 = vst [vmem:[#allocation36_spill] sm:$0xff] %v5402_v57  ;;  %v6489_v37 = vld [vmem:[#allocation18_spill] sm:$0xff] }
  0x92   : > { %4044 = vmatmul.mubr.f32.gmra.mxu0 %v5366_v36  ;;  %4079 = vmatpush3.msra.mxu1 %v3283_v25  ;;  %v3297_v25 = vld [vmem:[%s6379_s1 + $0x200] sm:$0xff] }
  0x93   : > { %4158 = vmatprep.subr.mxu0 %v3299_v12  ;;  %3966 = vmatprep.mubr.f32.mxu1 %v4976_v1 }
  0x94   : > { %4159 = vmatpush3.msra.mxu0 %v3299_v12  ;;  %3967 = vmatmul.mubr.f32.gmra.mxu1 %v4979_v19  ;;  %v3327_v12 = vld [vmem:[%s6379_s1 + $0x2f0] sm:$0xff] }
  0x95   : > { %4046 = vmatprep.mubr.f32.mxu0 %v5376_v47  ;;  %4080 = vmatprep.subr.mxu1 %v3282_v55 }
  0x96   : > { %4047 = vmatmul.mubr.f32.gmra.mxu0 %v5385_v43  ;;  %4081 = vmatpush3.msra.mxu1 %v3282_v55  ;;  %v3326_v55 = vld [vmem:[%s6379_s1 + $0x2e8] sm:$0xff] }
  0x97   : > { %4160 = vmatprep.subr.mxu0 %v3298_v3  ;;  %3969 = vmatprep.mubr.f32.mxu1 %v5028_v0 }
  0x98   : > { %4161 = vmatpush3.msra.mxu0 %v3298_v3  ;;  %3970 = vmatmul.mubr.f32.gmra.mxu1 %v5031_v63  ;;  %v3324_v3 = vld [vmem:[%s6379_s1 + $0x2d8] sm:$0xff] }
  0x99   : > { %4049 = vmatprep.mubr.f32.mxu0 %v5395_v53  ;;  %4082 = vmatprep.subr.mxu1 %v3281_v44 }
  0x9a   : > { %4050 = vmatmul.mubr.f32.gmra.mxu0 %v5402_v57  ;;  %4083 = vmatpush3.msra.mxu1 %v3281_v44  ;;  %v6491_v44 = vld [vmem:[#allocation22_spill] sm:$0xff] }
  0x9b   : > { %4162 = vmatprep.subr.mxu0 %v3297_v25  ;;  %4084 = vmatprep.mubr.f32.mxu1 %v4736_v31  ;;  %v3343_v31 = vld [vmem:[%s6379_s1 + $0x370] sm:$0xff] }
  0x9c   : > { %4163 = vmatpush3.msra.mxu0 %v3297_v25  ;;  %4085 = vmatmul.mubr.f32.vlgmr.msra.gmra.mxu1 %v4739_v32  ;;  %v6484_v32 = vld [vmem:[#allocation8_spill] sm:$0xff] }
  0x9d   : > { %4164 = vmatprep.mubr.f32.mxu0 %v4791_v54  ;;  %4212 = vmatprep.subr.mxu1 %v3328_v16  ;;  %v6485_v54 = vld [vmem:[#allocation10_spill] sm:$0xff]  ;;  %v3323_v25 = vld [vmem:[%s6379_s1 + $0x2d0] sm:$0xff] }
  0x9e   : > { %4165 = vmatmul.mubr.f32.vlgmr.msra.gmra.mxu0 %v6483_v9  ;;  %4213 = vmatpush3.msra.mxu1 %v3328_v16  ;;  %v3322_v16 = vld [vmem:[%s6379_s1 + $0x2c8] sm:$0xff]  ;;  %v6493_v9 = vld [vmem:[#allocation2_spill] sm:$0xff] }
  0x9f   : > { %4292 = vmatprep.subr.mxu0 %v3344_v35  ;;  %4087 = vmatprep.mubr.f32.mxu1 %v4782_v51  ;;  %v3342_v51 = vld [vmem:[%s6379_s1 + $0x368] sm:$0xff] }
  0xa0   : > { %4293 = vmatpush3.msra.mxu0 %v3344_v35  ;;  %4088 = vmatmul.mubr.f32.gmra.mxu1 %v4785_v52  ;;  %v6486_v52 = vld [vmem:[#allocation12_spill] sm:$0xff]  ;;  %v3337_v35 = vld [vmem:[%s6379_s1 + $0x340] sm:$0xff] }
  0xa1   : > { %4167 = vmatprep.mubr.f32.mxu0 %v6484_v32  ;;  %4214 = vmatprep.subr.mxu1 %v3327_v12 }
  0xa2   : > { %4168 = vmatmul.mubr.f32.gmra.mxu0 %v6485_v54  ;;  %4215 = vmatpush3.msra.mxu1 %v3327_v12  ;;  %v6494_v12 = vld [vmem:[#allocation3_spill] sm:$0xff] }
  0xa3   : > { %4294 = vmatprep.subr.mxu0 %v3343_v31  ;;  %4090 = vmatprep.mubr.f32.mxu1 %v4834_v7  ;;  %v3341_v7 = vld [vmem:[%s6379_s1 + $0x360] sm:$0xff] }
  0xa4   : > { %4295 = vmatpush3.msra.mxu0 %v3343_v31  ;;  %4091 = vmatmul.mubr.f32.gmra.mxu1 %v4837_v8  ;;  %v6488_v8 = vld [vmem:[#allocation16_spill] sm:$0xff]  ;;  %v3320_v31 = vld [vmem:[%s6379_s1 + $0x2b8] sm:$0xff] }
  0xa5   : > { %4170 = vmatprep.mubr.f32.mxu0 %v6486_v52  ;;  %4216 = vmatprep.subr.mxu1 %v3326_v55 }
  0xa6   : > { %4171 = vmatmul.mubr.f32.gmra.mxu0 %v6487_v61  ;;  %4217 = vmatpush3.msra.mxu1 %v3326_v55  ;;  %v5500_v55 = vld [vmem:[%s4685_s18 + $0xd8] sm:$0xff] }
  0xa7   : > { %4296 = vmatprep.subr.mxu0 %v3342_v51  ;;  %4093 = vmatprep.mubr.f32.mxu1 %v4886_v41  ;;  %v3340_v41 = vld [vmem:[%s6379_s1 + $0x358] sm:$0xff] }
  0xa8   : > { %4297 = vmatpush3.msra.mxu0 %v3342_v51  ;;  %4094 = vmatmul.mubr.f32.gmra.mxu1 %v4889_v42  ;;  %v6490_v42 = vld [vmem:[#allocation20_spill] sm:$0xff]  ;;  %v5504_v51 = vld [vmem:[%s4685_s18 + $0xe0] sm:$0xff] }
  0xa9   : > { %4173 = vmatprep.mubr.f32.mxu0 %v6488_v8  ;;  %4218 = vmatprep.subr.mxu1 %v3325_v14 }
  0xaa   : > { %4174 = vmatmul.mubr.f32.gmra.mxu0 %v6489_v37  ;;  %4219 = vmatpush3.msra.mxu1 %v3325_v14  ;;  %v3336_v14 = vld [vmem:[%s6379_s1 + $0x338] sm:$0xff] }
  0xab   : > { %4298 = vmatprep.subr.mxu0 %v3341_v7  ;;  %4096 = vmatprep.mubr.f32.mxu1 %v4938_v23  ;;  %v3339_v23 = vld [vmem:[%s6379_s1 + $0x350] sm:$0xff] }
  0xac   : > { %4299 = vmatpush3.msra.mxu0 %v3341_v7  ;;  %4097 = vmatmul.mubr.f32.gmra.mxu1 %v4941_v24  ;;  %v6492_v24 = vld [vmem:[#allocation24_spill] sm:$0xff] }
  0xad   : > { %4176 = vmatprep.mubr.f32.mxu0 %v6490_v42  ;;  %4220 = vmatprep.subr.mxu1 %v3324_v3  ;;  %v6495_v7 = vld [vmem:[#allocation4_spill] sm:$0xff] }
  0xae   : > { %4177 = vmatmul.mubr.f32.gmra.mxu0 %v6491_v44  ;;  %4221 = vmatpush3.msra.mxu1 %v3324_v3  ;;  %v6496_v3 = vld [vmem:[#allocation5_spill] sm:$0xff] }
  0xaf   : > { %4300 = vmatprep.subr.mxu0 %v3340_v41  ;;  %4099 = vmatprep.mubr.f32.mxu1 %v4990_v11  ;;  %v3321_v11 = vld [vmem:[%s6379_s1 + $0x2c0] sm:$0xff] }
  0xb0   : > { %4301 = vmatpush3.msra.mxu0 %v3340_v41  ;;  %4100 = vmatmul.mubr.f32.gmra.mxu1 %v4993_v4  ;;  %v3338_v4 = vld [vmem:[%s6379_s1 + $0x348] sm:$0xff]  ;;  %v3319_v41 = vld [vmem:[%s6379_s1 + $0x2b0] sm:$0xff] }
  0xb1   : > { %4179 = vmatprep.mubr.f32.mxu0 %v6492_v24  ;;  %4222 = vmatprep.subr.mxu1 %v3323_v25 }
  0xb2   : > { %4180 = vmatmul.mubr.f32.gmra.mxu0 %v5066_v62  ;;  %4223 = vmatpush3.msra.mxu1 %v3323_v25  ;;  %v5516_v25 = vld [vmem:[%s4685_s18 + $0xf0] sm:$0xff] }
  0xb3   : > { %4302 = vmatprep.subr.mxu0 %v3339_v23  ;;  %4102 = vmatprep.mubr.f32.mxu1 %v5042_v17  ;;  %v5484_v17 = vld [vmem:[%s4685_s18 + $0xc0] sm:$0xff] }
  0xb4   : > { %4303 = vmatpush3.msra.mxu0 %v3339_v23  ;;  %4103 = vmatmul.mubr.f32.gmra.mxu1 %v5045_v58  ;;  %v5488_v58 = vld [vmem:[%s4685_s18 + $0xc8] sm:$0xff]  ;;  %v5520_v23 = vld [vmem:[%s4685_s18 + $0xf8] sm:$0xff] }
  0xb5   : > { %4182 = vmatprep.mubr.f32.mxu0 %v5088_v50  ;;  %4224 = vmatprep.subr.mxu1 %v3322_v16 }
  0xb6   : > { %4183 = vmatmul.mubr.f32.gmra.mxu0 %v5098_v28  ;;  %4225 = vmatpush3.msra.mxu1 %v3322_v16  ;;  %v3335_v16 = vld [vmem:[%s6379_s1 + $0x330] sm:$0xff] }
  0xb7   : > { %4304 = vmatprep.subr.mxu0 %v3338_v4  ;;  %4105 = vmatprep.mubr.f32.mxu1 %v5484_v17 }
  0xb8   : > { %4305 = vmatpush3.msra.mxu0 %v3338_v4  ;;  %4106 = vmatmul.mubr.f32.gmra.mxu1 %v5488_v58  ;;  %v6497_v4 = vld [vmem:[#allocation7_spill] sm:$0xff] }
  0xb9   : > { %4185 = vmatprep.mubr.f32.mxu0 %v6493_v9  ;;  %4226 = vmatprep.subr.mxu1 %v3321_v11 }
  0xba   : > { %4186 = vmatmul.mubr.f32.gmra.mxu0 %v6494_v12  ;;  %4227 = vmatpush3.msra.mxu1 %v3321_v11  ;;  %v6498_v11 = vld [vmem:[#allocation9_spill] sm:$0xff] }
  0xbb   : > { %4306 = vmatprep.subr.mxu0 %v3337_v35  ;;  %4108 = vmatprep.mubr.f32.mxu1 %v5500_v55 }
  0xbc   : > { %4307 = vmatpush3.msra.mxu0 %v3337_v35  ;;  %4109 = vmatmul.mubr.f32.gmra.mxu1 %v5504_v51  ;;  %v3318_v35 = vld [vmem:[%s6379_s1 + $0x2a8] sm:$0xff] }
  0xbd   : > { %4188 = vmatprep.mubr.f32.mxu0 %v6495_v7  ;;  %4228 = vmatprep.subr.mxu1 %v3320_v31  ;;  %v6501_v7 = vld [vmem:[#allocation15_spill] sm:$0xff] }
  0xbe   : > { %4189 = vmatmul.mubr.f32.gmra.mxu0 %v6496_v3  ;;  %4229 = vmatpush3.msra.mxu1 %v3320_v31  ;;  %v5532_v31 = vld [vmem:[%s4685_s18 + $0x108] sm:$0xff]  ;;  %v3317_v3 = vld [vmem:[%s6379_s1 + $0x2a0] sm:$0xff] }
  0xbf   : > { %4308 = vmatprep.subr.mxu0 %v3336_v14  ;;  %4111 = vmatprep.mubr.f32.mxu1 %v5516_v25 }
  0xc0   : > { %4309 = vmatpush3.msra.mxu0 %v3336_v14  ;;  %4112 = vmatmul.mubr.f32.gmra.mxu1 %v5520_v23  ;;  %v5536_v14 = vld [vmem:[%s4685_s18 + $0x110] sm:$0xff] }
  0xc1   : > { %4191 = vmatprep.mubr.f32.mxu0 %v6497_v4  ;;  %4230 = vmatprep.subr.mxu1 %v3319_v41  ;;  %v6500_v4 = vld [vmem:[#allocation13_spill] sm:$0xff] }
  0xc2   : > { %4192 = vmatmul.mubr.f32.gmra.mxu0 %v6498_v11  ;;  %4231 = vmatpush3.msra.mxu1 %v3319_v41  ;;  %v3334_v11 = vld [vmem:[%s6379_s1 + $0x328] sm:$0xff] }
  0xc3   : > { %4310 = vmatprep.subr.mxu0 %v3335_v16  ;;  %4114 = vmatprep.mubr.f32.mxu1 %v5532_v31  ;;  %v6499_v41 = vld [vmem:[#allocation11_spill] sm:$0xff] }
  0xc4   : > { %4311 = vmatpush3.msra.mxu0 %v3335_v16  ;;  %4115 = vmatmul.mubr.f32.gmra.mxu1 %v5536_v14  ;;  %v5549_v16 = vld [vmem:[%s4685_s18 + $0x128] sm:$0xff] }
  0xc5   : > { %4194 = vmatprep.mubr.f32.mxu0 %v6499_v41  ;;  %4232 = vmatprep.subr.mxu1 %v3318_v35  ;;  %v3333_v41 = vld [vmem:[%s6379_s1 + $0x320] sm:$0xff] }
  0xc6   : > { %4195 = vmatmul.mubr.f32.gmra.mxu0 %v6500_v4  ;;  %4233 = vmatpush3.msra.mxu1 %v3318_v35  ;;  %v6502_v35 = vld [vmem:[#allocation17_spill] sm:$0xff] }
  0xc7   : > { %4312 = vmatprep.subr.mxu0 %v3334_v11  ;;  %4117 = vmatprep.mubr.f32.mxu1 %v4872_v34  ;;  %v3316_v34 = vld [vmem:[%s6379_s1 + $0x298] sm:$0xff] }
  0xc8   : > { %4313 = vmatpush3.msra.mxu0 %v3334_v11  ;;  %4118 = vmatmul.mubr.f32.gmra.mxu1 %v5549_v16  ;;  %v3332_v11 = vld [vmem:[%s6379_s1 + $0x318] sm:$0xff] }
  0xc9   : > { %4197 = vmatprep.mubr.f32.mxu0 %v6501_v7  ;;  %4234 = vmatprep.subr.mxu1 %v3317_v3  ;;  %v6503_v7 = vld [vmem:[#allocation19_spill] sm:$0xff] }
  0xca   : > { %4198 = vmatmul.mubr.f32.gmra.mxu0 %v6502_v35  ;;  %4235 = vmatpush3.msra.mxu1 %v3317_v3  ;;  %v6504_v35 = vld [vmem:[#allocation21_spill] sm:$0xff]  ;;  %v3315_v3 = vld [vmem:[%s6379_s1 + $0x290] sm:$0xff] }
  0xcb   : > { %4314 = vmatprep.subr.mxu0 %v3333_v41  ;;  %4120 = vmatprep.mubr.f32.mxu1 %v4924_v5  ;;  %v5572_v5 = vld [vmem:[%s4685_s18 + $0x180] sm:$0xff] }
  0xcc   : > { %4315 = vmatpush3.msra.mxu0 %v3333_v41  ;;  %4121 = vmatmul.mubr.f32.gmra.mxu1 %v4927_v6  ;;  %v5575_v6 = vld [vmem:[%s4685_s18 + $0x188] sm:$0xff]  ;;  %v3331_v41 = vld [vmem:[%s6379_s1 + $0x310] sm:$0xff] }
  0xcd   : > { %4200 = vmatprep.mubr.f32.mxu0 %v6503_v7  ;;  %4236 = vmatprep.subr.mxu1 %v3316_v34  ;;  %v6506_v7 = vld [vmem:[#allocation25_spill] sm:$0xff] }
  0xce   : > { %4201 = vmatmul.mubr.f32.gmra.mxu0 %v6504_v35  ;;  %4237 = vmatpush3.msra.mxu1 %v3316_v34  ;;  %v5582_v35 = vld [vmem:[%s4685_s18 + $0x190] sm:$0x3]  ;;  %v6505_v34 = vld [vmem:[#allocation23_spill] sm:$0xff] }
  0xcf   : > { %4316 = vmatprep.subr.mxu0 %v3332_v11  ;;  %4123 = vmatprep.mubr.f32.mxu1 %v4976_v1  ;;  %v3314_v1 = vld [vmem:[%s6379_s1 + $0x288] sm:$0xff]  ;;  %v1584_v4 = vrot.slane %v5582_v35, 1 }
  0xd0   : > { %4317 = vmatpush3.msra.mxu0 %v3332_v11  ;;  %4124 = vmatmul.mubr.f32.gmra.mxu1 %v4979_v19  ;;  %v1581_v11 = vrot.slane %v5572_v5, 1  ;;  %v1582_v19 = vrot.slane %v5575_v6, 1 }
  0xd1   : > { %4203 = vmatprep.mubr.f32.mxu0 %v6505_v34  ;;  %4238 = vmatprep.subr.mxu1 %v3315_v3 }
  0xd2   : > { %4204 = vmatmul.mubr.f32.gmra.mxu0 %v6506_v7  ;;  %4239 = vmatpush3.msra.mxu1 %v3315_v3  ;;  %v3330_v3 = vld [vmem:[%s6379_s1 + $0x308] sm:$0xff]  ;;  %v5600_v34 = vsel %vm337_vm0, %v1581_v11, %v1582_v19  ;;  %v4582_v11 = vld [vmem:[%s4685_s18 + $0x30] sm:$0xff] }
  0xd3   : > { %4318 = vmatprep.subr.mxu0 %v3331_v41  ;;  %4126 = vmatprep.mubr.f32.mxu1 %v5028_v0  ;;  %v6507_v7 = vld [vmem:[#allocation27_spill] sm:$0xff]  ;;  %6508 = vst [vmem:[#allocation6_spill] sm:$0xff] %v5600_v34  ;;  %v3313_v0 = vld [vmem:[%s6379_s1 + $0x280] sm:$0xff] }
  0xd4   : > { %4319 = vmatpush3.msra.mxu0 %v3331_v41  ;;  %4127 = vmatmul.mubr.f32.gmra.mxu1 %v5031_v63  ;;  %v5607_v63 = vsel %vm337_vm0, %v1582_v19, %v1584_v4  ;;  %v3329_v41 = vld [vmem:[%s6379_s1 + $0x300] sm:$0xff]  ;;  %v3376_v4 = vld [vmem:[%s6379_s1 + $0x478] sm:$0xff] }
  0xd5   : > { %4206 = vmatprep.mubr.f32.mxu0 %v5080_v38  ;;  %4240 = vmatprep.subr.mxu1 %v3314_v1  ;;  %6509 = vst [vmem:[#allocation8_spill] sm:$0xff] %v5607_v63  ;;  %v4583_v19 = vld [vmem:[%s4685_s18 + $0x38] sm:$0xff] }
  0xd6   : > { %4207 = vmatmul.mubr.f32.gmra.mxu0 %v6507_v7  ;;  %4241 = vmatpush3.msra.mxu1 %v3314_v1  ;;  %v3360_v1 = vld [vmem:[%s6379_s1 + $0x3f8] sm:$0xff]  ;;  %v3354_v7 = vld [vmem:[%s6379_s1 + $0x3c8] sm:$0xff] }
  0xd7   : > { %4320 = vmatprep.subr.mxu0 %v3330_v3  ;;  %4129 = vmatprep.mubr.f32.mxu1 %v5572_v5 }
  0xd8   : > { %4321 = vmatpush3.msra.mxu0 %v3330_v3  ;;  %4130 = vmatmul.mubr.f32.gmra.mxu1 %v5575_v6  ;;  %v3359_v3 = vld [vmem:[%s6379_s1 + $0x3f0] sm:$0xff] }
  0xd9   : > { %4209 = vmatprep.mubr.f32.mxu0 %v5600_v34  ;;  %4242 = vmatprep.subr.mxu1 %v3313_v0  ;;  %v4593_v34 = vld [vmem:[%s4685_s18 + $0xb0] sm:$0xff] }
  0xda   : > { %4210 = vmatmul.mubr.f32.gmra.mxu0 %v5607_v63  ;;  %4243 = vmatpush3.msra.mxu1 %v3313_v0  ;;  %v4585_v0 = vld [vmem:[%s4685_s18 + $0x50] sm:$0xff] }
  0xdb   : > { %4322 = vmatprep.subr.mxu0 %v3329_v41  ;;  %4244 = vmatprep.mubr.f32.mxu1 %v5129_v10  ;;  %v3375_v10 = vld [vmem:[%s6379_s1 + $0x470] sm:$0xff] }
  0xdc   : > { %4323 = vmatpush3.msra.mxu0 %v3329_v41  ;;  %4245 = vmatmul.mubr.f32.vlgmr.msra.gmra.mxu1 %v5138_v49  ;;  %v4584_v49 = vld [vmem:[%s4685_s18 + $0x48] sm:$0xff]  ;;  %v3371_v63 = vld [vmem:[%s6379_s1 + $0x450] sm:$0xff] }
  0xdd   : > { %4324 = vmatprep.mubr.f32.mxu0 %v4582_v11  ;;  %4372 = vmatprep.subr.mxu1 %v3360_v1  ;;  %v3358_v41 = vld [vmem:[%s6379_s1 + $0x3e8] sm:$0xff] }
  0xde   : > { %4325 = vmatmul.mubr.f32.vlgmr.msra.gmra.mxu0 %v4583_v19  ;;  %4373 = vmatpush3.msra.mxu1 %v3360_v1  ;;  %v3374_v1 = vld [vmem:[%s6379_s1 + $0x468] sm:$0xff]  ;;  %v3357_v19 = vld [vmem:[%s6379_s1 + $0x3e0] sm:$0xff] }
  0xdf   : > { %4452 = vmatprep.subr.mxu0 %v3376_v4  ;;  %4247 = vmatprep.mubr.f32.mxu1 %v5148_v45  ;;  %v4587_v11 = vld [vmem:[%s4685_s18 + $0x68] sm:$0xff] }
  0xe0   : > { %4453 = vmatpush3.msra.mxu0 %v3376_v4  ;;  %4248 = vmatmul.mubr.f32.gmra.mxu1 %v5157_v21  ;;  %v4586_v4 = vld [vmem:[%s4685_s18 + $0x60] sm:$0xff] }
  0xe1   : > { %4327 = vmatprep.mubr.f32.mxu0 %v4584_v49  ;;  %4374 = vmatprep.subr.mxu1 %v3359_v3  ;;  %v4589_v49 = vld [vmem:[%s4685_s18 + $0x80] sm:$0xff] }
  0xe2   : > { %4328 = vmatmul.mubr.f32.gmra.mxu0 %v4585_v0  ;;  %4375 = vmatpush3.msra.mxu1 %v3359_v3  ;;  %v3373_v3 = vld [vmem:[%s6379_s1 + $0x460] sm:$0xff]  ;;  %v3356_v0 = vld [vmem:[%s6379_s1 + $0x3d8] sm:$0xff] }
  0xe3   : > { %4454 = vmatprep.subr.mxu0 %v3375_v10  ;;  %4250 = vmatprep.mubr.f32.mxu1 %v5167_v22 }
  0xe4   : > { %4455 = vmatpush3.msra.mxu0 %v3375_v10  ;;  %4251 = vmatmul.mubr.f32.gmra.mxu1 %v5176_v39  ;;  %v4588_v10 = vld [vmem:[%s4685_s18 + $0x78] sm:$0xff] }
  0xe5   : > { %4330 = vmatprep.mubr.f32.mxu0 %v4586_v4  ;;  %4376 = vmatprep.subr.mxu1 %v3358_v41  ;;  %v4590_v4 = vld [vmem:[%s4685_s18 + $0x90] sm:$0xff] }
  0xe6   : > { %4331 = vmatmul.mubr.f32.gmra.mxu0 %v4587_v11  ;;  %4377 = vmatpush3.msra.mxu1 %v3358_v41  ;;  %v6510_v41 = vld [vmem:[#allocation28_spill] sm:$0xff] }
  0xe7   : > { %4456 = vmatprep.subr.mxu0 %v3374_v1  ;;  %4253 = vmatprep.mubr.f32.mxu1 %v5186_v40 }
  0xe8   : > { %4457 = vmatpush3.msra.mxu0 %v3374_v1  ;;  %4254 = vmatmul.mubr.f32.gmra.mxu1 %v5195_v29  ;;  %v3372_v1 = vld [vmem:[%s6379_s1 + $0x458] sm:$0xff] }
  0xe9   : > { %4333 = vmatprep.mubr.f32.mxu0 %v4588_v10  ;;  %4378 = vmatprep.subr.mxu1 %v3357_v19 }
  0xea   : > { %4334 = vmatmul.mubr.f32.gmra.mxu0 %v4589_v49  ;;  %4379 = vmatpush3.msra.mxu1 %v3357_v19  ;;  %v4591_v19 = vld [vmem:[%s4685_s18 + $0x98] sm:$0xff] }
  0xeb   : > { %4458 = vmatprep.subr.mxu0 %v3373_v3  ;;  %4256 = vmatprep.mubr.f32.mxu1 %v5205_v20 }
  0xec   : > { %4459 = vmatpush3.msra.mxu0 %v3373_v3  ;;  %4257 = vmatmul.mubr.f32.gmra.mxu1 %v6510_v41  ;;  %v3355_v3 = vld [vmem:[%s6379_s1 + $0x3d0] sm:$0xff] }
  0xed   : > { %4336 = vmatprep.mubr.f32.mxu0 %v4590_v4  ;;  %4380 = vmatprep.subr.mxu1 %v3356_v0  ;;  %v5664_v11 = vpop.f32.mrf.mxu1  ;;  %v6512_v4 = vld [vmem:[#allocation29_spill] sm:$0xff] }
  0xee   : > { %4337 = vmatmul.mubr.f32.gmra.mxu0 %v4591_v19  ;;  %4381 = vmatpush3.msra.mxu1 %v3356_v0  ;;  %v5670_v10 = vpop.f32.mrf.mxu0  ;;  %v4592_v0 = vld [vmem:[%s4685_s18 + $0xa8] sm:$0xff] }
  0xef   : > { %4460 = vmatprep.subr.mxu0 %v3372_v1  ;;  %4259 = vmatprep.mubr.f32.mxu1 %v5224_v59  ;;  %v5673_v49 = vpop.f32.mrf.mxu1 }
  0xf0   : > { %6511 = vst [vmem:[#allocation10_spill] sm:$0xff] %v5673_v49  ;;  %4461 = vmatpush3.msra.mxu0 %v3372_v1  ;;  %4260 = vmatmul.mubr.f32.gmra.mxu1 %v6512_v4  ;;  %v5679_v19 = vpop.f32.mrf.mxu0  ;;  %v6513_v1 = vld [vmem:[#allocation30_spill] sm:$0xff] }
  0xf1   : > { %4339 = vmatprep.mubr.f32.mxu0 %v4592_v0  ;;  %4382 = vmatprep.subr.mxu1 %v3355_v3  ;;  %v3370_v0 = vld [vmem:[%s6379_s1 + $0x448] sm:$0xff] }
  0xf2   : > { %4340 = vmatmul.mubr.f32.gmra.mxu0 %v4593_v34  ;;  %4383 = vmatpush3.msra.mxu1 %v3355_v3  ;;  %v5686_v38 = vpop.f32.mrf.mxu1 }
  0xf3   : > { %4462 = vmatprep.subr.mxu0 %v3371_v63  ;;  %4262 = vmatprep.mubr.f32.mxu1 %v5243_v60 }
  0xf4   : > { %4463 = vmatpush3.msra.mxu0 %v3371_v63  ;;  %4263 = vmatmul.mubr.f32.gmra.mxu1 %v6513_v1  ;;  %v5693_v49 = vpop.f32.mrf.mxu0  ;;  %v5695_v34 = vpop.f32.mrf.mxu1  ;;  %v3353_v63 = vld [vmem:[%s6379_s1 + $0x3c0] sm:$0xff] }
  0xf5   : > { %6514 = vst [vmem:[#allocation12_spill] sm:$0xff] %v5695_v34  ;;  %4342 = vmatprep.mubr.f32.mxu0 %v5484_v17  ;;  %4384 = vmatprep.subr.mxu1 %v3354_v7  ;;  %v3369_v17 = vld [vmem:[%s6379_s1 + $0x440] sm:$0xff] }
  0xf6   : > { %4343 = vmatmul.mubr.f32.gmra.mxu0 %v5488_v58  ;;  %4385 = vmatpush3.msra.mxu1 %v3354_v7  ;;  %v5702_v3 = vpop.f32.mrf.mxu0  ;;  %v3352_v58 = vld [vmem:[%s6379_s1 + $0x3b8] sm:$0xff] }
  0xf7   : > { %4464 = vmatprep.subr.mxu0 %v3370_v0  ;;  %4265 = vmatprep.mubr.f32.mxu1 %v5262_v48 }
  0xf8   : > { %4465 = vmatpush3.msra.mxu0 %v3370_v0  ;;  %4266 = vmatmul.mubr.f32.gmra.mxu1 %v5271_v56  ;;  %v5709_v34 = vpop.f32.mrf.mxu1 }
  0xf9   : > { %6515 = vst [vmem:[#allocation14_spill] sm:$0xff] %v5709_v34  ;;  %4345 = vmatprep.mubr.f32.mxu0 %v5500_v55  ;;  %4386 = vmatprep.subr.mxu1 %v3353_v63  ;;  %v3368_v55 = vld [vmem:[%s6379_s1 + $0x438] sm:$0xff] }
  0xfa   : > { %4346 = vmatmul.mubr.f32.gmra.mxu0 %v5504_v51  ;;  %4387 = vmatpush3.msra.mxu1 %v3353_v63  ;;  %v5716_v7 = vpop.f32.mrf.mxu0  ;;  %v5718_v0 = vpop.f32.mrf.mxu1  ;;  %v3351_v63 = vld [vmem:[%s6379_s1 + $0x3b0] sm:$0xff]  ;;  %v4598_v34 = vld [vmem:[%s4685_s18 + $0x158] sm:$0xff] }
  0xfb   : > { %6516 = vst [vmem:[#allocation16_spill] sm:$0xff] %v5718_v0  ;;  %4466 = vmatprep.subr.mxu0 %v3369_v17  ;;  %4268 = vmatprep.mubr.f32.mxu1 %v5281_v13 }
  0xfc   : > { %4467 = vmatpush3.msra.mxu0 %v3369_v17  ;;  %4269 = vmatmul.mubr.f32.gmra.mxu1 %v5290_v15  ;;  %v5725_v51 = vpop.f32.mrf.mxu0 }
  0xfd   : > { %4348 = vmatprep.mubr.f32.mxu0 %v5516_v25  ;;  %4388 = vmatprep.subr.mxu1 %v3352_v58  ;;  %v3367_v25 = vld [vmem:[%s6379_s1 + $0x430] sm:$0xff] }
  0xfe   : > { %4349 = vmatmul.mubr.f32.gmra.mxu0 %v5520_v23  ;;  %4389 = vmatpush3.msra.mxu1 %v3352_v58  ;;  %v5732_v0 = vpop.f32.mrf.mxu1  ;;  %v3350_v58 = vld [vmem:[%s6379_s1 + $0x3a8] sm:$0xff] }
  0xff   : > { %6517 = vst [vmem:[#allocation18_spill] sm:$0xff] %v5732_v0  ;;  %4468 = vmatprep.subr.mxu0 %v3368_v55  ;;  %4271 = vmatprep.mubr.f32.mxu1 %v5300_v26 }
 0x100   : > { %4469 = vmatpush3.msra.mxu0 %v3368_v55  ;;  %4272 = vmatmul.mubr.f32.gmra.mxu1 %v5309_v18  ;;  %v5739_v17 = vpop.f32.mrf.mxu0  ;;  %v5741_v23 = vpop.f32.mrf.mxu1 }
 0x101   : > { %6518 = vst [vmem:[#allocation20_spill] sm:$0xff] %v5741_v23  ;;  %4351 = vmatprep.mubr.f32.mxu0 %v5532_v31  ;;  %4390 = vmatprep.subr.mxu1 %v3351_v63  ;;  %v3366_v31 = vld [vmem:[%s6379_s1 + $0x428] sm:$0xff] }
 0x102   : > { %4352 = vmatmul.mubr.f32.gmra.mxu0 %v5536_v14  ;;  %4391 = vmatpush3.msra.mxu1 %v3351_v63  ;;  %v5748_v55 = vpop.f32.mrf.mxu0  ;;  %v4594_v14 = vld [vmem:[%s4685_s18 + $0x120] sm:$0xff] }
 0x103   : > { %4470 = vmatprep.subr.mxu0 %v3367_v25  ;;  %4274 = vmatprep.mubr.f32.mxu1 %v5319_v46  ;;  %v3349_v63 = vld [vmem:[%s6379_s1 + $0x3a0] sm:$0xff] }
 0x104   : > { %4471 = vmatpush3.msra.mxu0 %v3367_v25  ;;  %4275 = vmatmul.mubr.f32.gmra.mxu1 %v5328_v33  ;;  %v5755_v23 = vpop.f32.mrf.mxu1 }
 0x105   : > { %6519 = vst [vmem:[#allocation22_spill] sm:$0xff] %v5755_v23  ;;  %4354 = vmatprep.mubr.f32.mxu0 %v4594_v14  ;;  %4392 = vmatprep.subr.mxu1 %v3350_v58  ;;  %v3365_v14 = vld [vmem:[%s6379_s1 + $0x420] sm:$0xff] }
 0x106   : > { %4355 = vmatmul.mubr.f32.gmra.mxu0 %v5549_v16  ;;  %4393 = vmatpush3.msra.mxu1 %v3350_v58  ;;  %v5762_v25 = vpop.f32.mrf.mxu0  ;;  %v5764_v0 = vpop.f32.mrf.mxu1  ;;  %v4595_v58 = vld [vmem:[%s4685_s18 + $0x138] sm:$0xff]  ;;  %v4596_v23 = vld [vmem:[%s4685_s18 + $0x140] sm:$0xff] }
 0x107   : > { %6520 = vst [vmem:[#allocation24_spill] sm:$0xff] %v5764_v0  ;;  %4472 = vmatprep.subr.mxu0 %v3366_v31  ;;  %4277 = vmatprep.mubr.f32.mxu1 %v5338_v2  ;;  %v4600_v2 = vld [vmem:[%s4685_s18 + $0x170] sm:$0xff] }
 0x108   : > { %4473 = vmatpush3.msra.mxu0 %v3366_v31  ;;  %4278 = vmatmul.mubr.f32.gmra.mxu1 %v5347_v30  ;;  %v5771_v16 = vpop.f32.mrf.mxu0  ;;  %v3348_v31 = vld [vmem:[%s6379_s1 + $0x398] sm:$0xff] }
 0x109   : > { %4357 = vmatprep.mubr.f32.mxu0 %v4595_v58  ;;  %4394 = vmatprep.subr.mxu1 %v3349_v63  ;;  %v3364_v58 = vld [vmem:[%s6379_s1 + $0x418] sm:$0xff] }
 0x10a   : > { %4358 = vmatmul.mubr.f32.gmra.mxu0 %v4596_v23  ;;  %4395 = vmatpush3.msra.mxu1 %v3349_v63  ;;  %v5778_v0 = vpop.f32.mrf.mxu1  ;;  %v4597_v63 = vld [vmem:[%s4685_s18 + $0x150] sm:$0xff] }
 0x10b   : > { %6521 = vst [vmem:[#allocation2_spill] sm:$0xff] %v5778_v0  ;;  %4474 = vmatprep.subr.mxu0 %v3365_v14  ;;  %4280 = vmatprep.mubr.f32.mxu1 %v5357_v27  ;;  %v1865_v27 = vrot.slane %v5582_v35, 2 }
 0x10c   : > { %4475 = vmatpush3.msra.mxu0 %v3365_v14  ;;  %4281 = vmatmul.mubr.f32.gmra.mxu1 %v5366_v36  ;;  %v5785_v30 = vpop.f32.mrf.mxu0  ;;  %v5787_v23 = vpop.f32.mrf.mxu1  ;;  %v3347_v14 = vld [vmem:[%s6379_s1 + $0x390] sm:$0xff]  ;;  %v4599_v36 = vld [vmem:[%s4685_s18 + $0x168] sm:$0xff] }
 0x10d   : > { %6522 = vst [vmem:[#allocation3_spill] sm:$0xff] %v5787_v23  ;;  %4360 = vmatprep.mubr.f32.mxu0 %v4597_v63  ;;  %4396 = vmatprep.subr.mxu1 %v3348_v31  ;;  %v3363_v63 = vld [vmem:[%s6379_s1 + $0x410] sm:$0xff] }
 0x10e   : > { %4361 = vmatmul.mubr.f32.gmra.mxu0 %v4598_v34  ;;  %4397 = vmatpush3.msra.mxu1 %v3348_v31  ;;  %v5794_v0 = vpop.f32.mrf.mxu0  ;;  %v1862_v34 = vrot.slane %v5572_v5, 2  ;;  %v1863_v31 = vrot.slane %v5575_v6, 2 }
 0x10f   : > { %4476 = vmatprep.subr.mxu0 %v3364_v58  ;;  %4283 = vmatprep.mubr.f32.mxu1 %v5376_v47 }
 0x110   : > { %4477 = vmatpush3.msra.mxu0 %v3364_v58  ;;  %4284 = vmatmul.mubr.f32.gmra.mxu1 %v5385_v43  ;;  %v5801_v23 = vpop.f32.mrf.mxu1  ;;  %v3346_v58 = vld [vmem:[%s6379_s1 + $0x388] sm:$0xff]  ;;  %v5823_v35 = vsel %vm917_vm1, %v1862_v34, %v1863_v31  ;;  %v5840_v34 = vld [vmem:[%s4685_s18 + $0x1a0] sm:$0xff] }
 0x111   : > { %6523 = vst [vmem:[#allocation28_spill] sm:$0xff] %v5801_v23  ;;  %4363 = vmatprep.mubr.f32.mxu0 %v4599_v36  ;;  %4398 = vmatprep.subr.mxu1 %v3347_v14 }
 0x112   : > { %4364 = vmatmul.mubr.f32.gmra.mxu0 %v4600_v2  ;;  %4399 = vmatpush3.msra.mxu1 %v3347_v14  ;;  %v5811_v43 = vpop.f32.mrf.mxu0  ;;  %v5813_v23 = vpop.f32.mrf.mxu1  ;;  %v3362_v2 = vld [vmem:[%s6379_s1 + $0x408] sm:$0xff]  ;;  %v5827_v14 = vsel %vm917_vm1, %v1863_v31, %v1865_v27 }
 0x113   : > { %6524 = vst [vmem:[#allocation29_spill] sm:$0xff] %v5813_v23  ;;  %4478 = vmatprep.subr.mxu0 %v3363_v63  ;;  %4286 = vmatprep.mubr.f32.mxu1 %v5395_v53  ;;  %6525 = vst [vmem:[#allocation30_spill] sm:$0xff] %v5827_v14  ;;  %v5833_v23 = vld [vmem:[%s4685_s18 + $0x198] sm:$0xff] }
 0x114   : > { %4479 = vmatpush3.msra.mxu0 %v3363_v63  ;;  %4287 = vmatmul.mubr.f32.gmra.mxu1 %v5402_v57  ;;  %v5820_v36 = vpop.f32.mrf.mxu0  ;;  %v3345_v57 = vld [vmem:[%s6379_s1 + $0x380] sm:$0xff] }
 0x115   : > { %4366 = vmatprep.mubr.f32.mxu0 %v5572_v5  ;;  %4400 = vmatprep.subr.mxu1 %v3346_v58 }
 0x116   : > { %4367 = vmatmul.mubr.f32.gmra.mxu0 %v5575_v6  ;;  %4401 = vmatpush3.msra.mxu1 %v3346_v58  ;;  %v5830_v63 = vpop.f32.mrf.mxu1  ;;  %v3361_v6 = vld [vmem:[%s6379_s1 + $0x400] sm:$0xff] }
 0x117   : > { %6526 = vst [vmem:[#allocation37_spill] sm:$0xff] %v5830_v63  ;;  %4480 = vmatprep.subr.mxu0 %v3362_v2  ;;  %4289 = vmatprep.mubr.f32.mxu1 %v5823_v35 }
 0x118   : > { %4481 = vmatpush3.msra.mxu0 %v3362_v2  ;;  %4290 = vmatmul.mubr.f32.gmra.mxu1 %v5827_v14  ;;  %v5843_v27 = vpop.f32.mrf.mxu0  ;;  %v5845_v5 = vpop.f32.mrf.mxu1 }
 0x119   : > { %6527 = vst [vmem:[#allocation38_spill] sm:$0xff] %v5845_v5  ;;  %4369 = vmatprep.mubr.f32.mxu0 %v5833_v23  ;;  %4402 = vmatprep.subr.mxu1 %v3345_v57 }
 0x11a   : > { %4370 = vmatmul.mubr.f32.gmra.mxu0 %v5840_v34  ;;  %4403 = vmatpush3.msra.mxu1 %v3345_v57  ;;  %v5852_v31 = vpop.f32.mrf.mxu0 }
 0x11b   : > { %4482 = vmatprep.subr.mxu0 %v3361_v6  ;;  %4404 = vmatprep.mubr.f32.mxu1 %v6484_v32 }
 0x11c   : > { %4483 = vmatpush3.msra.mxu0 %v3361_v6  ;;  %v3926_v58 = vpop.f32.mrf.mxu1  ;;  %4405 = vmatmul.mubr.f32.vlgmr.msra.gmra.mxu1 %v6485_v54 }
 0x11d   : > { %v764_v2 = vadd.f32 %v3926_v58, %v5670_v10  ;;  %4484 = vmatprep.mubr.f32.mxu0 %v5148_v45  ;;  %4407 = vmatprep.mubr.f32.mxu1 %v6486_v52 }
 0x11e   : > { %v4006_v5 = vpop.f32.mrf.mxu0  ;;  %4485 = vmatmul.mubr.f32.vlgmr.msra.gmra.mxu0 %v5157_v21  ;;  %v758_v63 = vpop.f32.mrf.mxu1 }
 0x11f   : > { %v5860_v57 = vadd.f32 %v4006_v5, %v764_v2  ;;  %v759_v14 = vadd.f32 %v758_v63, %v5679_v19  ;;  %4487 = vmatprep.mubr.f32.mxu0 %v5167_v22 }
 0x120   : > { %v1113_v32 = vpop.f32.mrf.mxu0  ;;  %v3929_v6 = vpop.f32.mrf.mxu1  ;;  %4408 = vmatmul.mubr.f32.gmra.mxu1 %v6487_v61 }
 0x121   : > { %v5865_v54 = vadd.f32 %v1113_v32, %v759_v14  ;;  %v774_v45 = vadd.f32 %v3929_v6, %v5693_v49  ;;  %4410 = vmatprep.mubr.f32.mxu1 %v6488_v8 }
 0x122   : > { %v4009_v52 = vpop.f32.mrf.mxu0  ;;  %4488 = vmatmul.mubr.f32.gmra.mxu0 %v5176_v39  ;;  %v768_v21 = vpop.f32.mrf.mxu1 }
 0x123   : > { %v5870_v10 = vadd.f32 %v4009_v52, %v774_v45  ;;  %v769_v19 = vadd.f32 %v768_v21, %v5702_v3  ;;  %4490 = vmatprep.mubr.f32.mxu0 %v5186_v40  ;;  %v6528_v21 = vld [vmem:[#allocation4_spill] sm:$0xff] }
 0x124   : > { %v1123_v22 = vpop.f32.mrf.mxu0  ;;  %v3932_v63 = vpop.f32.mrf.mxu1  ;;  %4411 = vmatmul.mubr.f32.gmra.mxu1 %v6489_v37 }
 0x125   : > { %v5875_v61 = vadd.f32 %v1123_v22, %v769_v19  ;;  %v784_v49 = vadd.f32 %v3932_v63, %v5716_v7  ;;  %4413 = vmatprep.mubr.f32.mxu1 %v6490_v42  ;;  %v6529_v63 = vld [vmem:[#allocation5_spill] sm:$0xff] }
 0x126   : > { %v4012_v8 = vpop.f32.mrf.mxu0  ;;  %4491 = vmatmul.mubr.f32.gmra.mxu0 %v5195_v29  ;;  %v778_v39 = vpop.f32.mrf.mxu1 }
 0x127   : > { %v5880_v14 = vadd.f32 %v4012_v8, %v784_v49  ;;  %v779_v3 = vadd.f32 %v778_v39, %v5725_v51  ;;  %4493 = vmatprep.mubr.f32.mxu0 %v5205_v20  ;;  %v6530_v49 = vld [vmem:[#allocation7_spill] sm:$0xff] }
 0x128   : > { %v1133_v40 = vpop.f32.mrf.mxu0  ;;  %v3935_v5 = vpop.f32.mrf.mxu1  ;;  %4414 = vmatmul.mubr.f32.gmra.mxu1 %v6491_v44 }
 0x129   : > { %v5885_v37 = vadd.f32 %v1133_v40, %v779_v3  ;;  %v794_v7 = vadd.f32 %v3935_v5, %v5739_v17  ;;  %4416 = vmatprep.mubr.f32.mxu1 %v6492_v24  ;;  %v6531_v40 = vld [vmem:[#allocation9_spill] sm:$0xff] }
 0x12a   : > { %v4015_v42 = vpop.f32.mrf.mxu0  ;;  %4494 = vmatmul.mubr.f32.gmra.mxu0 %v6510_v41  ;;  %v788_v29 = vpop.f32.mrf.mxu1 }
 0x12b   : > { %v5890_v58 = vadd.f32 %v4015_v42, %v794_v7  ;;  %v789_v51 = vadd.f32 %v788_v29, %v5748_v55  ;;  %4496 = vmatprep.mubr.f32.mxu0 %v5224_v59  ;;  %v6532_v7 = vld [vmem:[#allocation11_spill] sm:$0xff] }
 0x12c   : > { %v1143_v20 = vpop.f32.mrf.mxu0  ;;  %v3938_v2 = vpop.f32.mrf.mxu1  ;;  %4417 = vmatmul.mubr.f32.gmra.mxu1 %v5066_v62 }
 0x12d   : > { %v5895_v44 = vadd.f32 %v1143_v20, %v789_v51  ;;  %v804_v17 = vadd.f32 %v3938_v2, %v5762_v25  ;;  %4419 = vmatprep.mubr.f32.mxu1 %v5088_v50  ;;  %v6533_v51 = vld [vmem:[#allocation10_spill] sm:$0xff]  ;;  %v6534_v2 = vld [vmem:[#allocation13_spill] sm:$0xff] }
 0x12e   : > { %v4018_v24 = vpop.f32.mrf.mxu0  ;;  %4497 = vmatmul.mubr.f32.gmra.mxu0 %v6512_v4  ;;  %v798_v41 = vpop.f32.mrf.mxu1 }
 0x12f   : > { %v5900_v32 = vadd.f32 %v4018_v24, %v804_v17  ;;  %v799_v55 = vadd.f32 %v798_v41, %v5771_v16  ;;  %4499 = vmatprep.mubr.f32.mxu0 %v5243_v60  ;;  %v6535_v24 = vld [vmem:[#allocation15_spill] sm:$0xff] }
 0x130   : > { %v1153_v59 = vpop.f32.mrf.mxu0  ;;  %v3941_v6 = vpop.f32.mrf.mxu1  ;;  %4420 = vmatmul.mubr.f32.gmra.mxu1 %v5098_v28 }
 0x131   : > { %v5905_v62 = vadd.f32 %v1153_v59, %v799_v55  ;;  %v814_v25 = vadd.f32 %v3941_v6, %v5785_v30  ;;  %4422 = vmatprep.mubr.f32.mxu1 %v6493_v9  ;;  %v6536_v59 = vld [vmem:[#allocation12_spill] sm:$0xff] }
 0x132   : > { %v4021_v50 = vpop.f32.mrf.mxu0  ;;  %4500 = vmatmul.mubr.f32.gmra.mxu0 %v6513_v1  ;;  %v808_v4 = vpop.f32.mrf.mxu1 }
 0x133   : > { %v5910_v45 = vadd.f32 %v4021_v50, %v814_v25  ;;  %v809_v16 = vadd.f32 %v808_v4, %v5794_v0  ;;  %4502 = vmatprep.mubr.f32.mxu0 %v5262_v48  ;;  %v6537_v25 = vld [vmem:[#allocation31_spill] sm:$0xff]  ;;  %v6538_v4 = vld [vmem:[#allocation17_spill] sm:$0xff] }
 0x134   : > { %v1163_v60 = vpop.f32.mrf.mxu0  ;;  %v3944_v52 = vpop.f32.mrf.mxu1  ;;  %4423 = vmatmul.mubr.f32.gmra.mxu1 %v6494_v12 }
 0x135   : > { %v5915_v28 = vadd.f32 %v1163_v60, %v809_v16  ;;  %v824_v30 = vadd.f32 %v3944_v52, %v5811_v43  ;;  %4425 = vmatprep.mubr.f32.mxu1 %v6528_v21  ;;  %v6539_v60 = vld [vmem:[#allocation14_spill] sm:$0xff]  ;;  %v6540_v52 = vld [vmem:[#allocation19_spill] sm:$0xff]  ;;  %v6541_v21 = vld [vmem:[#allocation32_spill] sm:$0xff] }
 0x136   : > { %v4024_v9 = vpop.f32.mrf.mxu0  ;;  %4503 = vmatmul.mubr.f32.gmra.mxu0 %v5271_v56  ;;  %v818_v1 = vpop.f32.mrf.mxu1 }
 0x137   : > { %v5920_v19 = vadd.f32 %v4024_v9, %v824_v30  ;;  %v819_v0 = vadd.f32 %v818_v1, %v5820_v36  ;;  %4505 = vmatprep.mubr.f32.mxu0 %v5281_v13  ;;  %v6542_v1 = vld [vmem:[#allocation16_spill] sm:$0xff] }
 0x138   : > { %v1173_v48 = vpop.f32.mrf.mxu0  ;;  %v3947_v22 = vpop.f32.mrf.mxu1  ;;  %4426 = vmatmul.mubr.f32.gmra.mxu1 %v6529_v63 }
 0x139   : > { %v5925_v12 = vadd.f32 %v1173_v48, %v819_v0  ;;  %v834_v43 = vadd.f32 %v3947_v22, %v5843_v27  ;;  %4428 = vmatprep.mubr.f32.mxu1 %v6530_v49  ;;  %v6543_v48 = vld [vmem:[#allocation33_spill] sm:$0xff] }
 0x13a   : > { %v4027_v8 = vpop.f32.mrf.mxu0  ;;  %4506 = vmatmul.mubr.f32.gmra.mxu0 %v5290_v15  ;;  %v828_v56 = vpop.f32.mrf.mxu1 }
 0x13b   : > { %v5930_v39 = vadd.f32 %v4027_v8, %v834_v43  ;;  %v829_v36 = vadd.f32 %v828_v56, %v5852_v31  ;;  %4508 = vmatprep.mubr.f32.mxu0 %v5300_v26  ;;  %v6544_v43 = vld [vmem:[#allocation21_spill] sm:$0xff]  ;;  %v6545_v8 = vld [vmem:[#allocation18_spill] sm:$0xff] }
 0x13c   : > { %v1183_v13 = vpop.f32.mrf.mxu0  ;;  %v3950_v3 = vpop.f32.mrf.mxu1  ;;  %4429 = vmatmul.mubr.f32.gmra.mxu1 %v6531_v40 }
 0x13d   : > { %v5935_v5 = vadd.f32 %v1183_v13, %v829_v36  ;;  %v844_v27 = vadd.f32 %v3950_v3, %v5664_v11  ;;  %4431 = vmatprep.mubr.f32.mxu1 %v6532_v7  ;;  %v6546_v36 = vld [vmem:[#allocation23_spill] sm:$0xff]  ;;  %v6547_v3 = vld [vmem:[#allocation34_spill] sm:$0xff]  ;;  %v6548_v7 = vld [vmem:[#allocation20_spill] sm:$0xff] }
 0x13e   : > { %v4030_v42 = vpop.f32.mrf.mxu0  ;;  %4509 = vmatmul.mubr.f32.gmra.mxu0 %v5309_v18  ;;  %v838_v15 = vpop.f32.mrf.mxu1 }
 0x13f   : > { %v5940_v29 = vadd.f32 %v4030_v42, %v844_v27  ;;  %v839_v31 = vadd.f32 %v838_v15, %v6533_v51  ;;  %4511 = vmatprep.mubr.f32.mxu0 %v5319_v46 }
 0x140   : > { %v1193_v26 = vpop.f32.mrf.mxu0  ;;  %v3953_v20 = vpop.f32.mrf.mxu1  ;;  %4432 = vmatmul.mubr.f32.gmra.mxu1 %v6534_v2 }
 0x141   : > { %v5945_v17 = vadd.f32 %v1193_v26, %v839_v31  ;;  %v854_v11 = vadd.f32 %v3953_v20, %v5686_v38  ;;  %4434 = vmatprep.mubr.f32.mxu1 %v6535_v24  ;;  %v6549_v31 = vld [vmem:[#allocation25_spill] sm:$0xff]  ;;  %v6550_v20 = vld [vmem:[#allocation22_spill] sm:$0xff]  ;;  %v2420_v24 = vrot.slane %v5833_v23, 1 }
 0x142   : > { %v4033_v41 = vpop.f32.mrf.mxu0  ;;  %4512 = vmatmul.mubr.f32.gmra.mxu0 %v5328_v33  ;;  %v848_v18 = vpop.f32.mrf.mxu1 }
 0x143   : > { %v5950_v55 = vadd.f32 %v4033_v41, %v854_v11  ;;  %v849_v6 = vadd.f32 %v848_v18, %v6536_v59  ;;  %4514 = vmatprep.mubr.f32.mxu0 %v6537_v25  ;;  %v6551_v11 = vld [vmem:[#allocation26_spill] sm:$0xff]  ;;  %v2421_v41 = vrot.slane %v5840_v34, 1  ;;  %v6552_v59 = vld [vmem:[#allocation35_spill] sm:$0xff] }
 0x144   : > { %v1203_v46 = vpop.f32.mrf.mxu0  ;;  %v3956_v50 = vpop.f32.mrf.mxu1  ;;  %4435 = vmatmul.mubr.f32.gmra.mxu1 %v6538_v4  ;;  %v272_v25 = vld [vmem:[%s4685_s18 + $0x1a8] sm:$0x3]  ;;  %v2701_v4 = vrot.slane %v5833_v23, 2  ;;  %s3379_s18 = sshll.u32 %s6646_s16, 8 }
 0x145   : > { %v5955_v16 = vadd.f32 %v1203_v46, %v849_v6  ;;  %v864_v38 = vadd.f32 %v3956_v50, %v6539_v60  ;;  %4437 = vmatprep.mubr.f32.mxu1 %v6540_v52  ;;  %v6553_v46 = vld [vmem:[#allocation24_spill] sm:$0xff]  ;;  %v2702_v60 = vrot.slane %v5840_v34, 2  ;;  %v6558_v34 = vld [vmem:[#allocation3_spill] sm:$0xff]  ;;  %s6250_s8 = scalar_lea.vmem %s6380_s2, %s3379_s18 }
 0x146   : > { %v4036_v30 = vpop.f32.mrf.mxu0  ;;  %4515 = vmatmul.mubr.f32.gmra.mxu0 %v6541_v21  ;;  %v858_v33 = vpop.f32.mrf.mxu1 }
 0x147   : > { %v5960_v9 = vadd.f32 %v4036_v30, %v864_v38  ;;  %v859_v0 = vadd.f32 %v858_v33, %v6542_v1  ;;  %4517 = vmatprep.mubr.f32.mxu0 %v6543_v48  ;;  %v6554_v30 = vld [vmem:[#allocation27_spill] sm:$0xff]  ;;  %v6555_v33 = vld [vmem:[#allocation2_spill] sm:$0xff]  ;;  %v2423_v48 = vrot.slane %v272_v25, 1 }
 0x148   : > { %v1213_v22 = vpop.f32.mrf.mxu0  ;;  %v3959_v63 = vpop.f32.mrf.mxu1  ;;  %4438 = vmatmul.mubr.f32.gmra.mxu1 %v6544_v43 }
 0x149   : > { %v5965_v49 = vadd.f32 %v1213_v22, %v859_v0  ;;  %v874_v56 = vadd.f32 %v3959_v63, %v6545_v8  ;;  %4440 = vmatprep.mubr.f32.mxu1 %v6546_v36  ;;  %v6556_v0 = vld [vmem:[#allocation6_spill] sm:$0xff]  ;;  %v6557_v63 = vld [vmem:[#allocation36_spill] sm:$0xff] }
 0x14a   : > { %v4039_v13 = vpop.f32.mrf.mxu0  ;;  %4518 = vmatmul.mubr.f32.gmra.mxu0 %v6547_v3  ;;  %v868_v40 = vpop.f32.mrf.mxu1  ;;  %v6559_v3 = vld [vmem:[#allocation8_spill] sm:$0xff] }
 0x14b   : > { %v5970_v27 = vadd.f32 %v4039_v13, %v874_v56  ;;  %v869_v42 = vadd.f32 %v868_v40, %v6548_v7  ;;  %4520 = vmatprep.mubr.f32.mxu0 %v5376_v47  ;;  %v2704_v56 = vrot.slane %v272_v25, 2  ;;  %v2703_v40 = vsel %vm917_vm1, %v2701_v4, %v2702_v60 }
 0x14c   : > { %v1223_v15 = vpop.f32.mrf.mxu0  ;;  %v3962_v51 = vpop.f32.mrf.mxu1  ;;  %4441 = vmatmul.mubr.f32.gmra.mxu1 %v6549_v31 }
 0x14d   : > { %v5975_v26 = vadd.f32 %v1223_v15, %v869_v42  ;;  %v884_v2 = vadd.f32 %v3962_v51, %v6550_v20  ;;  %4443 = vmatprep.mubr.f32.mxu1 %v6551_v11  ;;  %v6560_v42 = vld [vmem:[#allocation28_spill] sm:$0xff]  ;;  %v2424_v51 = vsel %vm337_vm0, %v2421_v41, %v2423_v48  ;;  %v6561_v20 = vld [vmem:[#allocation30_spill] sm:$0xff] }
 0x14e   : > { %v4042_v18 = vpop.f32.mrf.mxu0  ;;  %4521 = vmatmul.mubr.f32.gmra.mxu0 %v6552_v59  ;;  %v878_v6 = vpop.f32.mrf.mxu1 }
 0x14f   : > { %v5983_v47 = vadd.f32 %v4042_v18, %v884_v2  ;;  %v879_v50 = vadd.f32 %v878_v6, %v6553_v46  ;;  %4523 = vmatprep.mubr.f32.mxu0 %v5395_v53  ;;  %v2422_v53 = vsel %vm337_vm0, %v2420_v24, %v2421_v41  ;;  %v2705_v18 = vsel %vm917_vm1, %v2702_v60, %v2704_v56  ;;  %v6563_v46 = vld [vmem:[#allocation37_spill] sm:$0xff] }
 0x150   : > { %v1233_v38 = vpop.f32.mrf.mxu0  ;;  %v3965_v52 = vpop.f32.mrf.mxu1  ;;  %4444 = vmatmul.mubr.f32.gmra.mxu1 %v6554_v30 }
 0x151   : > { %v5990_v21 = vadd.f32 %v1233_v38, %v879_v50  ;;  %v894_v1 = vadd.f32 %v3965_v52, %v6555_v33  ;;  %4446 = vmatprep.mubr.f32.mxu1 %v6556_v0  ;;  %v6564_v52 = vld [vmem:[#allocation38_spill] sm:$0xff] }
 0x152   : > { %v4045_v22 = vpop.f32.mrf.mxu0  ;;  %4524 = vmatmul.mubr.f32.gmra.mxu0 %v6557_v63  ;;  %v888_v43 = vpop.f32.mrf.mxu1 }
 0x153   : > { %v5996_v23 = vadd.f32 %v4045_v22, %v894_v1  ;;  %v889_v8 = vadd.f32 %v888_v43, %v6558_v34  ;;  %4526 = vmatprep.mubr.f32.mxu0 %v5823_v35  ;;  %v6562_v35 = vld [vmem:[#allocation29_spill] sm:$0xff] }
 0x154   : > { %v1243_v36 = vpop.f32.mrf.mxu0  ;;  %v3968_v13 = vpop.f32.mrf.mxu1  ;;  %4447 = vmatmul.mubr.f32.gmra.mxu1 %v6559_v3 }
 0x155   : > { %v6002_v7 = vadd.f32 %v1243_v36, %v889_v8  ;;  %v904_v15 = vadd.f32 %v3968_v13, %v6560_v42  ;;  %4449 = vmatprep.mubr.f32.mxu1 %v2422_v53 }
 0x156   : > { %v4048_v31 = vpop.f32.mrf.mxu0  ;;  %4527 = vmatmul.mubr.f32.gmra.mxu0 %v6561_v20  ;;  %v898_v2 = vpop.f32.mrf.mxu1 }
 0x157   : > { %v6007_v11 = vadd.f32 %v4048_v31, %v904_v15  ;;  %v899_v24 = vadd.f32 %v898_v2, %v6562_v35  ;;  %4529 = vmatprep.mubr.f32.mxu0 %v2703_v40 }
 0x158   : > { %v1253_v59 = vpop.f32.mrf.mxu0  ;;  %v3971_v6 = vpop.f32.mrf.mxu1  ;;  %4450 = vmatmul.mubr.f32.gmra.mxu1 %v2424_v51 }
 0x159   : > { %v6011_v25 = vadd.f32 %v1253_v59, %v899_v24  ;;  %v914_v50 = vadd.f32 %v3971_v6, %v6563_v46 }
 0x15a   : > { %v4051_v4 = vpop.f32.mrf.mxu0  ;;  %4530 = vmatmul.mubr.f32.gmra.mxu0 %v2705_v18  ;;  %v908_v41 = vpop.f32.mrf.mxu1 }
 0x15b   : > { %v6014_v38 = vadd.f32 %v4051_v4, %v914_v50  ;;  %v909_v30 = vadd.f32 %v908_v41, %v6564_v52 }
 0x15c   : > { %v1263_v33 = vpop.f32.mrf.mxu0  ;;  %v4086_v1 = vpop.f32.mrf.mxu1 }
 0x15d   : > { %v6017_v0 = vadd.f32 %v1263_v33, %v909_v30  ;;  %v1547_v60 = vadd.f32 %v4086_v1, %v5860_v57 }
 0x15e   : > { %v4166_v48 = vpop.f32.mrf.mxu0  ;;  %v1387_v22 = vpop.f32.mrf.mxu1 }
 0x15f   : > { %v6020_v63 = vadd.f32 %v4166_v48, %v1547_v60  ;;  %v1546_v43 = vadd.f32 %v1387_v22, %v5865_v54 }
 0x160   : > { %v1671_v53 = vpop.f32.mrf.mxu0  ;;  %v4089_v34 = vpop.f32.mrf.mxu1 }
 0x161   : > { %v6023_v8 = vadd.f32 %v1671_v53, %v1546_v43  ;;  %v1549_v56 = vadd.f32 %v4089_v34, %v5870_v10 }
 0x162   : > { %v4169_v36 = vpop.f32.mrf.mxu0  ;;  %v1397_v13 = vpop.f32.mrf.mxu1 }
 0x163   : > { %v6026_v3 = vadd.f32 %v4169_v36, %v1549_v56  ;;  %v1548_v40 = vadd.f32 %v1397_v13, %v5875_v61 }
 0x164   : > { %v1681_v42 = vpop.f32.mrf.mxu0  ;;  %v4092_v57 = vpop.f32.mrf.mxu1 }
 0x165   : > { %v6029_v15 = vadd.f32 %v1681_v42, %v1548_v40  ;;  %v1551_v51 = vadd.f32 %v4092_v57, %v5880_v14 }
 0x166   : > { %v4172_v31 = vpop.f32.mrf.mxu0  ;;  %v1407_v54 = vpop.f32.mrf.mxu1 }
 0x167   : > { %v6032_v20 = vadd.f32 %v4172_v31, %v1551_v51  ;;  %v1550_v2 = vadd.f32 %v1407_v54, %v5885_v37 }
 0x168   : > { %v1691_v35 = vpop.f32.mrf.mxu0  ;;  %v4095_v10 = vpop.f32.mrf.mxu1 }
 0x169   : > { %v6035_v24 = vadd.f32 %v1691_v35, %v1550_v2  ;;  %v1553_v18 = vadd.f32 %v4095_v10, %v5890_v58 }
 0x16a   : > { %v4175_v59 = vpop.f32.mrf.mxu0  ;;  %v1417_v61 = vpop.f32.mrf.mxu1 }
 0x16b   : > { %v6038_v6 = vadd.f32 %v4175_v59, %v1553_v18  ;;  %v1552_v46 = vadd.f32 %v1417_v61, %v5895_v44 }
 0x16c   : > { %v1701_v50 = vpop.f32.mrf.mxu0  ;;  %v4098_v14 = vpop.f32.mrf.mxu1 }
 0x16d   : > { %v6041_v4 = vadd.f32 %v1701_v50, %v1552_v46  ;;  %v1555_v41 = vadd.f32 %v4098_v14, %v5900_v32 }
 0x16e   : > { %v4178_v52 = vpop.f32.mrf.mxu0  ;;  %v1427_v37 = vpop.f32.mrf.mxu1 }
 0x16f   : > { %v6044_v30 = vadd.f32 %v4178_v52, %v1555_v41  ;;  %v1554_v33 = vadd.f32 %v1427_v37, %v5905_v62 }
 0x170   : > { %v1711_v1 = vpop.f32.mrf.mxu0  ;;  %v4101_v58 = vpop.f32.mrf.mxu1 }
 0x171   : > { %v6047_v60 = vadd.f32 %v1711_v1, %v1554_v33  ;;  %v1557_v48 = vadd.f32 %v4101_v58, %v5910_v45 }
 0x172   : > { %v4181_v22 = vpop.f32.mrf.mxu0  ;;  %v1437_v44 = vpop.f32.mrf.mxu1 }
 0x173   : > { %v6050_v43 = vadd.f32 %v4181_v22, %v1557_v48  ;;  %v1556_v53 = vadd.f32 %v1437_v44, %v5915_v28 }
 0x174   : > { %v1721_v34 = vpop.f32.mrf.mxu0  ;;  %v4104_v32 = vpop.f32.mrf.mxu1 }
 0x175   : > { %v6053_v56 = vadd.f32 %v1721_v34, %v1556_v53  ;;  %v1559_v36 = vadd.f32 %v4104_v32, %v5920_v19 }
 0x176   : > { %v4184_v13 = vpop.f32.mrf.mxu0  ;;  %v1447_v62 = vpop.f32.mrf.mxu1 }
 0x177   : > { %v6056_v40 = vadd.f32 %v4184_v13, %v1559_v36  ;;  %v1558_v42 = vadd.f32 %v1447_v62, %v5925_v12 }
 0x178   : > { %v1731_v57 = vpop.f32.mrf.mxu0  ;;  %v4107_v45 = vpop.f32.mrf.mxu1 }
 0x179   : > { %v6059_v51 = vadd.f32 %v1731_v57, %v1558_v42  ;;  %v1561_v31 = vadd.f32 %v4107_v45, %v5930_v39 }
 0x17a   : > { %v4187_v54 = vpop.f32.mrf.mxu0  ;;  %v1457_v28 = vpop.f32.mrf.mxu1 }
 0x17b   : > { %v6062_v2 = vadd.f32 %v4187_v54, %v1561_v31  ;;  %v1560_v35 = vadd.f32 %v1457_v28, %v5935_v5 }
 0x17c   : > { %v1741_v10 = vpop.f32.mrf.mxu0  ;;  %v4110_v19 = vpop.f32.mrf.mxu1 }
 0x17d   : > { %v6065_v18 = vadd.f32 %v1741_v10, %v1560_v35  ;;  %v1563_v59 = vadd.f32 %v4110_v19, %v5940_v29 }
 0x17e   : > { %v4190_v61 = vpop.f32.mrf.mxu0  ;;  %v1467_v12 = vpop.f32.mrf.mxu1 }
 0x17f   : > { %v6068_v46 = vadd.f32 %v4190_v61, %v1563_v59  ;;  %v1562_v50 = vadd.f32 %v1467_v12, %v5945_v17 }
 0x180   : > { %v1751_v14 = vpop.f32.mrf.mxu0  ;;  %v4113_v39 = vpop.f32.mrf.mxu1 }
 0x181   : > { %v6071_v41 = vadd.f32 %v1751_v14, %v1562_v50  ;;  %v1565_v52 = vadd.f32 %v4113_v39, %v5950_v55 }
 0x182   : > { %v4193_v37 = vpop.f32.mrf.mxu0  ;;  %v1477_v5 = vpop.f32.mrf.mxu1 }
 0x183   : > { %v6074_v33 = vadd.f32 %v4193_v37, %v1565_v52  ;;  %v1564_v1 = vadd.f32 %v1477_v5, %v5955_v16 }
 0x184   : > { %v1761_v58 = vpop.f32.mrf.mxu0  ;;  %v4116_v29 = vpop.f32.mrf.mxu1 }
 0x185   : > { %6565 = vst [vmem:[#allocation4_spill] sm:$0xff] %v6074_v33  ;;  %v6077_v48 = vadd.f32 %v1761_v58, %v1564_v1  ;;  %v1567_v22 = vadd.f32 %v4116_v29, %v5960_v9 }
 0x186   : > { %v4196_v44 = vpop.f32.mrf.mxu0  ;;  %v1487_v17 = vpop.f32.mrf.mxu1 }
 0x187   : > { %6566 = vst [vmem:[#allocation5_spill] sm:$0xff] %v6077_v48  ;;  %v6080_v53 = vadd.f32 %v4196_v44, %v1567_v22  ;;  %v1566_v34 = vadd.f32 %v1487_v17, %v5965_v49 }
 0x188   : > { %v1771_v32 = vpop.f32.mrf.mxu0  ;;  %v4119_v55 = vpop.f32.mrf.mxu1 }
 0x189   : > { %6567 = vst [vmem:[#allocation7_spill] sm:$0xff] %v6080_v53  ;;  %v6083_v36 = vadd.f32 %v1771_v32, %v1566_v34  ;;  %v1569_v13 = vadd.f32 %v4119_v55, %v5970_v27 }
 0x18a   : > { %v4199_v62 = vpop.f32.mrf.mxu0  ;;  %v1497_v16 = vpop.f32.mrf.mxu1 }
 0x18b   : > { %6568 = vst [vmem:[#allocation9_spill] sm:$0xff] %v6083_v36  ;;  %v6086_v42 = vadd.f32 %v4199_v62, %v1569_v13  ;;  %v1568_v57 = vadd.f32 %v1497_v16, %v5975_v26 }
 0x18c   : > { %v1781_v45 = vpop.f32.mrf.mxu0  ;;  %v4122_v9 = vpop.f32.mrf.mxu1 }
 0x18d   : > { %6569 = vst [vmem:[#allocation11_spill] sm:$0xff] %v6086_v42  ;;  %v6089_v31 = vadd.f32 %v1781_v45, %v1568_v57  ;;  %v1571_v54 = vadd.f32 %v4122_v9, %v5983_v47 }
 0x18e   : > { %v4202_v28 = vpop.f32.mrf.mxu0  ;;  %v1507_v49 = vpop.f32.mrf.mxu1 }
 0x18f   : > { %6570 = vst [vmem:[#allocation10_spill] sm:$0xff] %v6089_v31  ;;  %v6092_v35 = vadd.f32 %v4202_v28, %v1571_v54  ;;  %v1570_v10 = vadd.f32 %v1507_v49, %v5990_v21 }
 0x190   : > { %v1791_v19 = vpop.f32.mrf.mxu0  ;;  %v4125_v27 = vpop.f32.mrf.mxu1 }
 0x191   : > { %6571 = vst [vmem:[#allocation13_spill] sm:$0xff] %v6092_v35  ;;  %v6095_v59 = vadd.f32 %v1791_v19, %v1570_v10  ;;  %v1573_v61 = vadd.f32 %v4125_v27, %v5996_v23 }
 0x192   : > { %v4205_v12 = vpop.f32.mrf.mxu0  ;;  %v1517_v26 = vpop.f32.mrf.mxu1 }
 0x193   : > { %6572 = vst [vmem:[#allocation15_spill] sm:$0xff] %v6095_v59  ;;  %v6098_v50 = vadd.f32 %v4205_v12, %v1573_v61  ;;  %v1572_v14 = vadd.f32 %v1517_v26, %v6002_v7 }
 0x194   : > { %v1801_v39 = vpop.f32.mrf.mxu0  ;;  %v4128_v47 = vpop.f32.mrf.mxu1 }
 0x195   : > { %6573 = vst [vmem:[#allocation12_spill] sm:$0xff] %v6098_v50  ;;  %v6101_v52 = vadd.f32 %v1801_v39, %v1572_v14  ;;  %v1575_v37 = vadd.f32 %v4128_v47, %v6007_v11 }
 0x196   : > { %v4208_v5 = vpop.f32.mrf.mxu0  ;;  %v1527_v21 = vpop.f32.mrf.mxu1 }
 0x197   : > { %6574 = vst [vmem:[#allocation31_spill] sm:$0xff] %v6101_v52  ;;  %v6104_v1 = vadd.f32 %v4208_v5, %v1575_v37  ;;  %v1574_v58 = vadd.f32 %v1527_v21, %v6011_v25 }
 0x198   : > { %v1811_v29 = vpop.f32.mrf.mxu0  ;;  %v4131_v23 = vpop.f32.mrf.mxu1 }
 0x199   : > { %6575 = vst [vmem:[#allocation17_spill] sm:$0xff] %v6104_v1  ;;  %v6107_v22 = vadd.f32 %v1811_v29, %v1574_v58  ;;  %v1577_v44 = vadd.f32 %v4131_v23, %v6014_v38 }
 0x19a   : > { %v4211_v17 = vpop.f32.mrf.mxu0  ;;  %v1537_v7 = vpop.f32.mrf.mxu1 }
 0x19b   : > { %6576 = vst [vmem:[#allocation14_spill] sm:$0xff] %v6107_v22  ;;  %v6110_v34 = vadd.f32 %v4211_v17, %v1577_v44  ;;  %v1576_v32 = vadd.f32 %v1537_v7, %v6017_v0 }
 0x19c   : > { %v1821_v55 = vpop.f32.mrf.mxu0  ;;  %v4246_v11 = vpop.f32.mrf.mxu1 }
 0x19d   : > { %6577 = vst [vmem:[#allocation19_spill] sm:$0xff] %v6110_v34  ;;  %v6113_v13 = vadd.f32 %v1821_v55, %v1576_v32 }
 0x19e   : > { %v6115_v62 = vpop.f32.mrf.mxu0  ;;  %v1952_v16 = vpop.f32.mrf.mxu1 }
 0x19f   : > { %6578 = vst [vmem:[#allocation32_spill] sm:$0xff] %v6113_v13 }
 0x1a0   : > { %v6117_v25 = vpop.f32.mrf.mxu0  ;;  %v4249_v57 = vpop.f32.mrf.mxu1 }
 0x1a2   : > { %v6119_v45 = vpop.f32.mrf.mxu0  ;;  %v6121_v9 = vpop.f32.mrf.mxu1 }
 0x1a4   : > { %v6123_v38 = vpop.f32.mrf.mxu0  ;;  %v6125_v54 = vpop.f32.mrf.mxu1 }
 0x1a6   : > { %v6127_v28 = vpop.f32.mrf.mxu0  ;;  %v6129_v0 = vpop.f32.mrf.mxu1 }
 0x1a8   : > { %v6131_v49 = vpop.f32.mrf.mxu0  ;;  %v6133_v10 = vpop.f32.mrf.mxu1 }
 0x1aa   : > { %v6135_v19 = vpop.f32.mrf.mxu0  ;;  %v6137_v27 = vpop.f32.mrf.mxu1 }
 0x1ac   : > { %v6139_v61 = vpop.f32.mrf.mxu0  ;;  %v6141_v12 = vpop.f32.mrf.mxu1 }
 0x1ae   : > { %v6143_v26 = vpop.f32.mrf.mxu0  ;;  %v6145_v14 = vpop.f32.mrf.mxu1 }
 0x1b0   : > { %v6147_v39 = vpop.f32.mrf.mxu0  ;;  %v6149_v47 = vpop.f32.mrf.mxu1 }
 0x1b2   : > { %v6151_v37 = vpop.f32.mrf.mxu0  ;;  %v6153_v5 = vpop.f32.mrf.mxu1 }
 0x1b4   : > { %v6155_v21 = vpop.f32.mrf.mxu0  ;;  %v6157_v58 = vpop.f32.mrf.mxu1 }
 0x1b6   : > { %v6159_v29 = vpop.f32.mrf.mxu0  ;;  %v6161_v23 = vpop.f32.mrf.mxu1 }
 0x1b8   : > { %v6163_v44 = vpop.f32.mrf.mxu0  ;;  %v6165_v17 = vpop.f32.mrf.mxu1 }
 0x1ba   : > { %v6167_v7 = vpop.f32.mrf.mxu0  ;;  %v6169_v32 = vpop.f32.mrf.mxu1 }
 0x1bc   : > { %v6171_v55 = vpop.f32.mrf.mxu0  ;;  %v6173_v13 = vpop.f32.mrf.mxu1 }
 0x1be   : > { %v6175_v34 = vpop.f32.mrf.mxu0  ;;  %v6177_v22 = vpop.f32.mrf.mxu1 }
 0x1c0   : > { %v6179_v1 = vpop.f32.mrf.mxu0  ;;  %v6181_v52 = vpop.f32.mrf.mxu1 }
 0x1c1   : > { %6579 = vst [vmem:[#allocation16_spill] sm:$0xff] %v6179_v1  ;;  %6580 = vst [vmem:[#allocation33_spill] sm:$0xff] %v6181_v52 }
 0x1c2   : > { %v6183_v50 = vpop.f32.mrf.mxu0  ;;  %v6185_v59 = vpop.f32.mrf.mxu1 }
 0x1c3   : > { %6581 = vst [vmem:[#allocation21_spill] sm:$0xff] %v6183_v50  ;;  %6582 = vst [vmem:[#allocation18_spill] sm:$0xff] %v6185_v59 }
 0x1c4   : > { %v6187_v35 = vpop.f32.mrf.mxu0  ;;  %v6189_v31 = vpop.f32.mrf.mxu1 }
 0x1c5   : > { %6583 = vst [vmem:[#allocation23_spill] sm:$0xff] %v6187_v35  ;;  %6584 = vst [vmem:[#allocation34_spill] sm:$0xff] %v6189_v31 }
 0x1c6   : > { %v6191_v42 = vpop.f32.mrf.mxu0  ;;  %v6193_v36 = vpop.f32.mrf.mxu1 }
 0x1c7   : > { %6585 = vst [vmem:[#allocation20_spill] sm:$0xff] %v6191_v42  ;;  %6586 = vst [vmem:[#allocation25_spill] sm:$0xff] %v6193_v36 }
 0x1c8   : > { %v6195_v53 = vpop.f32.mrf.mxu0  ;;  %v6197_v48 = vpop.f32.mrf.mxu1 }
 0x1c9   : > { %6587 = vst [vmem:[#allocation22_spill] sm:$0xff] %v6195_v53  ;;  %6588 = vst [vmem:[#allocation26_spill] sm:$0xff] %v6197_v48 }
 0x1ca   : > { %v6199_v33 = vpop.f32.mrf.mxu0  ;;  %v6201_v1 = vpop.f32.mrf.mxu1 }
 0x1cb   : > { %6589 = vst [vmem:[#allocation35_spill] sm:$0xff] %v6199_v33  ;;  %6590 = vst [vmem:[#allocation24_spill] sm:$0xff] %v6201_v1 }
 0x1cc   : > { %v6203_v52 = vpop.f32.mrf.mxu0  ;;  %v6205_v50 = vpop.f32.mrf.mxu1 }
 0x1cd   : > { %6591 = vst [vmem:[#allocation27_spill] sm:$0xff] %v6203_v52  ;;  %6592 = vst [vmem:[#allocation2_spill] sm:$0xff] %v6205_v50 }
 0x1ce   : > { %v6207_v59 = vpop.f32.mrf.mxu0  ;;  %v6209_v35 = vpop.f32.mrf.mxu1 }
 0x1cf   : > { %6593 = vst [vmem:[#allocation6_spill] sm:$0xff] %v6207_v59  ;;  %6594 = vst [vmem:[#allocation36_spill] sm:$0xff] %v6209_v35  ;;  %v2112_v59 = vadd.f32 %v4246_v11, %v6020_v63  ;;  %v2113_v11 = vadd.f32 %v6121_v9, %v6029_v15 }
 0x1d0   : > { %v6211_v31 = vpop.f32.mrf.mxu0  ;;  %v6213_v42 = vpop.f32.mrf.mxu1 }
 0x1d1   : > { %6595 = vst [vmem:[#allocation3_spill] sm:$0xff] %v6211_v31  ;;  %6596 = vst [vmem:[#allocation8_spill] sm:$0xff] %v6213_v42  ;;  %v2111_v42 = vadd.f32 %v1952_v16, %v6023_v8  ;;  %v2116_v8 = vadd.f32 %v6125_v54, %v6032_v20  ;;  %v2387_v15 = vadd.f32 %v6123_v38, %v2113_v11 }
 0x1d2   : > { %v6215_v53 = vpop.f32.mrf.mxu0  ;;  %v6217_v48 = vpop.f32.mrf.mxu1  ;;  %v2115_v20 = vadd.f32 %v6129_v0, %v6035_v24  ;;  %v2118_v38 = vadd.f32 %v6133_v10, %v6038_v6  ;;  %v2117_v24 = vadd.f32 %v6137_v27, %v6041_v4 }
 0x1d3   : > { %6597 = vst [vmem:[#allocation28_spill] sm:$0xff] %v6215_v53  ;;  %v2385_v63 = vadd.f32 %v6117_v25, %v2111_v42  ;;  %v2390_v9 = vadd.f32 %v6127_v28, %v2116_v8 }
 0x1d4   : > { %v6219_v33 = vpop.f32.mrf.mxu0  ;;  %v6221_v1 = vpop.f32.mrf.mxu1  ;;  %v2392_v4 = vadd.f32 %v6135_v19, %v2118_v38 }
 0x1d5   : > { %6598 = vst [vmem:[#allocation30_spill] sm:$0xff] %v6219_v33  ;;  %6599 = vst [vmem:[#allocation29_spill] sm:$0xff] %v6221_v1  ;;  %v2386_v33 = vadd.f32 %v6115_v62, %v2112_v59  ;;  %v2114_v1 = vadd.f32 %v4249_v57, %v6026_v3 }
 0x1d6   : > { %v6223_v52 = vpop.f32.mrf.mxu0  ;;  %v6225_v50 = vpop.f32.mrf.mxu1 }
 0x1d7   : > { %6600 = vst [vmem:[#allocation37_spill] sm:$0xff] %v6223_v52  ;;  %6601 = vst [vmem:[#allocation38_spill] sm:$0xff] %v6225_v50  ;;  %v2388_v62 = vadd.f32 %v6119_v45, %v2114_v1 }
 0x1d8   : > { %v6228_v35 = vpop.f32.mrf.mxu0  ;;  %v6230_v31 = vpop.f32.mrf.mxu1 }
 0x1d9   : > { %6602 = vst [vmem:[#allocation39_spill] sm:$0xff] %v6228_v35 }
 0x1da   : > { %v6233_v36 = vpop.f32.mrf.mxu0  ;;  %v6235_v53 = vpop.f32.mrf.mxu1 }
 0x1db   : > { %6603 = vst [vmem:[#allocation40_spill] sm:$0xff] %v6233_v36 }
 0x1dc   : > { %v6240_v52 = vpop.f32.mrf.mxu0  ;;  %v4406_v50 = vpop.f32.mrf.mxu1 }
 0x1dd   : > { %6604 = vst [vmem:[#allocation41_spill] sm:$0xff] %v6240_v52  ;;  %v2670_v35 = vadd.f32 %v4406_v50, %v2386_v33 }
 0x1de   : > { %v4486_v3 = vpop.f32.mrf.mxu0  ;;  %v2510_v59 = vpop.f32.mrf.mxu1 }
 0x1df   : > { %v2951_v16 = vadd.f32 %v4486_v3, %v2670_v35  ;;  %v2669_v42 = vadd.f32 %v2510_v59, %v2385_v63  ;;  %v2389_v3 = vadd.f32 %v6131_v49, %v2115_v20  ;;  %v2391_v49 = vadd.f32 %v6139_v61, %v2117_v24 }
 0x1e0   : > { %v2791_v25 = vpop.f32.mrf.mxu0  ;;  %v4409_v57 = vpop.f32.mrf.mxu1 }
 0x1e1   : > { %2983 = vst [vmem:[%s6250_s8 + $0x8] sm:$0xff] %v2951_v16  ;;  %v2950_v33 = vadd.f32 %v2791_v25, %v2669_v42  ;;  %v2672_v50 = vadd.f32 %v4409_v57, %v2388_v62  ;;  %v3052_v54 = vmul.f32 %v2951_v16, %v2951_v16  ;;  %v2120_v62 = vadd.f32 %v6141_v12, %v6044_v30 }
 0x1e2   : > { %v4489_v52 = vpop.f32.mrf.mxu0  ;;  %v2520_v36 = vpop.f32.mrf.mxu1  ;;  %v2119_v12 = vadd.f32 %v6145_v14, %v6047_v60 }
 0x1e3   : > { %2982 = vst [vmem:[%s6250_s8] sm:$0xff] %v2950_v33  ;;  %v3014_v1 = vadd.f32 %v2951_v16, %v2950_v33  ;;  %v3051_v35 = vmul.f32 %v2950_v33, %v2950_v33  ;;  %v2953_v45 = vadd.f32 %v4489_v52, %v2672_v50  ;;  %v2671_v63 = vadd.f32 %v2520_v36, %v2387_v15 }
 0x1e4   : > { %v2801_v0 = vpop.f32.mrf.mxu0  ;;  %v4412_v11 = vpop.f32.mrf.mxu1  ;;  %v2394_v30 = vadd.f32 %v6143_v26, %v2120_v62  ;;  %v2122_v50 = vadd.f32 %v6149_v47, %v6050_v43 }
 0x1e5   : > { %v3083_v28 = vadd.f32 %v3052_v54, %v3051_v35  ;;  %2985 = vst [vmem:[%s6250_s8 + $0x18] sm:$0xff] %v2953_v45  ;;  %v2952_v8 = vadd.f32 %v2801_v0, %v2671_v63  ;;  %v2674_v59 = vadd.f32 %v4412_v11, %v2390_v9  ;;  %v3054_v57 = vmul.f32 %v2953_v45, %v2953_v45 }
 0x1e6   : > { %v4492_v52 = vpop.f32.mrf.mxu0  ;;  %v2530_v36 = vpop.f32.mrf.mxu1  ;;  %v2393_v11 = vadd.f32 %v6147_v39, %v2119_v12 }
 0x1e7   : > { %2984 = vst [vmem:[%s6250_s8 + $0x10] sm:$0xff] %v2952_v8  ;;  %v3015_v16 = vadd.f32 %v3014_v1, %v2952_v8  ;;  %v3053_v6 = vmul.f32 %v2952_v8, %v2952_v8  ;;  %v2955_v10 = vadd.f32 %v4492_v52, %v2674_v59  ;;  %v2673_v42 = vadd.f32 %v2530_v36, %v2389_v3 }
 0x1e8   : > { %v2811_v27 = vpop.f32.mrf.mxu0  ;;  %v4415_v25 = vpop.f32.mrf.mxu1  ;;  %v2396_v3 = vadd.f32 %v6151_v37, %v2122_v50 }
 0x1e9   : > { %v3084_v15 = vadd.f32 %v3083_v28, %v3053_v6  ;;  %2987 = vst [vmem:[%s6250_s8 + $0x28] sm:$0xff] %v2955_v10  ;;  %v2954_v20 = vadd.f32 %v2811_v27, %v2673_v42  ;;  %v3016_v33 = vadd.f32 %v3015_v16, %v2953_v45  ;;  %v2676_v9 = vadd.f32 %v4415_v25, %v2392_v4 }
 0x1ea   : > { %v4495_v54 = vpop.f32.mrf.mxu0  ;;  %v2540_v19 = vpop.f32.mrf.mxu1  ;;  %v2121_v45 = vadd.f32 %v6153_v5, %v6053_v56  ;;  %v3056_v26 = vmul.f32 %v2955_v10, %v2955_v10  ;;  %v2124_v28 = vadd.f32 %v6157_v58, %v6056_v40  ;;  %v2123_v16 = vadd.f32 %v6161_v23, %v6059_v51 }
 0x1eb   : > { %2986 = vst [vmem:[%s6250_s8 + $0x20] sm:$0xff] %v2954_v20  ;;  %v3017_v61 = vadd.f32 %v3016_v33, %v2954_v20  ;;  %v3055_v1 = vmul.f32 %v2954_v20, %v2954_v20  ;;  %v3085_v35 = vadd.f32 %v3084_v15, %v3054_v57  ;;  %v2675_v63 = vadd.f32 %v2540_v19, %v2391_v49 }
 0x1ec   : > { %v2957_v38 = vadd.f32 %v4495_v54, %v2676_v9  ;;  %v2821_v24 = vpop.f32.mrf.mxu0  ;;  %v4418_v60 = vpop.f32.mrf.mxu1  ;;  %v2395_v36 = vadd.f32 %v6155_v21, %v2121_v45  ;;  %v2398_v4 = vadd.f32 %v6159_v29, %v2124_v28  ;;  %v2126_v21 = vadd.f32 %v6165_v17, %v6062_v2  ;;  %v6606_v28 = vld [vmem:[#allocation33_spill] sm:$0xff] }
 0x1ed   : > { %v3086_v14 = vadd.f32 %v3085_v35, %v3055_v1  ;;  %v2956_v0 = vadd.f32 %v2821_v24, %v2675_v63  ;;  %v3018_v43 = vadd.f32 %v3017_v61, %v2955_v10  ;;  %v2678_v47 = vadd.f32 %v4418_v60, %v2394_v30 }
 0x1ee   : > { %2989 = vst [vmem:[%s6250_s8 + $0x38] sm:$0xff] %v2957_v38  ;;  %v4498_v8 = vpop.f32.mrf.mxu0  ;;  %v2550_v59 = vpop.f32.mrf.mxu1  ;;  %v3058_v10 = vmul.f32 %v2957_v38, %v2957_v38  ;;  %v2397_v12 = vadd.f32 %v6163_v44, %v2123_v16  ;;  %v2125_v29 = vadd.f32 %v6169_v32, %v6065_v18  ;;  %v2128_v2 = vadd.f32 %v6173_v13, %v6068_v46  ;;  %v6609_v16 = vld [vmem:[#allocation18_spill] sm:$0xff] }
 0x1ef   : > { %2988 = vst [vmem:[%s6250_s8 + $0x30] sm:$0xff] %v2956_v0  ;;  %v3019_v56 = vadd.f32 %v3018_v43, %v2956_v0  ;;  %v3057_v5 = vmul.f32 %v2956_v0, %v2956_v0  ;;  %v3087_v62 = vadd.f32 %v3086_v14, %v3056_v26  ;;  %v2959_v52 = vadd.f32 %v4498_v8, %v2678_v47 }
 0x1f0   : > { %v2677_v39 = vadd.f32 %v2550_v59, %v2393_v11  ;;  %v2831_v37 = vpop.f32.mrf.mxu0  ;;  %v4421_v6 = vpop.f32.mrf.mxu1  ;;  %v2400_v35 = vadd.f32 %v6167_v7, %v2126_v21  ;;  %v2399_v24 = vadd.f32 %v6171_v55, %v2125_v29  ;;  %v2127_v46 = vadd.f32 %v6177_v22, %v6071_v41  ;;  %v6612_v21 = vld [vmem:[#allocation21_spill] sm:$0xff]  ;;  %v6613_v29 = vld [vmem:[#allocation23_spill] sm:$0xff] }
 0x1f1   : > { %v3088_v40 = vadd.f32 %v3087_v62, %v3057_v5  ;;  %2991 = vst [vmem:[%s6250_s8 + $0x48] sm:$0xff] %v2959_v52  ;;  %v3020_v58 = vadd.f32 %v3019_v56, %v2957_v38  ;;  %v2680_v42 = vadd.f32 %v4421_v6, %v2396_v3  ;;  %v3060_v17 = vmul.f32 %v2959_v52, %v2959_v52  ;;  %v6605_v3 = vld [vmem:[#allocation4_spill] sm:$0xff] }
 0x1f2   : > { %v2958_v49 = vadd.f32 %v2831_v37, %v2677_v39  ;;  %v4501_v27 = vpop.f32.mrf.mxu0  ;;  %v2560_v25 = vpop.f32.mrf.mxu1  ;;  %v2402_v14 = vadd.f32 %v6175_v34, %v2128_v2  ;;  %v2130_v8 = vadd.f32 %v6606_v28, %v6605_v3  ;;  %v6615_v2 = vld [vmem:[#allocation25_spill] sm:$0xff]  ;;  %v6621_v3 = vld [vmem:[#allocation24_spill] sm:$0xff] }
 0x1f3   : > { %v3089_v57 = vadd.f32 %v3088_v40, %v3058_v10  ;;  %v2961_v51 = vadd.f32 %v4501_v27, %v2680_v42  ;;  %v2679_v23 = vadd.f32 %v2560_v25, %v2395_v36  ;;  %v6608_v36 = vld [vmem:[#allocation5_spill] sm:$0xff]  ;;  %v6610_v10 = vld [vmem:[#allocation7_spill] sm:$0xff]  ;;  %v6611_v40 = vld [vmem:[#allocation34_spill] sm:$0xff] }
 0x1f4   : > { %2990 = vst [vmem:[%s6250_s8 + $0x40] sm:$0xff] %v2958_v49  ;;  %v3021_v15 = vadd.f32 %v3020_v58, %v2958_v49  ;;  %v3059_v20 = vmul.f32 %v2958_v49, %v2958_v49  ;;  %v2841_v33 = vpop.f32.mrf.mxu0  ;;  %v4424_v30 = vpop.f32.mrf.mxu1  ;;  %v2129_v39 = vadd.f32 %v6609_v16, %v6608_v36  ;;  %v2132_v58 = vadd.f32 %v6611_v40, %v6610_v10  ;;  %v6624_v36 = vld [vmem:[#allocation35_spill] sm:$0xff] }
 0x1f5   : > { %2993 = vst [vmem:[%s6250_s8 + $0x58] sm:$0xff] %v2961_v51  ;;  %v2960_v50 = vadd.f32 %v2841_v33, %v2679_v23  ;;  %v2682_v9 = vadd.f32 %v4424_v30, %v2398_v4  ;;  %v3062_v7 = vmul.f32 %v2961_v51, %v2961_v51 }
 0x1f6   : > { %v3090_v54 = vadd.f32 %v3089_v57, %v3059_v20  ;;  %v3022_v19 = vadd.f32 %v3021_v15, %v2959_v52  ;;  %v4504_v61 = vpop.f32.mrf.mxu0  ;;  %v2570_v1 = vpop.f32.mrf.mxu1  ;;  %v6607_v52 = vld [vmem:[#allocation16_spill] sm:$0xff]  ;;  %v2404_v57 = vadd.f32 %v6612_v21, %v2130_v8 }
 0x1f7   : > { %2992 = vst [vmem:[%s6250_s8 + $0x50] sm:$0xff] %v2960_v50  ;;  %v3061_v63 = vmul.f32 %v2960_v50, %v2960_v50  ;;  %v2963_v44 = vadd.f32 %v4504_v61, %v2682_v9  ;;  %v2681_v45 = vadd.f32 %v2570_v1, %v2397_v12  ;;  %v2401_v34 = vadd.f32 %v6607_v52, %v2127_v46  ;;  %v6614_v9 = vld [vmem:[#allocation9_spill] sm:$0xff]  ;;  %v6616_v61 = vld [vmem:[#allocation20_spill] sm:$0xff] }
 0x1f8   : > { %v3023_v26 = vadd.f32 %v3022_v19, %v2960_v50  ;;  %v3091_v18 = vadd.f32 %v3090_v54, %v3060_v17  ;;  %v2851_v32 = vpop.f32.mrf.mxu0  ;;  %v4427_v38 = vpop.f32.mrf.mxu1  ;;  %v2403_v50 = vadd.f32 %v6613_v29, %v2129_v39  ;;  %v2131_v17 = vadd.f32 %v6615_v2, %v6614_v9  ;;  %v6630_v9 = vld [vmem:[#allocation8_spill] sm:$0xff] }
 0x1f9   : > { %2995 = vst [vmem:[%s6250_s8 + $0x68] sm:$0xff] %v2963_v44  ;;  %v2962_v13 = vadd.f32 %v2851_v32, %v2681_v45  ;;  %v2684_v60 = vadd.f32 %v4427_v38, %v2400_v35  ;;  %v3064_v42 = vmul.f32 %v2963_v44, %v2963_v44  ;;  %v2406_v1 = vadd.f32 %v6616_v61, %v2132_v58  ;;  %v6618_v32 = vld [vmem:[#allocation26_spill] sm:$0xff] }
 0x1fa   : > { %v3092_v0 = vadd.f32 %v3091_v18, %v3061_v63  ;;  %v3024_v43 = vadd.f32 %v3023_v26, %v2961_v51  ;;  %v4507_v47 = vpop.f32.mrf.mxu0  ;;  %v2580_v11 = vpop.f32.mrf.mxu1  ;;  %v6617_v18 = vld [vmem:[#allocation11_spill] sm:$0xff] }
 0x1fb   : > { %2994 = vst [vmem:[%s6250_s8 + $0x60] sm:$0xff] %v2962_v13  ;;  %v3063_v59 = vmul.f32 %v2962_v13, %v2962_v13  ;;  %v2965_v55 = vadd.f32 %v4507_v47, %v2684_v60  ;;  %v2683_v56 = vadd.f32 %v2580_v11, %v2399_v24  ;;  %v2134_v38 = vadd.f32 %v6618_v32, %v6617_v18  ;;  %v6620_v11 = vld [vmem:[#allocation10_spill] sm:$0xff] }
 0x1fc   : > { %v3025_v5 = vadd.f32 %v3024_v43, %v2962_v13  ;;  %v3093_v41 = vadd.f32 %v3092_v0, %v3062_v7  ;;  %v2861_v22 = vpop.f32.mrf.mxu0  ;;  %v4430_v62 = vpop.f32.mrf.mxu1  ;;  %v6619_v43 = vld [vmem:[#allocation22_spill] sm:$0xff]  ;;  %v2133_v28 = vadd.f32 %v6621_v3, %v6620_v11 }
 0x1fd   : > { %2997 = vst [vmem:[%s6250_s8 + $0x78] sm:$0xff] %v2965_v55  ;;  %v2964_v37 = vadd.f32 %v2861_v22, %v2683_v56  ;;  %v2686_v6 = vadd.f32 %v4430_v62, %v2402_v14  ;;  %v3066_v35 = vmul.f32 %v2965_v55, %v2965_v55  ;;  %v2405_v47 = vadd.f32 %v6619_v43, %v2131_v17  ;;  %v6623_v56 = vld [vmem:[#allocation2_spill] sm:$0xff] }
 0x1fe   : > { %v3094_v4 = vadd.f32 %v3093_v41, %v3063_v59  ;;  %v3026_v49 = vadd.f32 %v3025_v5, %v2963_v44  ;;  %v4510_v27 = vpop.f32.mrf.mxu0  ;;  %v2590_v25 = vpop.f32.mrf.mxu1  ;;  %v2408_v16 = vadd.f32 %v6624_v36, %v2134_v38 }
 0x1ff   : > { %2996 = vst [vmem:[%s6250_s8 + $0x70] sm:$0xff] %v2964_v37  ;;  %v3065_v51 = vmul.f32 %v2964_v37, %v2964_v37  ;;  %v2967_v23 = vadd.f32 %v4510_v27, %v2686_v6  ;;  %v2685_v15 = vadd.f32 %v2590_v25, %v2401_v34  ;;  %v6626_v27 = vld [vmem:[#allocation15_spill] sm:$0xff]  ;;  %v6627_v25 = vld [vmem:[#allocation36_spill] sm:$0xff] }
 0x200   : > { %v3027_v20 = vadd.f32 %v3026_v49, %v2964_v37  ;;  %v3095_v33 = vadd.f32 %v3094_v4, %v3064_v42  ;;  %v2871_v30 = vpop.f32.mrf.mxu0  ;;  %v4433_v12 = vpop.f32.mrf.mxu1  ;;  %v6625_v4 = vld [vmem:[#allocation27_spill] sm:$0xff]  ;;  %v2135_v21 = vadd.f32 %v6627_v25, %v6626_v27 }
 0x201   : > { %2999 = vst [vmem:[%s6250_s8 + $0x88] sm:$0xff] %v2967_v23  ;;  %v2966_v54 = vadd.f32 %v2871_v30, %v2685_v15  ;;  %v2688_v19 = vadd.f32 %v4433_v12, %v2404_v57  ;;  %v3068_v41 = vmul.f32 %v2967_v23, %v2967_v23  ;;  %v2407_v49 = vadd.f32 %v6625_v4, %v2133_v28 }
 0x202   : > { %v3096_v63 = vadd.f32 %v3095_v33, %v3065_v51  ;;  %v3028_v44 = vadd.f32 %v3027_v20, %v2965_v55  ;;  %v4513_v45 = vpop.f32.mrf.mxu0  ;;  %v2600_v26 = vpop.f32.mrf.mxu1  ;;  %v6622_v55 = vld [vmem:[#allocation13_spill] sm:$0xff] }
 0x203   : > { %2998 = vst [vmem:[%s6250_s8 + $0x80] sm:$0xff] %v2966_v54  ;;  %v3067_v24 = vmul.f32 %v2966_v54, %v2966_v54  ;;  %v2969_v46 = vadd.f32 %v4513_v45, %v2688_v19  ;;  %v2687_v13 = vadd.f32 %v2600_v26, %v2403_v50  ;;  %v2136_v5 = vadd.f32 %v6623_v56, %v6622_v55  ;;  %v6629_v50 = vld [vmem:[#allocation12_spill] sm:$0xff]  ;;  %v6632_v26 = vld [vmem:[#allocation31_spill] sm:$0xff] }
 0x204   : > { %v3029_v60 = vadd.f32 %v3028_v44, %v2966_v54  ;;  %v3097_v14 = vadd.f32 %v3096_v63, %v3066_v35  ;;  %v2881_v7 = vpop.f32.mrf.mxu0  ;;  %v4436_v0 = vpop.f32.mrf.mxu1  ;;  %v2138_v2 = vadd.f32 %v6630_v9, %v6629_v50  ;;  %v6631_v44 = vld [vmem:[#allocation3_spill] sm:$0xff]  ;;  %v2137_v18 = vadd.f32 %v6217_v48, %v6632_v26  ;;  %v6644_v26 = vld [vmem:[#allocation41_spill] sm:$0xff] }
 0x205   : > { %3001 = vst [vmem:[%s6250_s8 + $0x98] sm:$0xff] %v2969_v46  ;;  %v2968_v8 = vadd.f32 %v2881_v7, %v2687_v13  ;;  %v2690_v59 = vadd.f32 %v4436_v0, %v2406_v1  ;;  %v3070_v20 = vmul.f32 %v2969_v46, %v2969_v46  ;;  %v2409_v45 = vadd.f32 %v6631_v44, %v2135_v21 }
 0x206   : > { %v3098_v22 = vadd.f32 %v3097_v14, %v3067_v24  ;;  %v3030_v62 = vadd.f32 %v3029_v60, %v2967_v23  ;;  %v4516_v52 = vpop.f32.mrf.mxu0  ;;  %v2610_v34 = vpop.f32.mrf.mxu1  ;;  %v6628_v23 = vld [vmem:[#allocation6_spill] sm:$0xff]  ;;  %v6633_v24 = vld [vmem:[#allocation17_spill] sm:$0xff] }
 0x207   : > { %3000 = vst [vmem:[%s6250_s8 + $0x90] sm:$0xff] %v2968_v8  ;;  %v3069_v39 = vmul.f32 %v2968_v8, %v2968_v8  ;;  %v2971_v37 = vadd.f32 %v4516_v52, %v2690_v59  ;;  %v2689_v6 = vadd.f32 %v2610_v34, %v2405_v47  ;;  %v2410_v15 = vadd.f32 %v6628_v23, %v2136_v5  ;;  %v6635_v47 = vld [vmem:[#allocation28_spill] sm:$0xff]  ;;  %v6636_v5 = vld [vmem:[#allocation30_spill] sm:$0xff] }
 0x208   : > { %v3031_v10 = vadd.f32 %v3030_v62, %v2968_v8  ;;  %v3099_v40 = vadd.f32 %v3098_v22, %v3068_v41  ;;  %v2891_v58 = vpop.f32.mrf.mxu0  ;;  %v4439_v42 = vpop.f32.mrf.mxu1  ;;  %v2412_v11 = vadd.f32 %v6635_v47, %v2138_v2  ;;  %v2411_v41 = vadd.f32 %v6636_v5, %v2137_v18  ;;  %v6637_v22 = vld [vmem:[#allocation14_spill] sm:$0xff] }
 0x209   : > { %3003 = vst [vmem:[%s6250_s8 + $0xa8] sm:$0xff] %v2971_v37  ;;  %v2970_v57 = vadd.f32 %v2891_v58, %v2689_v6  ;;  %v2692_v51 = vadd.f32 %v4439_v42, %v2408_v16  ;;  %v3072_v60 = vmul.f32 %v2971_v37, %v2971_v37  ;;  %v6638_v62 = vld [vmem:[#allocation38_spill] sm:$0xff]  ;;  %v6639_v16 = vld [vmem:[#allocation37_spill] sm:$0xff]  ;;  %v6640_v42 = vld [vmem:[#allocation19_spill] sm:$0xff] }
 0x20a   : > { %v3100_v33 = vadd.f32 %v3099_v40, %v3069_v39  ;;  %v3032_v30 = vadd.f32 %v3031_v10, %v2969_v46  ;;  %v4519_v12 = vpop.f32.mrf.mxu0  ;;  %v2620_v29 = vpop.f32.mrf.mxu1  ;;  %v6634_v46 = vld [vmem:[#allocation29_spill] sm:$0xff]  ;;  %v2139_v52 = vadd.f32 %v6638_v62, %v6637_v22  ;;  %v2142_v4 = vadd.f32 %v6230_v31, %v6640_v42 }
 0x20b   : > { %3002 = vst [vmem:[%s6250_s8 + $0xa0] sm:$0xff] %v2970_v57  ;;  %v3071_v17 = vmul.f32 %v2970_v57, %v2970_v57  ;;  %v2973_v54 = vadd.f32 %v4519_v12, %v2692_v51  ;;  %v2691_v19 = vadd.f32 %v2620_v29, %v2407_v49  ;;  %v2140_v13 = vadd.f32 %v6634_v46, %v6633_v24 }
 0x20c   : > { %v3033_v61 = vadd.f32 %v3032_v30, %v2970_v57  ;;  %v3101_v1 = vadd.f32 %v3100_v33, %v3070_v20  ;;  %v2901_v35 = vpop.f32.mrf.mxu0  ;;  %v4442_v63 = vpop.f32.mrf.mxu1  ;;  %v6642_v33 = vld [vmem:[#allocation32_spill] sm:$0xff] }
 0x20d   : > { %3005 = vst [vmem:[%s6250_s8 + $0xb8] sm:$0xff] %v2973_v54  ;;  %v2972_v32 = vadd.f32 %v2901_v35, %v2691_v19  ;;  %v2694_v38 = vadd.f32 %v4442_v63, %v2410_v15  ;;  %v2414_v39 = vadd.f32 %v6639_v16, %v2140_v13  ;;  %v6641_v15 = vld [vmem:[#allocation39_spill] sm:$0xff]  ;;  %v2141_v30 = vadd.f32 %v6235_v53, %v6642_v33 }
 0x20e   : > { %v3102_v14 = vadd.f32 %v3101_v1, %v3071_v17  ;;  %v3034_v7 = vadd.f32 %v3033_v61, %v2971_v37  ;;  %v4522_v0 = vpop.f32.mrf.mxu0  ;;  %v2630_v43 = vpop.f32.mrf.mxu1  ;;  %v3074_v37 = vmul.f32 %v2973_v54, %v2973_v54  ;;  %v2413_v20 = vadd.f32 %v6641_v15, %v2139_v52 }
 0x20f   : > { %3004 = vst [vmem:[%s6250_s8 + $0xb0] sm:$0xff] %v2972_v32  ;;  %v3073_v3 = vmul.f32 %v2972_v32, %v2972_v32  ;;  %v2975_v28 = vadd.f32 %v4522_v0, %v2694_v38  ;;  %v2693_v8 = vadd.f32 %v2630_v43, %v2409_v45  ;;  %v2415_v18 = vadd.f32 %v6644_v26, %v2141_v30 }
 0x210   : > { %v3035_v59 = vadd.f32 %v3034_v7, %v2972_v32  ;;  %v3103_v48 = vadd.f32 %v3102_v14, %v3072_v60  ;;  %v2911_v55 = vpop.f32.mrf.mxu0  ;;  %v4445_v56 = vpop.f32.mrf.mxu1 }
 0x211   : > { %3007 = vst [vmem:[%s6250_s8 + $0xc8] sm:$0xff] %v2975_v28  ;;  %v2974_v34 = vadd.f32 %v2911_v55, %v2693_v8  ;;  %v2696_v36 = vadd.f32 %v4445_v56, %v2412_v11  ;;  %v3076_v50 = vmul.f32 %v2975_v28, %v2975_v28 }
 0x212   : > { %v3104_v6 = vadd.f32 %v3103_v48, %v3073_v3  ;;  %v3036_v10 = vadd.f32 %v3035_v59, %v2973_v54  ;;  %v4525_v40 = vpop.f32.mrf.mxu0  ;;  %v2640_v58 = vpop.f32.mrf.mxu1  ;;  %v6643_v54 = vld [vmem:[#allocation40_spill] sm:$0xff] }
 0x213   : > { %3006 = vst [vmem:[%s6250_s8 + $0xc0] sm:$0xff] %v2974_v34  ;;  %v3075_v49 = vmul.f32 %v2974_v34, %v2974_v34  ;;  %v2977_v27 = vadd.f32 %v4525_v40, %v2696_v36  ;;  %v2695_v25 = vadd.f32 %v2640_v58, %v2411_v41  ;;  %v2416_v19 = vadd.f32 %v6643_v54, %v2142_v4 }
 0x214   : > { %v3037_v21 = vadd.f32 %v3036_v10, %v2974_v34  ;;  %v3105_v57 = vadd.f32 %v3104_v6, %v3074_v37  ;;  %v2921_v51 = vpop.f32.mrf.mxu0  ;;  %v4448_v23 = vpop.f32.mrf.mxu1 }
 0x215   : > { %3009 = vst [vmem:[%s6250_s8 + $0xd8] sm:$0xff] %v2977_v27  ;;  %v2976_v12 = vadd.f32 %v2921_v51, %v2695_v25  ;;  %v2698_v29 = vadd.f32 %v4448_v23, %v2414_v39  ;;  %v3078_v24 = vmul.f32 %v2977_v27, %v2977_v27 }
 0x216   : > { %v3106_v31 = vadd.f32 %v3105_v57, %v3075_v49  ;;  %v3038_v9 = vadd.f32 %v3037_v21, %v2975_v28  ;;  %v4528_v2 = vpop.f32.mrf.mxu0  ;;  %v2650_v17 = vpop.f32.mrf.mxu1 }
 0x217   : > { %3008 = vst [vmem:[%s6250_s8 + $0xd0] sm:$0xff] %v2976_v12  ;;  %v3077_v61 = vmul.f32 %v2976_v12, %v2976_v12  ;;  %v2979_v1 = vadd.f32 %v4528_v2, %v2698_v29  ;;  %v2697_v35 = vadd.f32 %v2650_v17, %v2413_v20 }
 0x218   : > { %v3039_v63 = vadd.f32 %v3038_v9, %v2976_v12  ;;  %v3107_v44 = vadd.f32 %v3106_v31, %v3076_v50  ;;  %v2931_v45 = vpop.f32.mrf.mxu0  ;;  %v4451_v53 = vpop.f32.mrf.mxu1 }
 0x219   : > { %3011 = vst [vmem:[%s6250_s8 + $0xe8] sm:$0xff] %v2979_v1  ;;  %v2978_v32 = vadd.f32 %v2931_v45, %v2697_v35  ;;  %v2700_v38 = vadd.f32 %v4451_v53, %v2416_v19  ;;  %v3080_v8 = vmul.f32 %v2979_v1, %v2979_v1 }
 0x21a   : > { %v3108_v46 = vadd.f32 %v3107_v44, %v3077_v61  ;;  %v3040_v13 = vadd.f32 %v3039_v63, %v2977_v27  ;;  %v4531_v60 = vpop.f32.mrf.mxu0  ;;  %v2660_v14 = vpop.f32.mrf.mxu1 }
 0x21b   : > { %3010 = vst [vmem:[%s6250_s8 + $0xe0] sm:$0xff] %v2978_v32  ;;  %v3079_v7 = vmul.f32 %v2978_v32, %v2978_v32  ;;  %v2981_v0 = vadd.f32 %v4531_v60, %v2700_v38  ;;  %v2699_v43 = vadd.f32 %v2660_v14, %v2415_v18 }
 0x21c   : > { %v3041_v47 = vadd.f32 %v3040_v13, %v2978_v32  ;;  %v3109_v11 = vadd.f32 %v3108_v46, %v3078_v24  ;;  %v2941_v3 = vpop.f32.mrf.mxu0 }
 0x21d   : > { %3013 = vst [vmem:[%s6250_s8 + $0xf8] sm:$0xff] %v2981_v0  ;;  %v2980_v28 = vadd.f32 %v2941_v3, %v2699_v43  ;;  %v3082_v41 = vmul.f32 %v2981_v0, %v2981_v0 }
 0x21e   : > { %v3110_v59 = vadd.f32 %v3109_v11, %v3079_v7  ;;  %v3042_v48 = vadd.f32 %v3041_v47, %v2979_v1 }
 0x21f   : > { %3012 = vst [vmem:[%s6250_s8 + $0xf0] sm:$0xff] %v2980_v28  ;;  %v3081_v55 = vmul.f32 %v2980_v28, %v2980_v28 }
 0x220   : > { %v3043_v56 = vadd.f32 %v3042_v48, %v2980_v28  ;;  %v3111_v5 = vadd.f32 %v3110_v59, %v3080_v8 }
 0x222   : > { %v3044_v22 = vadd.f32 %v3043_v56, %v2981_v0  ;;  %v3112_v62 = vadd.f32 %v3111_v5, %v3081_v55 }
 0x224   : > { %v3045_v52 = vrot.slane %v3044_v22, 4  ;;  %v3113_v34 = vadd.f32 %v3112_v62, %v3082_v41 }
 0x226   : > { %v3046_v36 = vadd.f32 %v3045_v52, %v3044_v22  ;;  %v3114_v16 = vrot.slane %v3113_v34, 4 }
 0x228   : > { %v3047_v39 = vrot.slane %v3046_v36, 2  ;;  %v3115_v37 = vadd.f32 %v3114_v16, %v3113_v34 }
 0x22a   : > { %v3048_v6 = vadd.f32 %v3047_v39, %v3046_v36  ;;  %v3116_v10 = vrot.slane %v3115_v37, 2 }
 0x22c   : > { %v3049_v40 = vrot.slane %v3048_v6, 1  ;;  %v3117_v58 = vadd.f32 %v3116_v10, %v3115_v37 }
 0x22e   : > { %v3050_v42 = vadd.f32 %v3049_v40, %v3048_v6  ;;  %v3118_v4 = vrot.slane %v3117_v58, 1 }
 0x230   : > { %v3119_v49 = vadd.f32 %v3118_v4, %v3117_v58  ;;  %3120 = vst [vmem:[%s214_s12] sm:$0xff] %v3050_v42 }
 0x232   : > { %3121 = vst [vmem:[%s218_s17] sm:$0xff] %v3119_v49 }
 0x233 PF: > { %s15_s15 = sadd.s32 1, %s4607_s15  }
 0x234   : > { %p12_p4 = scmp.ge.s32.totalorder %s15_s15, 4  }
 0x236   :  { %14 = sbr.rel (!%p12_p4) target bundleno = 1 (0x1), region = 90 }

</bundles_post_ra>
